<compile_context>
chip_gen: v5e
topology: v5e:2x2
jax: 0.10.0
libtpu: 0.0.40
codegen_flags: <defaults>
</compile_context>

<pallas_src>
import functools

import jax
import jax.numpy as jnp
from jax.experimental import pallas as pl
from jax.experimental.pallas import tpu as pltpu


def _round_up(x, m):
    return ((x + m - 1) // m) * m


def _pick_stripe_height(H, target=8):
    """Largest divisor of H that is <= target (>= 2, else a single stripe)."""
    th = min(target, H)
    while th > 1 and H % th:
        th -= 1
    if th < 2:          # prime H (or H == 1): fall back to one stripe
        th = H
    return th


# ---------------------------------------------------------------------------
# Pallas kernel: one (batch, row-stripe) step of one RPN scale head.
# ---------------------------------------------------------------------------
def _rpn_scale_kernel(x_ref, x_hbm, w1_ref, b1_ref, w2_ref, b2_ref, out_ref,
                      xhalo_ref, xs_ref, fs_ref, sem, *, W, TH, nj):
    # x_ref:     (1, TH, W, Cp)        bf16 core input stripe (auto-pipelined)
    # x_hbm:     (B, H, W, Cp)         bf16 full input in HBM (halo DMAs only)
    # w1_ref:    (3, 3*Cp, C1p)        bf16 conv1 weights, K-stacked over kx
    # b1_ref:    (1, C1p)              f32 conv1 bias (zero in padded lanes)
    # w2_ref:    (3, 3*C1p, Coutp)     bf16 fused [logit|delta] weights
    # b2_ref:    (1, Coutp)            f32 fused bias
    # out_ref:   (1, TH*W, Coutp)      f32 lane-dense fused output stripe
    # xhalo_ref: (4, W, Cp)            VMEM: 2 rows above / 2 rows below stripe
    # xs_ref:    (TH+4, W, 3*Cp)       VMEM: W-shifted channel-stacked input
    # fs_ref:    (TH+2, W, 3*C1p)      VMEM: W-shifted channel-stacked relu(f)
    # sem:       DMA semaphores (2,)
    b = pl.program_id(0)
    j = pl.program_id(1)
    Cp = x_ref.shape[-1]
    C1p = w1_ref.shape[-1]
    row0 = j * TH

    # ---- 1. start the tiny halo DMAs (2 rows above / below the stripe) ----
    def _halo_copy(slot, start_row):
        return pltpu.make_async_copy(
            x_hbm.at[b, pl.ds(start_row, 2)],
            xhalo_ref.at[pl.ds(2 * slot, 2)],
            sem.at[slot])

    if nj > 1:
        @pl.when(j > 0)
        def _():
            _halo_copy(0, row0 - 2).start()

        @pl.when(j < nj - 1)
        def _():
            _halo_copy(1, row0 + TH).start()

    # Rows outside the image are zero (conv SAME padding along H).
    @pl.when(j == 0)
    def _():
        xhalo_ref[0:2] = jnp.zeros((2, W, Cp), xhalo_ref.dtype)

    @pl.when(j == nj - 1)
    def _():
        xhalo_ref[2:4] = jnp.zeros((2, W, Cp), xhalo_ref.dtype)

    # ---- helpers: W-shifted channel-stacked layout --------------------------
    def put_shifted(dst_ref, r0, src, C):
        # dst[r, x, kx*C:(kx+1)*C] = src[r, x + kx - 1]   (kx = 0, 1, 2)
        rows = src.shape[0]
        dst_ref[r0:r0 + rows, :, C:2 * C] = src                        # kx = 1
        dst_ref[r0:r0 + rows, 1:W, 0:C] = src[:, 0:W - 1, :]           # kx = 0
        dst_ref[r0:r0 + rows, 0:W - 1, 2 * C:3 * C] = src[:, 1:W, :]   # kx = 2

    def zero_edge_cols(dst_ref, C):
        # SAME padding along W: column -1 (kx=0 slot) and column W (kx=2 slot).
        R = dst_ref.shape[0]
        z = jnp.zeros((R, 1, C), dst_ref.dtype)
        dst_ref[:, 0:1, 0:C] = z
        dst_ref[:, W - 1:W, 2 * C:3 * C] = z

    # Core rows: already in VMEM via the pipelined BlockSpec block.
    put_shifted(xs_ref, 2, x_ref[0], Cp)

    if nj > 1:
        @pl.when(j > 0)
        def _():
            _halo_copy(0, row0 - 2).wait()

        @pl.when(j < nj - 1)
        def _():
            _halo_copy(1, row0 + TH).wait()

    put_shifted(xs_ref, 0, xhalo_ref[0:2], Cp)
    put_shifted(xs_ref, TH + 2, xhalo_ref[2:4], Cp)
    zero_edge_cols(xs_ref, Cp)

    # ---- 2. K-stacked 3x3 conv: 3 matmuls (one per ky), K = 3*C -------------
    def conv3x3(src_ref, nrows, w_ref, b_ref):
        K = src_ref.shape[-1]
        cout = w_ref.shape[-1]
        acc = jnp.zeros((nrows * W, cout), jnp.float32)
        for ky in range(3):
            blk = src_ref[ky:ky + nrows].reshape(nrows * W, K)
            acc = acc + jnp.dot(blk, w_ref[ky],
                                preferred_element_type=jnp.float32)
        return acc + b_ref[...]

    # conv1 + relu over TH+2 rows (1-row halo each side for conv2).
    f = jnp.maximum(conv3x3(xs_ref, TH + 2, w1_ref, b1_ref), 0.0)
    f = f.astype(fs_ref.dtype).reshape(TH + 2, W, C1p)
    put_shifted(fs_ref, 0, f, C1p)
    zero_edge_cols(fs_ref, C1p)

    # relu(conv1) rows outside the image are zero (conv2 SAME padding in H).
    @pl.when(j == 0)
    def _():
        fs_ref[0:1] = jnp.zeros((1, W, 3 * C1p), fs_ref.dtype)

    @pl.when(j == nj - 1)
    def _():
        fs_ref[TH + 1:TH + 2] = jnp.zeros((1, W, 3 * C1p), fs_ref.dtype)

    # Dropout(p=0.5) in inference mode == identity.
    # Fused second conv: [logits | deltas | pad] -> one lane-dense f32 store.
    out = conv3x3(fs_ref, TH, w2_ref, b2_ref)
    out_ref[...] = out.reshape(1, TH * W, out.shape[-1])


def rpn_scale_forward(x_nhwc, w1s, b1, w2s, b2, *, stripe_target=8,
                      vmem_limit_bytes=None):
    """One RPN scale: x (B, H, W, Cp) bf16 -> fused (B, H*W, Coutp) f32."""
    B, H, W, Cp = x_nhwc.shape
    C1p = w1s.shape[-1]
    Coutp = w2s.shape[-1]
    TH = _pick_stripe_height(H, stripe_target)
    nj = H // TH

    kernel = functools.partial(_rpn_scale_kernel, W=W, TH=TH, nj=nj)

    cp_kwargs = dict(dimension_semantics=("parallel", "parallel"))
    if vmem_limit_bytes is not None:
        # For production sizes (e.g. P2 200x200, Cin=256) budget explicitly,
        # especially on v7x (64 MiB physical VMEM).
        cp_kwargs["vmem_limit_bytes"] = vmem_limit_bytes

    return pl.pallas_call(
        kernel,
        out_shape=jax.ShapeDtypeStruct((B, H * W, Coutp), jnp.float32),
        grid_spec=pltpu.PrefetchScalarGridSpec(
            num_scalar_prefetch=0,
            grid=(B, nj),
            in_specs=[
                # core TH-row stripe: auto-pipelined / double-buffered
                pl.BlockSpec((1, TH, W, Cp), lambda b, j: (b, j, 0, 0)),
                # full input left in HBM: source for the 2-row halo DMAs
                pl.BlockSpec(memory_space=pl.ANY),
                pl.BlockSpec((3, 3 * Cp, C1p), lambda b, j: (0, 0, 0)),
                pl.BlockSpec((1, C1p), lambda b, j: (0, 0)),
                pl.BlockSpec((3, 3 * C1p, Coutp), lambda b, j: (0, 0, 0)),
                pl.BlockSpec((1, Coutp), lambda b, j: (0, 0)),
            ],
            out_specs=pl.BlockSpec((1, TH * W, Coutp), lambda b, j: (b, j, 0)),
            scratch_shapes=[
                pltpu.VMEM((4, W, Cp), jnp.bfloat16),            # halo rows
                pltpu.VMEM((TH + 4, W, 3 * Cp), jnp.bfloat16),   # shifted x
                pltpu.VMEM((TH + 2, W, 3 * C1p), jnp.bfloat16),  # shifted f
                pltpu.SemaphoreType.DMA((2,)),
            ],
        ),
        compiler_params=pltpu.CompilerParams(**cp_kwargs),
    )(x_nhwc, x_nhwc, w1s, b1, w2s, b2)


# ---------------------------------------------------------------------------
# RpnMultiHead (parameter setup + flatten/concat glue in plain JAX)
# ---------------------------------------------------------------------------
class RpnMultiHead:
    def __init__(self, key, in_channels, num_bases):
        self.in_channels = in_channels
        self.num_bases = list(num_bases)
        self.num_scales = len(num_bases)
        self.cin_pad = _round_up(in_channels, 128)   # lane-aligned input chans
        self.params = []         # raw f32 params (pure-JAX reference)
        self.kernel_params = []  # fused / padded / K-stacked bf16 kernel params
        self.head_dims = []      # (Cl, Cd) per scale
        scale = 0.1
        for l in range(self.num_scales):
            c1 = in_channels * 2
            cl = 2 * self.num_bases[l]
            cd = 4 * 2 * self.num_bases[l]
            key, *ks = jax.random.split(key, 7)
            # weights stored as (9, Cin, Cout), tap k = ky*3 + kx (HWIO-flat)
            w1 = scale * jax.random.normal(ks[0], (9, in_channels, c1), jnp.float32)
            b1 = scale * jax.random.normal(ks[1], (1, c1), jnp.float32)
            wl = scale * jax.random.normal(ks[2], (9, c1, cl), jnp.float32)
            bl = scale * jax.random.normal(ks[3], (1, cl), jnp.float32)
            wd = scale * jax.random.normal(ks[4], (9, c1, cd), jnp.float32)
            bd = scale * jax.random.normal(ks[5], (1, cd), jnp.float32)
            self.params.append((w1, b1, wl, bl, wd, bd))

            # --- kernel-side packing (done once, on the host) ---
            cinp = self.cin_pad
            c1p = _round_up(c1, 128)          # production C1=512: 256-aligned
            coutp = _round_up(cl + cd, 128)   # lane-dense fused output width

            # conv1 weights, K-stacked over kx: (3, kx*Cinp + ci, co)
            w1_k = w1.reshape(3, 3, in_channels, c1)
            w1s = jnp.zeros((3, 3, cinp, c1p), jnp.float32)
            w1s = w1s.at[:, :, :in_channels, :c1].set(w1_k)
            w1s = w1s.reshape(3, 3 * cinp, c1p).astype(jnp.bfloat16)
            b1k = jnp.zeros((1, c1p), jnp.float32).at[:, :c1].set(b1)

            # fused [logits | deltas] second conv, K-stacked over kx
            w2 = jnp.concatenate([wl, wd], axis=-1).reshape(3, 3, c1, cl + cd)
            w2s = jnp.zeros((3, 3, c1p, coutp), jnp.float32)
            w2s = w2s.at[:, :, :c1, :cl + cd].set(w2)
            w2s = w2s.reshape(3, 3 * c1p, coutp).astype(jnp.bfloat16)
            b2k = jnp.zeros((1, coutp), jnp.float32).at[:, :cl + cd].set(
                jnp.concatenate([bl, bd], axis=-1))

            self.kernel_params.append((w1s, b1k, w2s, b2k))
            self.head_dims.append((cl, cd))

    def __call__(self, fs_nchw):
        """fs_nchw: list of (B, Cin, H, W) feature maps (one per scale)."""
        batch_size = fs_nchw[0].shape[0]
        logits_flat = []
        deltas_flat = []
        for l in range(self.num_scales):
            # NCHW -> NHWC glue; bf16 inputs (f32 accumulation in kernel).
            x = jnp.transpose(fs_nchw[l], (0, 2, 3, 1)).astype(jnp.bfloat16)
            if self.cin_pad != self.in_channels:
                x = jnp.pad(x, ((0, 0), (0, 0), (0, 0),
                                (0, self.cin_pad - self.in_channels)))
            cl, cd = self.head_dims[l]
            fused = rpn_scale_forward(x, *self.kernel_params[l])
            # Channel-last slicing reproduces permute(0,2,3,1).view(...) exactly.
            logits_flat.append(fused[:, :, :cl].reshape(batch_size, -1, 2))
            deltas_flat.append(
                fused[:, :, cl:cl + cd].reshape(batch_size, -1, 2, 4))
        return (jnp.concatenate(logits_flat, axis=1),
                jnp.concatenate(deltas_flat, axis=1))


# ---------------------------------------------------------------------------
# Pure-JAX reference (same bf16-in / f32-accum numerics as the kernel)
# ---------------------------------------------------------------------------
def _conv3x3_ref(x, w_flat, b):
    w = w_flat.reshape(3, 3, w_flat.shape[1], w_flat.shape[2])  # HWIO
    y = jax.lax.conv_general_dilated(
        x, w, window_strides=(1, 1), padding="SAME",
        dimension_numbers=("NHWC", "HWIO", "NHWC"),
        preferred_element_type=jnp.float32)
    return y + b[0]


def _rpn_ref(fs_nchw, params):
    B = fs_nchw[0].shape[0]
    logits, deltas = [], []
    for l, (w1, b1, wl, bl, wd, bd) in enumerate(params):
        x = jnp.transpose(fs_nchw[l], (0, 2, 3, 1)).astype(jnp.bfloat16)
        f = jnp.maximum(_conv3x3_ref(x, w1.astype(jnp.bfloat16), b1), 0.0)
        f = f.astype(jnp.bfloat16)
        logit = _conv3x3_ref(f, wl.astype(jnp.bfloat16), bl)
        delta = _conv3x3_ref(f, wd.astype(jnp.bfloat16), bd)
        logits.append(logit.reshape(B, -1, 2))
        deltas.append(delta.reshape(B, -1, 2, 4))
    return jnp.concatenate(logits, 1), jnp.concatenate(deltas, 1)


if __name__ == "__main__":
    key = jax.random.PRNGKey(0)

    B = 2
    in_channels = 4
    num_bases = [3, 3]                 # len(rpn_base_aspect_ratios[l]) per scale
    spatial = [(16, 16), (8, 8)]       # small P2/P3-style feature maps
    # (16x16 -> 2 row-stripes per image: exercises both halo DMA paths;
    #  8x8   -> single stripe: exercises both zero-border paths at once.)

    head = RpnMultiHead(jax.random.PRNGKey(1), in_channels, num_bases)

    fs = []
    for (H, W) in spatial:
        key, sub = jax.random.split(key)
        fs.append(jax.random.normal(sub, (B, in_channels, H, W), jnp.float32))

    logits_flat, deltas_flat = head(fs)
    logits_flat = jax.block_until_ready(logits_flat)
    deltas_flat = jax.block_until_ready(deltas_flat)

    N = sum(H * W * nb for (H, W), nb in zip(spatial, num_bases))
    assert logits_flat.shape == (B, N, 2), logits_flat.shape
    assert deltas_flat.shape == (B, N, 2, 4), deltas_flat.shape

    ref_logits, ref_deltas = _rpn_ref(fs, head.params)
    assert jnp.allclose(logits_flat, ref_logits, atol=2e-3, rtol=2e-3)
    assert jnp.allclose(deltas_flat, ref_deltas, atol=2e-3, rtol=2e-3)

    print("KERNEL_OK")
</pallas_src>

<mosaic_0001>
module attributes {stable_mosaic.version = 11 : i64} {
  func.func @_rpn_scale_kernel(%arg0: i32, %arg1: i32, %arg2: memref<1x8x16x128xbf16, #tpu.memory_space<vmem>>, %arg3: memref<2x16x16x128xbf16, #tpu.memory_space<any>>, %arg4: memref<3x384x128xbf16, #tpu.memory_space<vmem>>, %arg5: memref<1x128xf32, #tpu.memory_space<vmem>>, %arg6: memref<3x384x128xbf16, #tpu.memory_space<vmem>>, %arg7: memref<1x128xf32, #tpu.memory_space<vmem>>, %arg8: memref<1x128x128xf32, #tpu.memory_space<vmem>>, %arg9: memref<4x16x128xbf16, #tpu.memory_space<vmem>>, %arg10: memref<12x16x384xbf16, #tpu.memory_space<vmem>>, %arg11: memref<10x16x384xbf16, #tpu.memory_space<vmem>>, %arg12: memref<2x!tpu.dma_semaphore, #tpu.memory_space<semaphore_mem>>) attributes {dimension_semantics = [#tpu.dimension_semantics<parallel>, #tpu.dimension_semantics<parallel>], iteration_bounds = array<i64: 2, 2>, scalar_prefetch = 0 : i64, scratch_operands = 4 : i64, tpu.core_type = #tpu.core_type<tc>, window_params = [{transform_indices = @transform_0, window_bounds = array<i64: 1, 8, 16, 128>}, {}, {pipeline_mode = #tpu.pipeline_mode<synchronous>, transform_indices = @transform_2, window_bounds = array<i64: 3, 384, 128>}, {pipeline_mode = #tpu.pipeline_mode<synchronous>, transform_indices = @transform_3, window_bounds = array<i64: 1, 128>}, {pipeline_mode = #tpu.pipeline_mode<synchronous>, transform_indices = @transform_4, window_bounds = array<i64: 3, 384, 128>}, {pipeline_mode = #tpu.pipeline_mode<synchronous>, transform_indices = @transform_5, window_bounds = array<i64: 1, 128>}, {transform_indices = @transform_6, window_bounds = array<i64: 1, 128, 128>}]} {
    %c8_i32 = arith.constant 8 : i32
    %0 = arith.muli %arg1, %c8_i32 : i32
    %c0_i32 = arith.constant 0 : i32
    %1 = arith.cmpi sgt, %arg1, %c0_i32 : i32
    %2 = arith.extui %1 : i1 to i32
    %c0_i32_0 = arith.constant 0 : i32
    %3 = arith.cmpi ne, %2, %c0_i32_0 : i32
    scf.if %3 {
      %c2_i32 = arith.constant 2 : i32
      %105 = arith.subi %0, %c2_i32 : i32
      %c0_i32_118 = arith.constant 0 : i32
      %c0_i32_119 = arith.constant 0 : i32
      %c0_i32_120 = arith.constant 0 : i32
      %106 = tpu.memref_slice %arg3[%arg0, %105, %c0_i32_119, %c0_i32_120] : memref<2x16x16x128xbf16, #tpu.memory_space<any>> -> memref<1x2x16x128xbf16, #tpu.memory_space<any>>
      %107 = tpu.memref_squeeze %106 : memref<1x2x16x128xbf16, #tpu.memory_space<any>> -> memref<2x16x128xbf16, #tpu.memory_space<any>>
      %c0_i32_121 = arith.constant 0 : i32
      %c0_i32_122 = arith.constant 0 : i32
      %c0_i32_123 = arith.constant 0 : i32
      %108 = tpu.memref_slice %arg9[%c0_i32_121, %c0_i32_122, %c0_i32_123] : memref<4x16x128xbf16, #tpu.memory_space<vmem>> -> memref<2x16x128xbf16, #tpu.memory_space<vmem>>
      %109 = tpu.memref_slice %arg12[%c0_i32_118] : memref<2x!tpu.dma_semaphore, #tpu.memory_space<semaphore_mem>> -> memref<1x!tpu.dma_semaphore, #tpu.memory_space<semaphore_mem>>
      %110 = tpu.memref_squeeze %109 : memref<1x!tpu.dma_semaphore, #tpu.memory_space<semaphore_mem>> -> memref<!tpu.dma_semaphore, #tpu.memory_space<semaphore_mem>>
      tpu.enqueue_dma source(%107 : memref<2x16x128xbf16, #tpu.memory_space<any>>) target(%108 : memref<2x16x128xbf16, #tpu.memory_space<vmem>>) target_semaphore(%110 : memref<!tpu.dma_semaphore, #tpu.memory_space<semaphore_mem>>)
    } else {
    }
    %c1_i32 = arith.constant 1 : i32
    %4 = arith.cmpi slt, %arg1, %c1_i32 : i32
    %5 = arith.extui %4 : i1 to i32
    %c0_i32_1 = arith.constant 0 : i32
    %6 = arith.cmpi ne, %5, %c0_i32_1 : i32
    scf.if %6 {
      %c8_i32_118 = arith.constant 8 : i32
      %105 = arith.addi %0, %c8_i32_118 : i32
      %c1_i32_119 = arith.constant 1 : i32
      %c0_i32_120 = arith.constant 0 : i32
      %c0_i32_121 = arith.constant 0 : i32
      %106 = tpu.memref_slice %arg3[%arg0, %105, %c0_i32_120, %c0_i32_121] : memref<2x16x16x128xbf16, #tpu.memory_space<any>> -> memref<1x2x16x128xbf16, #tpu.memory_space<any>>
      %107 = tpu.memref_squeeze %106 : memref<1x2x16x128xbf16, #tpu.memory_space<any>> -> memref<2x16x128xbf16, #tpu.memory_space<any>>
      %c2_i32 = arith.constant 2 : i32
      %c0_i32_122 = arith.constant 0 : i32
      %c0_i32_123 = arith.constant 0 : i32
      %108 = tpu.memref_slice %arg9[%c2_i32, %c0_i32_122, %c0_i32_123] : memref<4x16x128xbf16, #tpu.memory_space<vmem>> -> memref<2x16x128xbf16, #tpu.memory_space<vmem>>
      %109 = tpu.memref_slice %arg12[%c1_i32_119] : memref<2x!tpu.dma_semaphore, #tpu.memory_space<semaphore_mem>> -> memref<1x!tpu.dma_semaphore, #tpu.memory_space<semaphore_mem>>
      %110 = tpu.memref_squeeze %109 : memref<1x!tpu.dma_semaphore, #tpu.memory_space<semaphore_mem>> -> memref<!tpu.dma_semaphore, #tpu.memory_space<semaphore_mem>>
      tpu.enqueue_dma source(%107 : memref<2x16x128xbf16, #tpu.memory_space<any>>) target(%108 : memref<2x16x128xbf16, #tpu.memory_space<vmem>>) target_semaphore(%110 : memref<!tpu.dma_semaphore, #tpu.memory_space<semaphore_mem>>)
    } else {
    }
    %c0_i32_2 = arith.constant 0 : i32
    %7 = arith.cmpi eq, %arg1, %c0_i32_2 : i32
    %8 = arith.extui %7 : i1 to i32
    %c0_i32_3 = arith.constant 0 : i32
    %9 = arith.cmpi ne, %8, %c0_i32_3 : i32
    scf.if %9 {
      %cst_118 = arith.constant 0.000000e+00 : bf16
      %105 = vector.broadcast %cst_118 : bf16 to vector<2x16x128xbf16>
      %c0_119 = arith.constant 0 : index
      %c0_120 = arith.constant 0 : index
      %c0_121 = arith.constant 0 : index
      %106 = vector.load %arg9[%c0_119, %c0_120, %c0_121] : memref<4x16x128xbf16, #tpu.memory_space<vmem>>, vector<2x16x128xbf16>
      tpu.vector_store %arg9[%c0_119, %c0_120, %c0_121], %105 {strides = array<i32>} : memref<4x16x128xbf16, #tpu.memory_space<vmem>>, vector<2x16x128xbf16>,
    } else {
    }
    %c1_i32_4 = arith.constant 1 : i32
    %10 = arith.cmpi eq, %arg1, %c1_i32_4 : i32
    %11 = arith.extui %10 : i1 to i32
    %c0_i32_5 = arith.constant 0 : i32
    %12 = arith.cmpi ne, %11, %c0_i32_5 : i32
    scf.if %12 {
      %cst_118 = arith.constant 0.000000e+00 : bf16
      %105 = vector.broadcast %cst_118 : bf16 to vector<2x16x128xbf16>
      %c2_119 = arith.constant 2 : index
      %c0_120 = arith.constant 0 : index
      %c0_121 = arith.constant 0 : index
      %106 = vector.load %arg9[%c2_119, %c0_120, %c0_121] : memref<4x16x128xbf16, #tpu.memory_space<vmem>>, vector<2x16x128xbf16>
      tpu.vector_store %arg9[%c2_119, %c0_120, %c0_121], %105 {strides = array<i32>} : memref<4x16x128xbf16, #tpu.memory_space<vmem>>, vector<2x16x128xbf16>,
    } else {
    }
    %c0 = arith.constant 0 : index
    %c0_6 = arith.constant 0 : index
    %c0_7 = arith.constant 0 : index
    %c0_8 = arith.constant 0 : index
    %13 = vector.load %arg2[%c0, %c0_6, %c0_7, %c0_8] : memref<1x8x16x128xbf16, #tpu.memory_space<vmem>>, vector<1x8x16x128xbf16>
    %14 = vector.shape_cast %13 : vector<1x8x16x128xbf16> to vector<8x16x128xbf16>
    %c2 = arith.constant 2 : index
    %c0_9 = arith.constant 0 : index
    %c128 = arith.constant 128 : index
    %15 = vector.load %arg10[%c2, %c0_9, %c128] : memref<12x16x384xbf16, #tpu.memory_space<vmem>>, vector<8x16x128xbf16>
    tpu.vector_store %arg10[%c2, %c0_9, %c128], %14 {strides = array<i32>} : memref<12x16x384xbf16, #tpu.memory_space<vmem>>, vector<8x16x128xbf16>,
    %16 = vector.extract_strided_slice %14 {offsets = [0, 0, 0], sizes = [8, 15, 128], strides = [1, 1, 1]} : vector<8x16x128xbf16> to vector<8x15x128xbf16>
    %c2_10 = arith.constant 2 : index
    %c1 = arith.constant 1 : index
    %c0_11 = arith.constant 0 : index
    %17 = vector.load %arg10[%c2_10, %c1, %c0_11] : memref<12x16x384xbf16, #tpu.memory_space<vmem>>, vector<8x15x128xbf16>
    tpu.vector_store %arg10[%c2_10, %c1, %c0_11], %16 {strides = array<i32>} : memref<12x16x384xbf16, #tpu.memory_space<vmem>>, vector<8x15x128xbf16>,
    %18 = vector.extract_strided_slice %14 {offsets = [0, 1, 0], sizes = [8, 15, 128], strides = [1, 1, 1]} : vector<8x16x128xbf16> to vector<8x15x128xbf16>
    %c2_12 = arith.constant 2 : index
    %c0_13 = arith.constant 0 : index
    %c256 = arith.constant 256 : index
    %19 = vector.load %arg10[%c2_12, %c0_13, %c256] : memref<12x16x384xbf16, #tpu.memory_space<vmem>>, vector<8x15x128xbf16>
    tpu.vector_store %arg10[%c2_12, %c0_13, %c256], %18 {strides = array<i32>} : memref<12x16x384xbf16, #tpu.memory_space<vmem>>, vector<8x15x128xbf16>,
    %c0_i32_14 = arith.constant 0 : i32
    %20 = arith.cmpi sgt, %arg1, %c0_i32_14 : i32
    %21 = arith.extui %20 : i1 to i32
    %c0_i32_15 = arith.constant 0 : i32
    %22 = arith.cmpi ne, %21, %c0_i32_15 : i32
    scf.if %22 {
      %c2_i32 = arith.constant 2 : i32
      %105 = arith.subi %0, %c2_i32 : i32
      %c0_i32_118 = arith.constant 0 : i32
      %c0_i32_119 = arith.constant 0 : i32
      %c0_i32_120 = arith.constant 0 : i32
      %106 = tpu.memref_slice %arg3[%arg0, %105, %c0_i32_119, %c0_i32_120] : memref<2x16x16x128xbf16, #tpu.memory_space<any>> -> memref<1x2x16x128xbf16, #tpu.memory_space<any>>
      %107 = tpu.memref_squeeze %106 : memref<1x2x16x128xbf16, #tpu.memory_space<any>> -> memref<2x16x128xbf16, #tpu.memory_space<any>>
      %c0_i32_121 = arith.constant 0 : i32
      %c0_i32_122 = arith.constant 0 : i32
      %c0_i32_123 = arith.constant 0 : i32
      %108 = tpu.memref_slice %arg9[%c0_i32_121, %c0_i32_122, %c0_i32_123] : memref<4x16x128xbf16, #tpu.memory_space<vmem>> -> memref<2x16x128xbf16, #tpu.memory_space<vmem>>
      %109 = tpu.memref_slice %arg12[%c0_i32_118] : memref<2x!tpu.dma_semaphore, #tpu.memory_space<semaphore_mem>> -> memref<1x!tpu.dma_semaphore, #tpu.memory_space<semaphore_mem>>
      %110 = tpu.memref_squeeze %109 : memref<1x!tpu.dma_semaphore, #tpu.memory_space<semaphore_mem>> -> memref<!tpu.dma_semaphore, #tpu.memory_space<semaphore_mem>>
      tpu.wait_dma2 semaphore(%110 : memref<!tpu.dma_semaphore, #tpu.memory_space<semaphore_mem>>) src(%107 : memref<2x16x128xbf16, #tpu.memory_space<any>>) dst(%108 : memref<2x16x128xbf16, #tpu.memory_space<vmem>>)
    } else {
    }
    %c1_i32_16 = arith.constant 1 : i32
    %23 = arith.cmpi slt, %arg1, %c1_i32_16 : i32
    %24 = arith.extui %23 : i1 to i32
    %c0_i32_17 = arith.constant 0 : i32
    %25 = arith.cmpi ne, %24, %c0_i32_17 : i32
    scf.if %25 {
      %c8_i32_118 = arith.constant 8 : i32
      %105 = arith.addi %0, %c8_i32_118 : i32
      %c1_i32_119 = arith.constant 1 : i32
      %c0_i32_120 = arith.constant 0 : i32
      %c0_i32_121 = arith.constant 0 : i32
      %106 = tpu.memref_slice %arg3[%arg0, %105, %c0_i32_120, %c0_i32_121] : memref<2x16x16x128xbf16, #tpu.memory_space<any>> -> memref<1x2x16x128xbf16, #tpu.memory_space<any>>
      %107 = tpu.memref_squeeze %106 : memref<1x2x16x128xbf16, #tpu.memory_space<any>> -> memref<2x16x128xbf16, #tpu.memory_space<any>>
      %c2_i32 = arith.constant 2 : i32
      %c0_i32_122 = arith.constant 0 : i32
      %c0_i32_123 = arith.constant 0 : i32
      %108 = tpu.memref_slice %arg9[%c2_i32, %c0_i32_122, %c0_i32_123] : memref<4x16x128xbf16, #tpu.memory_space<vmem>> -> memref<2x16x128xbf16, #tpu.memory_space<vmem>>
      %109 = tpu.memref_slice %arg12[%c1_i32_119] : memref<2x!tpu.dma_semaphore, #tpu.memory_space<semaphore_mem>> -> memref<1x!tpu.dma_semaphore, #tpu.memory_space<semaphore_mem>>
      %110 = tpu.memref_squeeze %109 : memref<1x!tpu.dma_semaphore, #tpu.memory_space<semaphore_mem>> -> memref<!tpu.dma_semaphore, #tpu.memory_space<semaphore_mem>>
      tpu.wait_dma2 semaphore(%110 : memref<!tpu.dma_semaphore, #tpu.memory_space<semaphore_mem>>) src(%107 : memref<2x16x128xbf16, #tpu.memory_space<any>>) dst(%108 : memref<2x16x128xbf16, #tpu.memory_space<vmem>>)
    } else {
    }
    %c0_18 = arith.constant 0 : index
    %c0_19 = arith.constant 0 : index
    %c0_20 = arith.constant 0 : index
    %26 = vector.load %arg9[%c0_18, %c0_19, %c0_20] : memref<4x16x128xbf16, #tpu.memory_space<vmem>>, vector<2x16x128xbf16>
    %c0_21 = arith.constant 0 : index
    %c0_22 = arith.constant 0 : index
    %c128_23 = arith.constant 128 : index
    %27 = vector.load %arg10[%c0_21, %c0_22, %c128_23] : memref<12x16x384xbf16, #tpu.memory_space<vmem>>, vector<2x16x128xbf16>
    tpu.vector_store %arg10[%c0_21, %c0_22, %c128_23], %26 {strides = array<i32>} : memref<12x16x384xbf16, #tpu.memory_space<vmem>>, vector<2x16x128xbf16>,
    %28 = vector.extract_strided_slice %26 {offsets = [0, 0, 0], sizes = [2, 15, 128], strides = [1, 1, 1]} : vector<2x16x128xbf16> to vector<2x15x128xbf16>
    %c0_24 = arith.constant 0 : index
    %c1_25 = arith.constant 1 : index
    %c0_26 = arith.constant 0 : index
    %29 = vector.load %arg10[%c0_24, %c1_25, %c0_26] : memref<12x16x384xbf16, #tpu.memory_space<vmem>>, vector<2x15x128xbf16>
    tpu.vector_store %arg10[%c0_24, %c1_25, %c0_26], %28 {strides = array<i32>} : memref<12x16x384xbf16, #tpu.memory_space<vmem>>, vector<2x15x128xbf16>,
    %30 = vector.extract_strided_slice %26 {offsets = [0, 1, 0], sizes = [2, 15, 128], strides = [1, 1, 1]} : vector<2x16x128xbf16> to vector<2x15x128xbf16>
    %c0_27 = arith.constant 0 : index
    %c0_28 = arith.constant 0 : index
    %c256_29 = arith.constant 256 : index
    %31 = vector.load %arg10[%c0_27, %c0_28, %c256_29] : memref<12x16x384xbf16, #tpu.memory_space<vmem>>, vector<2x15x128xbf16>
    tpu.vector_store %arg10[%c0_27, %c0_28, %c256_29], %30 {strides = array<i32>} : memref<12x16x384xbf16, #tpu.memory_space<vmem>>, vector<2x15x128xbf16>,
    %c2_30 = arith.constant 2 : index
    %c0_31 = arith.constant 0 : index
    %c0_32 = arith.constant 0 : index
    %32 = vector.load %arg9[%c2_30, %c0_31, %c0_32] : memref<4x16x128xbf16, #tpu.memory_space<vmem>>, vector<2x16x128xbf16>
    %c10 = arith.constant 10 : index
    %c0_33 = arith.constant 0 : index
    %c128_34 = arith.constant 128 : index
    %33 = vector.load %arg10[%c10, %c0_33, %c128_34] : memref<12x16x384xbf16, #tpu.memory_space<vmem>>, vector<2x16x128xbf16>
    tpu.vector_store %arg10[%c10, %c0_33, %c128_34], %32 {strides = array<i32>} : memref<12x16x384xbf16, #tpu.memory_space<vmem>>, vector<2x16x128xbf16>,
    %34 = vector.extract_strided_slice %32 {offsets = [0, 0, 0], sizes = [2, 15, 128], strides = [1, 1, 1]} : vector<2x16x128xbf16> to vector<2x15x128xbf16>
    %c10_35 = arith.constant 10 : index
    %c1_36 = arith.constant 1 : index
    %c0_37 = arith.constant 0 : index
    %35 = vector.load %arg10[%c10_35, %c1_36, %c0_37] : memref<12x16x384xbf16, #tpu.memory_space<vmem>>, vector<2x15x128xbf16>
    tpu.vector_store %arg10[%c10_35, %c1_36, %c0_37], %34 {strides = array<i32>} : memref<12x16x384xbf16, #tpu.memory_space<vmem>>, vector<2x15x128xbf16>,
    %36 = vector.extract_strided_slice %32 {offsets = [0, 1, 0], sizes = [2, 15, 128], strides = [1, 1, 1]} : vector<2x16x128xbf16> to vector<2x15x128xbf16>
    %c10_38 = arith.constant 10 : index
    %c0_39 = arith.constant 0 : index
    %c256_40 = arith.constant 256 : index
    %37 = vector.load %arg10[%c10_38, %c0_39, %c256_40] : memref<12x16x384xbf16, #tpu.memory_space<vmem>>, vector<2x15x128xbf16>
    tpu.vector_store %arg10[%c10_38, %c0_39, %c256_40], %36 {strides = array<i32>} : memref<12x16x384xbf16, #tpu.memory_space<vmem>>, vector<2x15x128xbf16>,
    %cst = arith.constant 0.000000e+00 : bf16
    %38 = vector.broadcast %cst : bf16 to vector<12x1x128xbf16>
    %c0_41 = arith.constant 0 : index
    %c0_42 = arith.constant 0 : index
    %c0_43 = arith.constant 0 : index
    %39 = vector.load %arg10[%c0_41, %c0_42, %c0_43] : memref<12x16x384xbf16, #tpu.memory_space<vmem>>, vector<12x1x128xbf16>
    tpu.vector_store %arg10[%c0_41, %c0_42, %c0_43], %38 {strides = array<i32>} : memref<12x16x384xbf16, #tpu.memory_space<vmem>>, vector<12x1x128xbf16>,
    %c0_44 = arith.constant 0 : index
    %c15 = arith.constant 15 : index
    %c256_45 = arith.constant 256 : index
    %40 = vector.load %arg10[%c0_44, %c15, %c256_45] : memref<12x16x384xbf16, #tpu.memory_space<vmem>>, vector<12x1x128xbf16>
    tpu.vector_store %arg10[%c0_44, %c15, %c256_45], %38 {strides = array<i32>} : memref<12x16x384xbf16, #tpu.memory_space<vmem>>, vector<12x1x128xbf16>,
    %cst_46 = arith.constant 0.000000e+00 : f32
    %41 = vector.broadcast %cst_46 : f32 to vector<160x128xf32>
    %c0_47 = arith.constant 0 : index
    %c0_48 = arith.constant 0 : index
    %c0_49 = arith.constant 0 : index
    %42 = vector.load %arg10[%c0_47, %c0_48, %c0_49] : memref<12x16x384xbf16, #tpu.memory_space<vmem>>, vector<10x16x384xbf16>
    %43 = vector.shape_cast %42 : vector<10x16x384xbf16> to vector<160x384xbf16>
    %c0_50 = arith.constant 0 : index
    %c0_51 = arith.constant 0 : index
    %c0_52 = arith.constant 0 : index
    %44 = vector.load %arg4[%c0_50, %c0_51, %c0_52] : memref<3x384x128xbf16, #tpu.memory_space<vmem>>, vector<1x384x128xbf16>
    %45 = vector.shape_cast %44 : vector<1x384x128xbf16> to vector<384x128xbf16>
    %cst_53 = arith.constant dense<0.000000e+00> : vector<160x128xf32>
    %46 = tpu.matmul %43, %45, %cst_53 {dimension_numbers = #tpu.dot_dimension_numbers<[1], [0], [0], [1], [0, 0, 1, 1], [], []>} : vector<160x384xbf16>, vector<384x128xbf16>, vector<160x128xf32> -> vector<160x128xf32>
    %47 = arith.addf %41, %46 : vector<160x128xf32>
    %c1_54 = arith.constant 1 : index
    %c0_55 = arith.constant 0 : index
    %c0_56 = arith.constant 0 : index
    %48 = vector.load %arg10[%c1_54, %c0_55, %c0_56] : memref<12x16x384xbf16, #tpu.memory_space<vmem>>, vector<10x16x384xbf16>
    %49 = vector.shape_cast %48 : vector<10x16x384xbf16> to vector<160x384xbf16>
    %c1_57 = arith.constant 1 : index
    %c0_58 = arith.constant 0 : index
    %c0_59 = arith.constant 0 : index
    %50 = vector.load %arg4[%c1_57, %c0_58, %c0_59] : memref<3x384x128xbf16, #tpu.memory_space<vmem>>, vector<1x384x128xbf16>
    %51 = vector.shape_cast %50 : vector<1x384x128xbf16> to vector<384x128xbf16>
    %cst_60 = arith.constant dense<0.000000e+00> : vector<160x128xf32>
    %52 = tpu.matmul %49, %51, %cst_60 {dimension_numbers = #tpu.dot_dimension_numbers<[1], [0], [0], [1], [0, 0, 1, 1], [], []>} : vector<160x384xbf16>, vector<384x128xbf16>, vector<160x128xf32> -> vector<160x128xf32>
    %53 = arith.addf %47, %52 : vector<160x128xf32>
    %c2_61 = arith.constant 2 : index
    %c0_62 = arith.constant 0 : index
    %c0_63 = arith.constant 0 : index
    %54 = vector.load %arg10[%c2_61, %c0_62, %c0_63] : memref<12x16x384xbf16, #tpu.memory_space<vmem>>, vector<10x16x384xbf16>
    %55 = vector.shape_cast %54 : vector<10x16x384xbf16> to vector<160x384xbf16>
    %c2_64 = arith.constant 2 : index
    %c0_65 = arith.constant 0 : index
    %c0_66 = arith.constant 0 : index
    %56 = vector.load %arg4[%c2_64, %c0_65, %c0_66] : memref<3x384x128xbf16, #tpu.memory_space<vmem>>, vector<1x384x128xbf16>
    %57 = vector.shape_cast %56 : vector<1x384x128xbf16> to vector<384x128xbf16>
    %cst_67 = arith.constant dense<0.000000e+00> : vector<160x128xf32>
    %58 = tpu.matmul %55, %57, %cst_67 {dimension_numbers = #tpu.dot_dimension_numbers<[1], [0], [0], [1], [0, 0, 1, 1], [], []>} : vector<160x384xbf16>, vector<384x128xbf16>, vector<160x128xf32> -> vector<160x128xf32>
    %59 = arith.addf %53, %58 : vector<160x128xf32>
    %c0_68 = arith.constant 0 : index
    %c0_69 = arith.constant 0 : index
    %60 = vector.load %arg5[%c0_68, %c0_69] : memref<1x128xf32, #tpu.memory_space<vmem>>, vector<1x128xf32>
    %61 = vector.broadcast %60 : vector<1x128xf32> to vector<160x128xf32>
    %62 = arith.addf %59, %61 : vector<160x128xf32>
    %cst_70 = arith.constant 0.000000e+00 : f32
    %63 = vector.broadcast %cst_70 : f32 to vector<160x128xf32>
    %64 = arith.maximumf %62, %63 : vector<160x128xf32>
    %65 = arith.truncf %64 : vector<160x128xf32> to vector<160x128xbf16>
    %66 = vector.shape_cast %65 : vector<160x128xbf16> to vector<10x16x128xbf16>
    %c0_71 = arith.constant 0 : index
    %c0_72 = arith.constant 0 : index
    %c128_73 = arith.constant 128 : index
    %67 = vector.load %arg11[%c0_71, %c0_72, %c128_73] : memref<10x16x384xbf16, #tpu.memory_space<vmem>>, vector<10x16x128xbf16>
    tpu.vector_store %arg11[%c0_71, %c0_72, %c128_73], %66 {strides = array<i32>} : memref<10x16x384xbf16, #tpu.memory_space<vmem>>, vector<10x16x128xbf16>,
    %68 = vector.extract_strided_slice %66 {offsets = [0, 0, 0], sizes = [10, 15, 128], strides = [1, 1, 1]} : vector<10x16x128xbf16> to vector<10x15x128xbf16>
    %c0_74 = arith.constant 0 : index
    %c1_75 = arith.constant 1 : index
    %c0_76 = arith.constant 0 : index
    %69 = vector.load %arg11[%c0_74, %c1_75, %c0_76] : memref<10x16x384xbf16, #tpu.memory_space<vmem>>, vector<10x15x128xbf16>
    tpu.vector_store %arg11[%c0_74, %c1_75, %c0_76], %68 {strides = array<i32>} : memref<10x16x384xbf16, #tpu.memory_space<vmem>>, vector<10x15x128xbf16>,
    %70 = vector.extract_strided_slice %66 {offsets = [0, 1, 0], sizes = [10, 15, 128], strides = [1, 1, 1]} : vector<10x16x128xbf16> to vector<10x15x128xbf16>
    %c0_77 = arith.constant 0 : index
    %c0_78 = arith.constant 0 : index
    %c256_79 = arith.constant 256 : index
    %71 = vector.load %arg11[%c0_77, %c0_78, %c256_79] : memref<10x16x384xbf16, #tpu.memory_space<vmem>>, vector<10x15x128xbf16>
    tpu.vector_store %arg11[%c0_77, %c0_78, %c256_79], %70 {strides = array<i32>} : memref<10x16x384xbf16, #tpu.memory_space<vmem>>, vector<10x15x128xbf16>,
    %cst_80 = arith.constant 0.000000e+00 : bf16
    %72 = vector.broadcast %cst_80 : bf16 to vector<10x1x128xbf16>
    %c0_81 = arith.constant 0 : index
    %c0_82 = arith.constant 0 : index
    %c0_83 = arith.constant 0 : index
    %73 = vector.load %arg11[%c0_81, %c0_82, %c0_83] : memref<10x16x384xbf16, #tpu.memory_space<vmem>>, vector<10x1x128xbf16>
    tpu.vector_store %arg11[%c0_81, %c0_82, %c0_83], %72 {strides = array<i32>} : memref<10x16x384xbf16, #tpu.memory_space<vmem>>, vector<10x1x128xbf16>,
    %c0_84 = arith.constant 0 : index
    %c15_85 = arith.constant 15 : index
    %c256_86 = arith.constant 256 : index
    %74 = vector.load %arg11[%c0_84, %c15_85, %c256_86] : memref<10x16x384xbf16, #tpu.memory_space<vmem>>, vector<10x1x128xbf16>
    tpu.vector_store %arg11[%c0_84, %c15_85, %c256_86], %72 {strides = array<i32>} : memref<10x16x384xbf16, #tpu.memory_space<vmem>>, vector<10x1x128xbf16>,
    %c0_i32_87 = arith.constant 0 : i32
    %75 = arith.cmpi eq, %arg1, %c0_i32_87 : i32
    %76 = arith.extui %75 : i1 to i32
    %c0_i32_88 = arith.constant 0 : i32
    %77 = arith.cmpi ne, %76, %c0_i32_88 : i32
    scf.if %77 {
      %cst_118 = arith.constant 0.000000e+00 : bf16
      %105 = vector.broadcast %cst_118 : bf16 to vector<1x16x384xbf16>
      %c0_119 = arith.constant 0 : index
      %c0_120 = arith.constant 0 : index
      %c0_121 = arith.constant 0 : index
      %106 = vector.load %arg11[%c0_119, %c0_120, %c0_121] : memref<10x16x384xbf16, #tpu.memory_space<vmem>>, vector<1x16x384xbf16>
      tpu.vector_store %arg11[%c0_119, %c0_120, %c0_121], %105 {strides = array<i32>} : memref<10x16x384xbf16, #tpu.memory_space<vmem>>, vector<1x16x384xbf16>,
    } else {
    }
    %c1_i32_89 = arith.constant 1 : i32
    %78 = arith.cmpi eq, %arg1, %c1_i32_89 : i32
    %79 = arith.extui %78 : i1 to i32
    %c0_i32_90 = arith.constant 0 : i32
    %80 = arith.cmpi ne, %79, %c0_i32_90 : i32
    scf.if %80 {
      %cst_118 = arith.constant 0.000000e+00 : bf16
      %105 = vector.broadcast %cst_118 : bf16 to vector<1x16x384xbf16>
      %c9 = arith.constant 9 : index
      %c0_119 = arith.constant 0 : index
      %c0_120 = arith.constant 0 : index
      %106 = vector.load %arg11[%c9, %c0_119, %c0_120] : memref<10x16x384xbf16, #tpu.memory_space<vmem>>, vector<1x16x384xbf16>
      tpu.vector_store %arg11[%c9, %c0_119, %c0_120], %105 {strides = array<i32>} : memref<10x16x384xbf16, #tpu.memory_space<vmem>>, vector<1x16x384xbf16>,
    } else {
    }
    %cst_91 = arith.constant 0.000000e+00 : f32
    %81 = vector.broadcast %cst_91 : f32 to vector<128x128xf32>
    %c0_92 = arith.constant 0 : index
    %c0_93 = arith.constant 0 : index
    %c0_94 = arith.constant 0 : index
    %82 = vector.load %arg11[%c0_92, %c0_93, %c0_94] : memref<10x16x384xbf16, #tpu.memory_space<vmem>>, vector<8x16x384xbf16>
    %83 = vector.shape_cast %82 : vector<8x16x384xbf16> to vector<128x384xbf16>
    %c0_95 = arith.constant 0 : index
    %c0_96 = arith.constant 0 : index
    %c0_97 = arith.constant 0 : index
    %84 = vector.load %arg6[%c0_95, %c0_96, %c0_97] : memref<3x384x128xbf16, #tpu.memory_space<vmem>>, vector<1x384x128xbf16>
    %85 = vector.shape_cast %84 : vector<1x384x128xbf16> to vector<384x128xbf16>
    %cst_98 = arith.constant dense<0.000000e+00> : vector<128x128xf32>
    %86 = tpu.matmul %83, %85, %cst_98 {dimension_numbers = #tpu.dot_dimension_numbers<[1], [0], [0], [1], [0, 0, 1, 1], [], []>} : vector<128x384xbf16>, vector<384x128xbf16>, vector<128x128xf32> -> vector<128x128xf32>
    %87 = arith.addf %81, %86 : vector<128x128xf32>
    %c1_99 = arith.constant 1 : index
    %c0_100 = arith.constant 0 : index
    %c0_101 = arith.constant 0 : index
    %88 = vector.load %arg11[%c1_99, %c0_100, %c0_101] : memref<10x16x384xbf16, #tpu.memory_space<vmem>>, vector<8x16x384xbf16>
    %89 = vector.shape_cast %88 : vector<8x16x384xbf16> to vector<128x384xbf16>
    %c1_102 = arith.constant 1 : index
    %c0_103 = arith.constant 0 : index
    %c0_104 = arith.constant 0 : index
    %90 = vector.load %arg6[%c1_102, %c0_103, %c0_104] : memref<3x384x128xbf16, #tpu.memory_space<vmem>>, vector<1x384x128xbf16>
    %91 = vector.shape_cast %90 : vector<1x384x128xbf16> to vector<384x128xbf16>
    %cst_105 = arith.constant dense<0.000000e+00> : vector<128x128xf32>
    %92 = tpu.matmul %89, %91, %cst_105 {dimension_numbers = #tpu.dot_dimension_numbers<[1], [0], [0], [1], [0, 0, 1, 1], [], []>} : vector<128x384xbf16>, vector<384x128xbf16>, vector<128x128xf32> -> vector<128x128xf32>
    %93 = arith.addf %87, %92 : vector<128x128xf32>
    %c2_106 = arith.constant 2 : index
    %c0_107 = arith.constant 0 : index
    %c0_108 = arith.constant 0 : index
    %94 = vector.load %arg11[%c2_106, %c0_107, %c0_108] : memref<10x16x384xbf16, #tpu.memory_space<vmem>>, vector<8x16x384xbf16>
    %95 = vector.shape_cast %94 : vector<8x16x384xbf16> to vector<128x384xbf16>
    %c2_109 = arith.constant 2 : index
    %c0_110 = arith.constant 0 : index
    %c0_111 = arith.constant 0 : index
    %96 = vector.load %arg6[%c2_109, %c0_110, %c0_111] : memref<3x384x128xbf16, #tpu.memory_space<vmem>>, vector<1x384x128xbf16>
    %97 = vector.shape_cast %96 : vector<1x384x128xbf16> to vector<384x128xbf16>
    %cst_112 = arith.constant dense<0.000000e+00> : vector<128x128xf32>
    %98 = tpu.matmul %95, %97, %cst_112 {dimension_numbers = #tpu.dot_dimension_numbers<[1], [0], [0], [1], [0, 0, 1, 1], [], []>} : vector<128x384xbf16>, vector<384x128xbf16>, vector<128x128xf32> -> vector<128x128xf32>
    %99 = arith.addf %93, %98 : vector<128x128xf32>
    %c0_113 = arith.constant 0 : index
    %c0_114 = arith.constant 0 : index
    %100 = vector.load %arg7[%c0_113, %c0_114] : memref<1x128xf32, #tpu.memory_space<vmem>>, vector<1x128xf32>
    %101 = vector.broadcast %100 : vector<1x128xf32> to vector<128x128xf32>
    %102 = arith.addf %99, %101 : vector<128x128xf32>
    %103 = vector.shape_cast %102 : vector<128x128xf32> to vector<1x128x128xf32>
    %c0_115 = arith.constant 0 : index
    %c0_116 = arith.constant 0 : index
    %c0_117 = arith.constant 0 : index
    %104 = vector.load %arg8[%c0_115, %c0_116, %c0_117] : memref<1x128x128xf32, #tpu.memory_space<vmem>>, vector<1x128x128xf32>
    tpu.vector_store %arg8[%c0_115, %c0_116, %c0_117], %103 {strides = array<i32>} : memref<1x128x128xf32, #tpu.memory_space<vmem>>, vector<1x128x128xf32>,
    return
  }
  func.func @transform_0(%arg0: i32, %arg1: i32) -> (i32, i32, i32, i32) {
    %c0_i32 = arith.constant 0 : i32
    %c0_i32_0 = arith.constant 0 : i32
    %c0_i32_1 = arith.constant 0 : i32
    return %arg0, %arg1, %c0_i32, %c0_i32_0 : i32, i32, i32, i32
  }
  func.func @transform_2(%arg0: i32, %arg1: i32) -> (i32, i32, i32) {
    %c0_i32 = arith.constant 0 : i32
    %c0_i32_0 = arith.constant 0 : i32
    %c0_i32_1 = arith.constant 0 : i32
    %c0_i32_2 = arith.constant 0 : i32
    return %c0_i32, %c0_i32_0, %c0_i32_1 : i32, i32, i32
  }
  func.func @transform_3(%arg0: i32, %arg1: i32) -> (i32, i32) {
    %c0_i32 = arith.constant 0 : i32
    %c0_i32_0 = arith.constant 0 : i32
    %c0_i32_1 = arith.constant 0 : i32
    return %c0_i32, %c0_i32_0 : i32, i32
  }
  func.func @transform_4(%arg0: i32, %arg1: i32) -> (i32, i32, i32) {
    %c0_i32 = arith.constant 0 : i32
    %c0_i32_0 = arith.constant 0 : i32
    %c0_i32_1 = arith.constant 0 : i32
    %c0_i32_2 = arith.constant 0 : i32
    return %c0_i32, %c0_i32_0, %c0_i32_1 : i32, i32, i32
  }
  func.func @transform_5(%arg0: i32, %arg1: i32) -> (i32, i32) {
    %c0_i32 = arith.constant 0 : i32
    %c0_i32_0 = arith.constant 0 : i32
    %c0_i32_1 = arith.constant 0 : i32
    return %c0_i32, %c0_i32_0 : i32, i32
  }
  func.func @transform_6(%arg0: i32, %arg1: i32) -> (i32, i32, i32) {
    %c0_i32 = arith.constant 0 : i32
    %c0_i32_0 = arith.constant 0 : i32
    return %arg0, %arg1, %c0_i32 : i32, i32, i32
  }
}

</mosaic_0001>

<bundles_post_ra>
// kernel: tpu_custom_call.1
= control target key start
LH: loop header
LB: loop body
LE: loop exit
PB: predicated region body
PF: predicated region fallthrough
CT: control target
= control target key end

     0   :  { %s8305_s0 = inlined_call_operand.hbm [shape: bf16[2,16,16,128], index: 0, kind: input, shape index: {}]   ;;  %s8306_s1 = inlined_call_operand.hbm [shape: bf16[2,16,16,128], index: 1, kind: input, shape index: {}]   ;;  %s8307_s2 = inlined_call_operand.hbm [shape: bf16[3,384,128], index: 2, kind: input, shape index: {}]   ;;  %s8308_s3 = inlined_call_operand.vmem [shape: f32[1,128], index: 3, kind: input, shape index: {}]   ;;  %s8309_s4 = inlined_call_operand.hbm [shape: bf16[3,384,128], index: 4, kind: input, shape index: {}]   ;;  %s8310_s5 = inlined_call_operand.vmem [shape: f32[1,128], index: 5, kind: input, shape index: {}]   ;;  %s8311_s6 = inlined_call_operand.hbm [shape: f32[2,256,128], index: 6, kind: output, shape index: {}]  }
   0x1   :  { %8327 = sst [smem:[#allocation29_spill]] %s8307_s2 }
   0x2   :  { %8328 = sst [smem:[#allocation30_spill]] %s8308_s3 }
   0x3   :  { %8329 = sst [smem:[#allocation31_spill]] %s8309_s4 }
   0x4   :  { %8330 = sst [smem:[#allocation32_spill]] %s8310_s5 }
   0x5   :  { %8331 = sst [smem:[#allocation33_spill]] %s8311_s6 }
   0x6   :  { %11 = vsyncpa [#allocation7], 0 }
   0x7   :  { %13 = vsyncpa [#allocation7 + $0x1], 0 }
   0x8   :  { %14 = vsyncpa [#allocation10], 0 }
   0x9   :  { %15 = vsyncpa [#allocation8], 0 }
   0xa   :  { %17 = vsyncpa [#allocation8 + $0x1], 0  ;;  %s6948_s21 = smov 0   ;;  %s6950_s22 = smov 0  }
   0xb   :  { %s6952_s23 = smov 0   ;;  %s6954_s24 = smov 0  }
   0xc   :  { %s6956_s25 = smov 0   ;;  %s6958_s26 = smov 0  }
   0xd   :  { %s6960_s27 = smov 0   ;;  %s6962_s28 = smov 0  }
   0xe LB: > { %8332 = sst [smem:[#allocation24_spill]] %s6871_s21  ;;  %s4930_s29 = sadd.s32 4294967295, %s6899_s28   ;;  %s6899_s28 = sphi %s6962_s28, %s23_s28   ;;  %s6895_s27 = sphi %s6960_s27, %s8386_s27   ;;  %s6891_s26 = sphi %s6958_s26, %s8385_s26   ;;  %s6887_s25 = sphi %s6956_s25, %s8384_s25   ;;  %s6883_s24 = sphi %s6954_s24, %s8383_s24   ;;  %s6879_s23 = sphi %s6952_s23, %s8382_s23   ;;  %s6875_s22 = sphi %s6950_s22, %s8381_s22   ;;  %s6871_s21 = sphi %s6948_s21, %s8380_s21  }
   0xf   : > { %s4931_s30 = sadd.s32 4294967294, %s6899_s28   ;;  %p57_p0 = scmp.ne.s32.totalorder %s6875_s22, %s6871_s21 }
  0x10   : > { %p6992_p1 = scmp.eq.s32.totalorder %s4930_s29, 0  ;;  %p6996_p2 = scmp.eq.s32.totalorder %s4930_s29, 3 }
  0x11   : > { %p173_p3 = scmp.eq.s32.totalorder %s4931_s30, 3  ;;  %p4932_p5 = scmp.ge.s32.totalorder %s6899_s28, 1 }
  0x12   : > { %p7002_p4 = por %p6992_p1, %p57_p0  ;;  %p180_p7 = scmp.lt.s32.totalorder %s6899_s28, 5 }
  0x13   : > { %p7007_p6 = por %p173_p3, %p57_p0  ;;  %s8338_s2 = sld [smem:[#allocation29_spill]] }
  0x14   : > { %p7015_p8 = pnand %p4932_p5, %p180_p7  ;;  %s6901_s15 = smov [#allocation9]  }
  0x15   : > { %s8336_s10 = scalar_select %p7007_p6, 1, 0 }
  0x16   : > { %p6539_p9 = pneg %p7015_p8  ;;  %s193_s16 = sshll.u32 %s6901_s15, 4  ;;  %s194_s16 = int_to_ptr.vmem [resolvable:$true] %s193_s16 }
  0x17   : > { %8337 = sst [smem:[#allocation25_spill]] %s8336_s10  ;;  %s8312_s20 = smov 64  }
  0x18   : > { %p6540_p10 = pnand %p6539_p9, %p6992_p1  ;;  %s8340_s4 = sld [smem:[#allocation31_spill]] }
  0x19   : > { %s191_s13 = sshll.u32 %s8338_s2, 4  ;;  %s8313_s29 = smov 4   ;;  %s192_s13 = int_to_ptr.hbm [resolvable:$true] %s191_s13 }
  0x1a   : > { %6542 = dma.hbm_to_vmem [thread:$0]  (!%p6540_p10), %s192_s13, 9216, %s194_s16, [#allocation10], %s8312_s20, %s8312_s20, %s8313_s29  }
  0x1b   : > { %s6904_s30 = smov [#allocation11]   ;;  %s32_s12 = sadd.s32 1, %s6891_s26 }
  0x1c   : > { %s210_s11 = sshll.u32 %s6904_s30, 4  ;;  %s35_s15 = sadd.s32 1, %s6895_s27  ;;  %s211_s11 = int_to_ptr.vmem [resolvable:$true] %s210_s11 }
  0x1d   : > { %p33_p11 = scmp.ge.s32.totalorder %s32_s12, 2  ;;  %s44_s17 = sadd.s32 1, %s6879_s23 }
  0x1e   : > { %s208_s19 = sshll.u32 %s8340_s4, 4  ;;  %p51_p12 = scmp.ne.s32.totalorder %s6879_s23, %s6875_s22  ;;  %s209_s19 = int_to_ptr.hbm [resolvable:$true] %s208_s19 }
  0x1f   : > { %6545 = dma.hbm_to_vmem [thread:$0]  (!%p6540_p10), %s209_s19, 9216, %s211_s11, [#allocation10], %s8312_s20, %s8312_s20, %s8313_s29  }
  0x20   : > { %p52_p13 = scmp.eq.s32.totalorder %s6899_s28, 0  ;;  %s8388_s12 = smov (%p33_p11, %s32_s12), 0 }
  0x21   : > { %8341 = sst [smem:[#allocation26_spill]] %s8388_s12  ;;  %s8390_s15 = smov (!%p33_p11, %s35_s15), %s6895_s27 }
  0x22   : > { %s40_s13 = ssub.s32 %s6891_s26, %s8388_s12  ;;  %p7043_p0 = por %p52_p13, %p51_p12 }
  0x23   : > { %p37_p3 = scmp.ge.s32.totalorder %s8390_s15, 2  ;;  %p7049_p5 = por %p6996_p2, %p51_p12 }
  0x24   : > { %p6556_p7 = scmp.lt.s32.totalorder %s6899_s28, 4  ;;  %s227_s19 = sand.u32 1, %s6879_s23  }
  0x25   : > { %s8343_s18 = scalar_select %p7049_p5, 1, 0 }
  0x26   : > { %s8392_s15 = smov (%p37_p3, %s8390_s15), 0  ;;  %s4936_s30 = sshll.u32 %s227_s19, 6 }
  0x27   : > { %8344 = sst [smem:[#allocation27_spill]] %s8343_s18  ;;  %s39_s11 = ssub.s32 %s6895_s27, %s8392_s15 }
  0x28   : > { %s41_s20 = sor.u32 %s40_s13, %s39_s11  ;;  %s6195_s29 = sshll.u32 %s6891_s26, 4 }
  0x29   : > { %p42_p9 = scmp.eq.s32.totalorder %s41_s20, 0  ;;  %s4939_s2 = sshll.u32 %s6895_s27, 5 }
  0x2a   : > { %s237_s4 = sadd.s32 %s6195_s29, %s4939_s2  ;;  %s231_s12 = scalar_lea.vmem [#allocation6], %s4936_s30 }
  0x2b   : > { %s242_s8 = sshll.u32 %s231_s12, 4  ;;  %s4940_s21 = sshll.u32 %s237_s4, 2  ;;  %s243_s8 = int_to_ptr.vmem [resolvable:$true] %s242_s8 }
  0x2c   : > { %s7062_s10 = scalar_select %p42_p9, %s6879_s23, %s44_s17  }
  0x2d   : > { %s239_s5 = scalar_lea.hbm %s8305_s0, %s4940_s21  ;;  %p6547_p2 = pnand %p6556_p7, %p7043_p0 }
  0x2e   : > { %s240_s3 = sshll.u32 %s239_s5, 4  ;;  %s228_s13 = scalar_lea.sflag [#allocation7], %s227_s19  ;;  %s241_s3 = int_to_ptr.hbm [resolvable:$true] %s240_s3 }
  0x2f   : > { %s8345_s11 = smov 4   ;;  %s8346_s20 = smov 64  }
  0x30   : > { %6549 = dma.hbm_to_vmem [thread:$0]  (!%p6547_p2), %s241_s3, 1024, %s243_s8, %s228_s13, %s8346_s20, %s8346_s20, %s8345_s11  }
  0x31   : > { %254 = sbr.rel (%p7015_p8) target bundleno = 1451 (0x5ab), region = 40 }
  0x36   : > { %s7077_s2 = sand.u32 1, %s6875_s22  }
  0x37   : > { %s4942_s4 = sshll.u32 %s7077_s2, 6  ;;  %s257_s6 = scalar_lea.sflag [#allocation7], %s7077_s2 }
  0x38   : > { %s7081_s21 = scalar_lea.vmem [#allocation6], %s4942_s4 }
  0x39   : > { %6850 = dma.done.wait (%p7002_p4), %s257_s6, 1024  }
  0x3a   : > { %6852 = vsyncadd (%p7002_p4), %s257_s6, 4294966272 }
  0x3b   : > { %6854 = dma.done.wait (%p6992_p1), [#allocation10], 18432  }
  0x3c   : > { %6856 = vsyncadd (%p6992_p1), [#allocation10], 4294948864  ;;  %s4945_s3 = sshll.u32 %s7077_s2, 7  ;;  %s4946_s5 = sshll.u32 %s6883_s24, 3 }
  0x3d   : > { %p6559_p8 = scmp.gt.s32.totalorder %s6883_s24, 0  ;;  %s4948_s14 = sadd.s32 4294967294, %s4946_s5 }
  0x3e   : > { %s4949_s29 = sshll.u32 %s4948_s14, 1  ;;  %s4950_s12 = sshll.u32 %s6887_s25, 5 }
  0x3f   : > { %s309_s9 = sadd.s32 %s4950_s12, %s4949_s29  ;;  %s6905_s16 = smov [#allocation2]  }
  0x40   : > { %s4951_s17 = sshll.u32 %s309_s9, 2  ;;  %s321_s18 = sshll.u32 %s6905_s16, 4  ;;  %s322_s18 = int_to_ptr.vmem [resolvable:$true] %s321_s18 }
  0x41   : > { %s311_s7 = scalar_lea.hbm %s8306_s1, %s4951_s17  ;;  %s6196_s13 = sshll.u32 %s6883_s24, 4 }
  0x42   : > { %s319_s8 = sshll.u32 %s311_s7, 4  ;;  %s7099_s11 = sadd.s32 %s6196_s13, %s4950_s12  ;;  %s320_s8 = int_to_ptr.hbm [resolvable:$true] %s319_s8 }
  0x43   : > { %s6733_s20 = sshra.s32 %s320_s8, 4  ;;  %s6739_s5 = scalar_lea.hbm %s8306_s1, 256  ;;  %s6734_s20 = int_to_ptr.hbm [resolvable:$true] %s6733_s20 }
  0x44   : > { %s6735_s4 = scalar_lea.hbm %s6734_s20, 16  ;;  %p6740_p11 = scmp.lt.s32.totalorder %s6734_s20, %s8306_s1 }
  0x45   : > { %p6736_p1 = scmp.ne.s32.totalorder %s6734_s20, %s6735_s4  ;;  %p6741_p12 = scmp.lt.s32.totalorder %s6739_s5, %s6735_s4 }
  0x47   : > { %p6737_p4 = pnand %p6736_p1, %p6559_p8  ;;  %p6742_p13 = por %p6741_p12, %p6740_p11 }
  0x49   : > { %p6738_p10 = pneg %p6737_p4 }
  0x4b   : > { %p6743_p0 = pnand %p6742_p13, %p6738_p10 }
  0x4d   : > { %6746 = shalt.err (!%p6743_p0)  }
  0x4e   : > { %6530 = dma.hbm_to_vmem [thread:$0]  (%p6559_p8), %s320_s8, 256, %s322_s18, [#allocation5] }
  0x4f   : > { %p6560_p3 = scmp.lt.s32.totalorder %s6883_s24, 1  ;;  %s4956_s12 = sshll.u32 %s7099_s11, 2 }
  0x50   : > { %s4864_s16 = scalar_lea.hbm %s8306_s1, %s4956_s12  ;;  %s6906_s19 = smov [#allocation2 + $0x10]  }
  0x51   : > { %s346_s30 = sshll.u32 %s6906_s19, 4  ;;  %s4865_s7 = scalar_lea.hbm %s4864_s16, 64  ;;  %s347_s30 = int_to_ptr.vmem [resolvable:$true] %s346_s30 }
  0x52   : > { %s344_s13 = sshll.u32 %s4865_s7, 4  ;;  %s345_s13 = int_to_ptr.hbm [resolvable:$true] %s344_s13 }
  0x53   : > { %s6761_s20 = sshra.s32 %s345_s13, 4  ;;  %s6762_s20 = int_to_ptr.hbm [resolvable:$true] %s6761_s20 }
  0x54   : > { %s6763_s4 = scalar_lea.hbm %s6762_s20, 16  ;;  %p6768_p1 = scmp.lt.s32.totalorder %s6762_s20, %s8306_s1 }
  0x55   : > { %p6764_p7 = scmp.ne.s32.totalorder %s6762_s20, %s6763_s4  ;;  %p6769_p4 = scmp.lt.s32.totalorder %s6739_s5, %s6763_s4 }
  0x57   : > { %p6765_p9 = pnand %p6764_p7, %p6560_p3  ;;  %p6770_p10 = por %p6769_p4, %p6768_p1 }
  0x59   : > { %p6766_p2 = pneg %p6765_p9 }
  0x5b   : > { %p6771_p11 = pnand %p6770_p10, %p6766_p2 }
  0x5d   : > { %6774 = shalt.err (!%p6771_p11)  }
  0x5e   : > { %6532 = dma.hbm_to_vmem [thread:$0]  (%p6560_p3), %s345_s13, 256, %s347_s30, [#allocation5 + $0x1] }
  0x5f   : > { %s7125_s25 = scalar_lea.vmem [#allocation12], %s4945_s3  ;;  %p4957_p12 = scmp.ne.s32.totalorder %s6883_s24, 0 }
  0x61   : > { %353 = sbr.rel (%p4957_p12) target bundleno = 107 (0x6b), region = 72 }
  0x66   : > { %v6907_v0 = vmov 0  }
  0x67   : > { %354 = vst [vmem:[#allocation2] sm:$0xf] %v6907_v0 }
  0x68   : > { %355 = vst [vmem:[#allocation2 + $0x4] sm:$0xf] %v6907_v0 }
  0x69   : > { %356 = vst [vmem:[#allocation2 + $0x8] sm:$0xf] %v6907_v0 }
  0x6a   : > { %357 = vst [vmem:[#allocation2 + $0xc] sm:$0xf] %v6907_v0 }
  0x6b PF: > { %p4958_p13 = scmp.ne.s32.totalorder %s6883_s24, 1 }
  0x6d   : > { %361 = sbr.rel (%p4958_p13) target bundleno = 119 (0x77), region = 76 }
  0x72   : > { %v6908_v1 = vmov 0  }
  0x73   : > { %363 = vst [vmem:[#allocation2 + $0x10] sm:$0xf] %v6908_v1 }
  0x74   : > { %364 = vst [vmem:[#allocation2 + $0x14] sm:$0xf] %v6908_v1 }
  0x75   : > { %365 = vst [vmem:[#allocation2 + $0x18] sm:$0xf] %v6908_v1 }
  0x76   : > { %366 = vst [vmem:[#allocation2 + $0x1c] sm:$0xf] %v6908_v1 }
  0x77 PF: > { %v367_v2 = vld [vmem:[%s7081_s21] sm:$0xf]  ;;  %v7135_v3 = vld [vmem:[%s7081_s21 + $0x4] sm:$0xf]  ;;  %v369_v5 = vld [vmem:[%s7081_s21 + $0x8] sm:$0xf] }
  0x78   : > { %384 = vst [vmem:[#allocation3 + $0x34] sm:$0xf] %v367_v2  ;;  %v404_v4 = vshrl.u32 %v367_v2, 16  ;;  %v407_v6 = vshll.u32 %v367_v2, 16  ;;  %v412_v7 = vshrl.u32 %v7135_v3, 16  ;;  %v8322_v9 = vshll.u32 %v7135_v3, 16 }
  0x79   : > { %385 = vst [vmem:[#allocation3 + $0x40] sm:$0xf] %v7135_v3  ;;  %v7141_v8 = vld [vmem:[%s7081_s21 + $0xc] sm:$0xf]  ;;  %v420_v10 = vshrl.u32 %v369_v5, 16  ;;  %v423_v11 = vshll.u32 %v369_v5, 16 }
  0x7a   : > { %386 = vst [vmem:[#allocation3 + $0x4c] sm:$0xf] %v369_v5  ;;  %v7145_v12 = vrot.slane %v404_v4, 7  ;;  %v7147_v13 = vrot.slane %v404_v4, 4  ;;  %v371_v14 = vld [vmem:[%s7081_s21 + $0x10] sm:$0xf] }
  0x7b   : > { %387 = vst [vmem:[#allocation3 + $0x58] sm:$0xf] %v7141_v8  ;;  %v7151_v15 = vld [vmem:[%s7081_s21 + $0x14] sm:$0xf]  ;;  %v7153_v16 = vrot.slane %v407_v6, 5  ;;  %v414_v17 = vrot.slane %v412_v7, 7 }
  0x7c   : > { %v7155_v18 = vrot.slane %v412_v7, 4  ;;  %v428_v19 = vshrl.u32 %v7141_v8, 16  ;;  %388 = vst [vmem:[#allocation3 + $0x64] sm:$0xf] %v371_v14  ;;  %v436_v20 = vshrl.u32 %v371_v14, 16  ;;  %v439_v21 = vshll.u32 %v371_v14, 16 }
  0x7d   : > { %389 = vst [vmem:[#allocation3 + $0x70] sm:$0xf] %v7151_v15  ;;  %v7160_v22 = vld [vmem:[%s7081_s21 + $0x18] sm:$0xf]  ;;  %v7162_v23 = vrot.slane %v420_v10, 7  ;;  %v7164_v24 = vrot.slane %v420_v10, 4  ;;  %v7184_v35 = vor.u32 %v407_v6, %v7145_v12  ;;  %v7188_v36 = vor.u32 %v8322_v9, %v414_v17 }
  0x7e   : > { %v7166_v25 = vrot.slane %v423_v11, 5  ;;  %v444_v26 = vshrl.u32 %v7151_v15, 16  ;;  %390 = vst [vmem:[#allocation3 + $0x7c] sm:$0xf] %v7160_v22  ;;  %v430_v27 = vrot.slane %v428_v19, 7  ;;  %v8321_v28 = vshll.u32 %v7141_v8, 16 }
  0x7f   : > { %v8323_v29 = vshll.u32 %v7151_v15, 16  ;;  %v452_v30 = vshrl.u32 %v7160_v22, 16  ;;  %v7174_v31 = vld [vmem:[%s7081_s21 + $0x1c] sm:$0xf]  ;;  %v7176_v32 = vrot.slane %v428_v19, 4  ;;  %v455_v33 = vshll.u32 %v7160_v22, 16 }
  0x80   : > { %391 = vst [vmem:[#allocation3 + $0x88] sm:$0xf] %v7174_v31  ;;  %v7181_v34 = vld [vmem:[%s7081_s21 + $0x20] sm:$0xf]  ;;  %v7190_v37 = vrot.slane %v436_v20, 7  ;;  %v7192_v38 = vrot.slane %v436_v20, 4  ;;  %v7221_v53 = vor.u32 %v423_v11, %v7162_v23  ;;  %v433_v62 = vor.u32 %v8321_v28, %v430_v27 }
  0x81   : > { %v7194_v39 = vrot.slane %v439_v21, 5  ;;  %v460_v40 = vshrl.u32 %v7174_v31, 16  ;;  %392 = vst [vmem:[#allocation3 + $0x94] sm:$0xf] %v7181_v34  ;;  %v446_v41 = vrot.slane %v444_v26, 7  ;;  %v7198_v42 = vrot.slane %v444_v26, 4 }
  0x82   : > { %v8324_v43 = vshll.u32 %v7174_v31, 16  ;;  %v7202_v44 = vld [vmem:[%s7081_s21 + $0x24] sm:$0xf]  ;;  %vm547_vm0 = vcmask 1043456   ;;  %v7204_v45 = vrot.slane %v452_v30, 7  ;;  %v7206_v46 = vrot.slane %v452_v30, 4 }
  0x83   : > { %v468_v47 = vshrl.u32 %v7181_v34, 16  ;;  %v471_v48 = vshll.u32 %v7181_v34, 16  ;;  %393 = vst [vmem:[#allocation3 + $0xa0] sm:$0xf] %v7202_v44  ;;  %v7211_v49 = vrot.slane %v455_v33, 5  ;;  %v476_v50 = vshrl.u32 %v7202_v44, 16 }
  0x84   : > { %v7215_v51 = vld [vmem:[%s7081_s21 + $0x28] sm:$0xf]  ;;  %v7218_v52 = vld [vmem:[%s7081_s21 + $0x2c] sm:$0xf]  ;;  %v462_v55 = vrot.slane %v460_v40, 7  ;;  %v7225_v56 = vrot.slane %v460_v40, 4  ;;  %v441_v63 = vor.u32 %v439_v21, %v7190_v37 }
  0x85   : > { %394 = vst [vmem:[#allocation3 + $0xac] sm:$0xf] %v7215_v51  ;;  %v484_v57 = vshrl.u32 %v7215_v51, 16  ;;  %v487_v59 = vshll.u32 %v7215_v51, 16  ;;  %v492_v60 = vshrl.u32 %v7218_v52, 16  ;;  %v7239_v0 = vrot.slane %v468_v47, 7 }
  0x86   : > { %395 = vst [vmem:[#allocation3 + $0xb8] sm:$0xf] %v7218_v52  ;;  %v7234_v61 = vld [vmem:[%s7081_s21 + $0x30] sm:$0xf]  ;;  %v7241_v1 = vrot.slane %v468_v47, 4  ;;  %v7245_v2 = vrot.slane %v471_v48, 5  ;;  %v457_v51 = vor.u32 %v455_v33, %v7204_v45 }
  0x87   : > { %v8326_v4 = vshll.u32 %v7202_v44, 16  ;;  %396 = vst [vmem:[#allocation3 + $0xc4] sm:$0xf] %v7234_v61  ;;  %v478_v5 = vrot.slane %v476_v50, 7  ;;  %v7249_v6 = vrot.slane %v476_v50, 4  ;;  %v500_v7 = vshrl.u32 %v7234_v61, 16 }
  0x88   : > { %v7253_v10 = vld [vmem:[%s7081_s21 + $0x34] sm:$0xf]  ;;  %v426_v11 = vrot.slane %v7162_v23, 4  ;;  %v7256_v14 = vrot.slane %v484_v57, 7  ;;  %v503_v19 = vshll.u32 %v7234_v61, 16  ;;  %v7262_v21 = vrot.slane %v484_v57, 4 }
  0x89   : > { %397 = vst [vmem:[#allocation3 + $0xd0] sm:$0xf] %v7253_v10  ;;  %v508_v20 = vshrl.u32 %v7253_v10, 16  ;;  %v7264_v22 = vrot.slane %v487_v59, 5  ;;  %v494_v26 = vrot.slane %v492_v60, 7  ;;  %v7266_v27 = vrot.slane %v492_v60, 4 }
  0x8a   : > { %v7269_v30 = vld [vmem:[%s7081_s21 + $0x38] sm:$0xf]  ;;  %v7271_v23 = vrot.slane %v500_v7, 7  ;;  %v7275_v40 = vld [vmem:[%s7081_s21 + $0x3c] sm:$0xf]  ;;  %v442_v47 = vrot.slane %v7190_v37, 4  ;;  %v449_v50 = vor.u32 %v8323_v29, %v446_v41  ;;  %v465_v61 = vor.u32 %v8324_v43, %v462_v55 }
  0x8b   : > { %398 = vst [vmem:[#allocation3 + $0xdc] sm:$0xf] %v7269_v30  ;;  %v7281_v57 = vrot.slane %v500_v7, 4  ;;  %vm548_vm1 = vsmask.f32 7938  ;;  %v7287_v54 = vrot.slane %v503_v19, 5  ;;  %v481_v17 = vor.u32 %v8326_v4, %v478_v5 }
  0x8c   : > { %399 = vst [vmem:[#allocation3 + $0xe8] sm:$0xf] %v7275_v40  ;;  %v510_v28 = vrot.slane %v508_v20, 7  ;;  %v7289_v9 = vrot.slane %v508_v20, 4  ;;  %vm7292_vm2 = vmand %vm547_vm0, %vm548_vm1  ;;  %v550_v33 = vld [vmem:[#allocation3 + $0x30] sm:$0xf]  ;;  %v489_v34 = vor.u32 %v487_v59, %v7256_v14 }
  0x8d   : > { %v458_v41 = vrot.slane %v7204_v45, 4  ;;  %v516_v7 = vshrl.u32 %v7269_v30, 16  ;;  %v8325_v29 = vshrl.u32 %v7275_v40, 16  ;;  %v551_v55 = vsel %vm7292_vm2, %v7184_v35, %v550_v33  ;;  %v554_v43 = vld [vmem:[#allocation3 + $0x48] sm:$0xf] }
  0x8e   : > { %vm400_vm3 = vsmask.f32 256  ;;  %552 = vst [vmem:[#allocation3 + $0x30] sm:$0xf] %v551_v55  ;;  %vm401_vm4 = vsmask.f32 4368  ;;  %v555_v20 = vsel %vm7292_vm2, %v7221_v53, %v554_v43  ;;  %v473_v45 = vor.u32 %v471_v48, %v7239_v0 }
  0x8f   : > { %v558_v60 = vld [vmem:[#allocation3 + $0x60] sm:$0xf]  ;;  %v7310_v58 = vrot.slane %v516_v7, 7  ;;  %v526_v35 = vrot.slane %v8325_v29, 7  ;;  %vm7315_vm5 = vmor %vm400_vm3, %vm401_vm4  ;;  %556 = vst [vmem:[#allocation3 + $0x48] sm:$0xf] %v555_v20 }
  0x90   : > { %v559_v43 = vsel %vm7292_vm2, %v441_v63, %v558_v60  ;;  %v562_v53 = vld [vmem:[#allocation3 + $0x78] sm:$0xf]  ;;  %v8351_v48 = vrot.slane %v7145_v12, 4  ;;  %v434_v55 = vsel %vm7315_vm5, %v426_v11, %v433_v62  ;;  %v450_v29 = vsel %vm7315_vm5, %v442_v47, %v449_v50  ;;  %v566_v20 = vld [vmem:[#allocation3 + $0x90] sm:$0xf] }
  0x91   : > { %560 = vst [vmem:[#allocation3 + $0x60] sm:$0xf] %v559_v43  ;;  %v474_v4 = vrot.slane %v7239_v0, 4  ;;  %v519_v63 = vshll.u32 %v7269_v30, 16  ;;  %v527_v59 = vshll.u32 %v7275_v40, 16  ;;  %v563_v12 = vsel %vm7292_vm2, %v457_v51, %v562_v53 }
  0x92   : > { %v418_v5 = vsel %vm7315_vm5, %v8351_v48, %v7188_v36  ;;  %v570_v60 = vld [vmem:[#allocation3 + $0xa8] sm:$0xf]  ;;  %v505_v36 = vor.u32 %v503_v19, %v7271_v23  ;;  %557 = vst [vmem:[#allocation3 + $0x54] sm:$0xf] %v434_v55  ;;  %v466_v62 = vsel %vm7315_vm5, %v458_v41, %v465_v61  ;;  %v490_v11 = vrot.slane %v7256_v14, 4 }
  0x93   : > { %553 = vst [vmem:[#allocation3 + $0x3c] sm:$0xf] %v418_v5  ;;  %v8352_v47 = vshll.u32 %v7218_v52, 16  ;;  %v574_v50 = vld [vmem:[#allocation3 + $0xc0] sm:$0xf]  ;;  %v8353_v30 = vshll.u32 %v7253_v10, 16  ;;  %v567_v51 = vsel %vm7292_vm2, %v473_v45, %v566_v20  ;;  %v521_v53 = vor.u32 %v519_v63, %v7310_v58 }
  0x94   : > { %561 = vst [vmem:[#allocation3 + $0x6c] sm:$0xf] %v450_v29  ;;  %v529_v19 = vor.u32 %v527_v59, %v526_v35  ;;  %v596_v61 = vor.u32 %v7166_v25, %v7164_v24  ;;  %v482_v14 = vsel %vm7315_vm5, %v474_v4, %v481_v17  ;;  %vm582_vm6 = vsmask.f32 3328  ;;  %v578_v17 = vld [vmem:[#allocation3 + $0xd8] sm:$0xf] }
  0x95   : > { %v497_v0 = vor.u32 %v8352_v47, %v494_v26  ;;  %v513_v43 = vor.u32 %v8353_v30, %v510_v28  ;;  %564 = vst [vmem:[#allocation3 + $0x78] sm:$0xf] %v563_v12  ;;  %v506_v26 = vrot.slane %v7271_v23, 4  ;;  %v8354_v28 = vshll.u32 %v7135_v3, 16  ;;  %vm7393_vm9 = vmand %vm547_vm0, %vm582_vm6 }
  0x96   : > { %565 = vst [vmem:[#allocation3 + $0x84] sm:$0xf] %v466_v62  ;;  %v571_v41 = vsel %vm7292_vm2, %v489_v34, %v570_v60  ;;  %v575_v45 = vsel %vm7292_vm2, %v505_v36, %v574_v50  ;;  %vm583_vm7 = vsmask.f32 7440  ;;  %v8355_v24 = vshll.u32 %v7141_v8, 16 }
  0x97   : > { %v589_v29 = vrot.slane %v8354_v28, 5  ;;  %568 = vst [vmem:[#allocation3 + $0x90] sm:$0xf] %v567_v51  ;;  %v498_v4 = vsel %vm7315_vm5, %v490_v11, %v497_v0  ;;  %v522_v23 = vrot.slane %v7310_v58, 4  ;;  %v8356_v35 = vshll.u32 %v7151_v15, 16  ;;  %vm7384_vm8 = vmor %vm582_vm6, %vm583_vm7 }
  0x98   : > { %v598_v25 = vrot.slane %v8355_v24, 5  ;;  %569 = vst [vmem:[#allocation3 + $0x9c] sm:$0xf] %v482_v14  ;;  %v8357_v34 = vor.u32 %v7153_v16, %v7147_v13  ;;  %v605_v55 = vor.u32 %v7194_v39, %v7192_v38  ;;  %v8358_v20 = vshll.u32 %v7174_v31, 16  ;;  %v675_v38 = vld [vmem:[#allocation3 + $0x44] sm:$0xf] }
  0x99   : > { %v592_v3 = vor.u32 %v7155_v18, %v589_v29  ;;  %v607_v48 = vrot.slane %v8356_v35, 5  ;;  %v7378_v58 = vrot.slane %v516_v7, 4  ;;  %572 = vst [vmem:[#allocation3 + $0xa8] sm:$0xf] %v571_v41  ;;  %v514_v15 = vsel %vm7315_vm5, %v506_v26, %v513_v43 }
  0x9a   : > { %v588_v5 = vrot.slane %v8357_v34, 4  ;;  %v601_v8 = vor.u32 %v7176_v32, %v598_v25  ;;  %v7376_v12 = vrot.slane %v8358_v20, 5  ;;  %573 = vst [vmem:[#allocation3 + $0xb4] sm:$0xf] %v498_v4  ;;  %v579_v31 = vsel %vm7292_vm2, %v521_v53, %v578_v17 }
  0x9b   : > { %v593_v16 = vrot.slane %v592_v3, 4  ;;  %v610_v18 = vor.u32 %v7198_v42, %v607_v48  ;;  %v597_v39 = vrot.slane %v596_v61, 4  ;;  %v614_v7 = vor.u32 %v7211_v49, %v7206_v46  ;;  %576 = vst [vmem:[#allocation3 + $0xc0] sm:$0xf] %v575_v45  ;;  %v679_v46 = vld [vmem:[#allocation3 + $0x5c] sm:$0xf] }
  0x9c   : > { %v8363_v60 = vshll.u32 %v7202_v44, 16  ;;  %v649_v62 = vrot.slane %v519_v63, 5  ;;  %v530_v42 = vsel %vm7315_vm5, %v522_v23, %v529_v19  ;;  %v602_v11 = vrot.slane %v601_v8, 4  ;;  %577 = vst [vmem:[#allocation3 + $0xcc] sm:$0xf] %v514_v15 }
  0x9d   : > { %v619_v47 = vor.u32 %v7225_v56, %v7376_v12  ;;  %v8364_v0 = vshrl.u32 %v7275_v40, 16  ;;  %v590_v30 = vsel %vm7384_vm8, %v588_v5, %v589_v29  ;;  %v606_v49 = vrot.slane %v605_v55, 4  ;;  %580 = vst [vmem:[#allocation3 + $0xd8] sm:$0xf] %v579_v31  ;;  %v683_v61 = vld [vmem:[#allocation3 + $0x74] sm:$0xf] }
  0x9e   : > { %v625_v36 = vrot.slane %v8363_v60, 5  ;;  %v623_v44 = vor.u32 %v7245_v2, %v7241_v1  ;;  %v676_v63 = vsel %vm7393_vm9, %v593_v16, %v675_v38  ;;  %v611_v43 = vrot.slane %v610_v18, 4  ;;  %581 = vst [vmem:[#allocation3 + $0xe4] sm:$0xf] %v530_v42  ;;  %v687_v45 = vld [vmem:[#allocation3 + $0x8c] sm:$0xf] }
  0x9f   : > { %v654_v50 = vrot.slane %v8364_v0, 4  ;;  %v8365_v56 = vshll.u32 %v7218_v52, 16  ;;  %v599_v19 = vsel %vm7384_vm8, %v597_v39, %v598_v25  ;;  %v615_v14 = vrot.slane %v614_v7, 4  ;;  %673 = vst [vmem:[#allocation3 + $0x38] sm:$0xf] %v590_v30 }
  0xa0   : > { %v628_v51 = vor.u32 %v7249_v6, %v625_v36  ;;  %v632_v26 = vor.u32 %v7264_v22, %v7262_v21  ;;  %v8366_v1 = vshll.u32 %v7253_v10, 16  ;;  %v680_v28 = vsel %vm7393_vm9, %v602_v11, %v679_v46  ;;  %677 = vst [vmem:[#allocation3 + $0x44] sm:$0xf] %v676_v63  ;;  %v691_v40 = vld [vmem:[#allocation3 + $0xa4] sm:$0xf] }
  0xa1   : > { %v634_v53 = vrot.slane %v8365_v56, 5  ;;  %v620_v6 = vrot.slane %v619_v47, 4  ;;  %v652_v29 = vrot.slane %v527_v59, 5  ;;  %v608_v41 = vsel %vm7384_vm8, %v606_v49, %v607_v48  ;;  %678 = vst [vmem:[#allocation3 + $0x50] sm:$0xf] %v599_v19 }
  0xa2   : > { %v643_v2 = vrot.slane %v8366_v1, 5  ;;  %v624_v24 = vrot.slane %v623_v44, 4  ;;  %v641_v10 = vor.u32 %v7287_v54, %v7281_v57  ;;  %v684_v21 = vsel %vm7393_vm9, %v611_v43, %v683_v61  ;;  %681 = vst [vmem:[#allocation3 + $0x5c] sm:$0xf] %v680_v28  ;;  %v699_v5 = vld [vmem:[#allocation3 + $0xd4] sm:$0xf] }
  0xa3   : > { %v637_v52 = vor.u32 %v7266_v27, %v634_v53  ;;  %v629_v22 = vrot.slane %v628_v51, 4  ;;  %v617_v27 = vsel %vm7384_vm8, %v615_v14, %v7376_v12  ;;  %v633_v59 = vrot.slane %v632_v26, 4  ;;  %682 = vst [vmem:[#allocation3 + $0x68] sm:$0xf] %v608_v41 }
  0xa4   : > { %v646_v25 = vor.u32 %v7289_v9, %v643_v2  ;;  %v650_v4 = vor.u32 %v649_v62, %v7378_v58  ;;  %v688_v54 = vsel %vm7393_vm9, %v620_v6, %v687_v45  ;;  %v655_v17 = vor.u32 %v654_v50, %v652_v29  ;;  %685 = vst [vmem:[#allocation3 + $0x74] sm:$0xf] %v684_v21  ;;  %v695_v9 = vld [vmem:[#allocation3 + $0xbc] sm:$0xf]  ;;  %v703_v58 = vld [vmem:[#allocation3 + $0xec] sm:$0xf] }
  0xa5   : > { %v638_v57 = vrot.slane %v637_v52, 4  ;;  %v626_v23 = vsel %vm7384_vm8, %v624_v24, %v625_v36  ;;  %v642_v3 = vrot.slane %v641_v10, 4  ;;  %686 = vst [vmem:[#allocation3 + $0x80] sm:$0xf] %v617_v27  ;;  %v692_v35 = vsel %vm7393_vm9, %v629_v22, %v691_v40 }
  0xa6   : > { %v647_v48 = vrot.slane %v646_v25, 4  ;;  %689 = vst [vmem:[#allocation3 + $0x8c] sm:$0xf] %v688_v54  ;;  %v635_v34 = vsel %vm7384_vm8, %v633_v59, %v634_v53  ;;  %v651_v8 = vrot.slane %v650_v4, 4  ;;  %v656_v20 = vrot.slane %v655_v17, 4 }
  0xa7   : > { %690 = vst [vmem:[#allocation3 + $0x98] sm:$0xf] %v626_v23  ;;  %v696_v55 = vsel %vm7393_vm9, %v638_v57, %v695_v9  ;;  %v644_v12 = vsel %vm7384_vm8, %v642_v3, %v643_v2 }
  0xa8   : > { %693 = vst [vmem:[#allocation3 + $0xa4] sm:$0xf] %v692_v35  ;;  %v700_v15 = vsel %vm7393_vm9, %v647_v48, %v699_v5  ;;  %v653_v16 = vsel %vm7384_vm8, %v651_v8, %v652_v29  ;;  %v704_v18 = vsel %vm7393_vm9, %v656_v20, %v703_v58 }
  0xa9   : > { %694 = vst [vmem:[#allocation3 + $0xb0] sm:$0xf] %v635_v34 }
  0xaa   : > { %697 = vst [vmem:[#allocation3 + $0xbc] sm:$0xf] %v696_v55 }
  0xab   : > { %698 = vst [vmem:[#allocation3 + $0xc8] sm:$0xf] %v644_v12 }
  0xac   : > { %701 = vst [vmem:[#allocation3 + $0xd4] sm:$0xf] %v700_v15 }
  0xad   : > { %702 = vst [vmem:[#allocation3 + $0xe0] sm:$0xf] %v653_v16 }
  0xae   : > { %705 = vst [vmem:[#allocation3 + $0xec] sm:$0xf] %v704_v18 }
  0xaf   : > { %6858 = dma.done.wait (%p6559_p8), [#allocation5], 256 }
  0xb0   : > { %6860 = vsyncadd (%p6559_p8), [#allocation5], 4294967040 }
  0xb1   : > { %6862 = dma.done.wait (%p6560_p3), [#allocation5 + $0x1], 256 }
  0xb2   : > { %6864 = vsyncadd (%p6560_p3), [#allocation5 + $0x1], 4294967040  ;;  %v6288_v31 = vld [vmem:[#allocation9 + $0xf8] sm:$0xff]  ;;  %v6287_v39 = vld [vmem:[#allocation9 + $0xf0] sm:$0xff]  ;;  %vm889_vm10 = vcmask 1040384   ;;  %vm927_vm12 = vcmask 1043459  }
  0xb3   : > { %v6296_v38 = vld [vmem:[#allocation9 + $0x138] sm:$0xff]  ;;  %1448 = vmatpush.bf16.msra.mxu0 %v6288_v31  ;;  %v6295_v7 = vld [vmem:[#allocation9 + $0x130] sm:$0xff]  ;;  %v6286_v62 = vld [vmem:[#allocation9 + $0xe8] sm:$0xff]  ;;  %vm928_vm13 = vsmask.f32 7950  ;;  %s8373_s6 = sld [smem:[#allocation30_spill]] }
  0xb4   : > { %1507 = vmatpush.bf16.msra.mxu1 %v6296_v38  ;;  %6503 = vmatpush.bf16.msra.mxu3 %v6296_v38  ;;  %v7464_v60 = vld [vmem:[#allocation2 + $0x8] sm:$0xf]  ;;  %v7466_v36 = vld [vmem:[#allocation2 + $0xc] sm:$0xf]  ;;  %v6294_v42 = vld [vmem:[#allocation9 + $0x128] sm:$0xff] }
  0xb5   : > { %v748_v11 = vshrl.u32 %v7464_v60, 16  ;;  %v751_v47 = vshll.u32 %v7464_v60, 16  ;;  %v756_v0 = vshrl.u32 %v7466_v36, 16  ;;  %v759_v50 = vshll.u32 %v7466_v36, 16  ;;  %729 = vst [vmem:[#allocation3 + $0x1c] sm:$0xf] %v7464_v60  ;;  %vm7478_vm11 = vmand %vm889_vm10, %vm400_vm3 }
  0xb6   : > { %730 = vst [vmem:[#allocation3 + $0x28] sm:$0xf] %v7466_v36  ;;  %v7483_v44 = vld [vmem:[#allocation9 + $0x178] sm:$0xff]  ;;  %v771_v63 = vld [vmem:[#allocation3 + $0x18] sm:$0xf]  ;;  %v6285_v51 = vld [vmem:[#allocation9 + $0xe0] sm:$0xff] }
  0xb7   : > { %1449 = vmatpush.bf16.msra.mxu0 %v6287_v39  ;;  %v750_v30 = vrot.slane %v748_v11, 7  ;;  %v758_v46 = vrot.slane %v756_v0, 7  ;;  %v897_v43 = vld [vmem:[#allocation3 + $0x30] sm:$0x1]  ;;  %6511 = vmatpush.bf16.msra.mxu2 %v7483_v44  ;;  %v6284_v2 = vld [vmem:[#allocation9 + $0xd8] sm:$0xff]  ;;  %v7496_v6 = vld [vmem:[#allocation9 + $0x170] sm:$0xff] }
  0xb8   : > { %1508 = vmatpush.bf16.msra.mxu1 %v6295_v7  ;;  %6504 = vmatpush.bf16.msra.mxu3 %v6295_v7  ;;  %v6293_v56 = vld [vmem:[#allocation9 + $0x120] sm:$0xff]  ;;  %v898_v14 = vsel %vm7478_vm11, 0, %v897_v43  ;;  %v6292_v28 = vld [vmem:[#allocation9 + $0x118] sm:$0xff]  ;;  %v6283_v52 = vld [vmem:[#allocation9 + $0xd0] sm:$0xff]  ;;  %v784_v36 = vrot.slane %v748_v11, 4 }
  0xb9   : > { %v753_v53 = vor.u32 %v751_v47, %v750_v30  ;;  %v754_v19 = vrot.slane %v750_v30, 4  ;;  %v761_v61 = vor.u32 %v759_v50, %v758_v46  ;;  %899 = vst [vmem:[#allocation3 + $0x30] sm:$0x1] %v898_v14  ;;  %v6291_v29 = vld [vmem:[#allocation9 + $0x110] sm:$0xff]  ;;  %v7499_v41 = vld [vmem:[#allocation9 + $0x168] sm:$0xff]  ;;  %v7505_v27 = vld [vmem:[#allocation9 + $0x160] sm:$0xff] }
  0xba   : > { %v900_v24 = vld [vmem:[#allocation3 + $0x48] sm:$0x1]  ;;  %v6282_v22 = vld [vmem:[#allocation9 + $0xc8] sm:$0xff]  ;;  %v7508_v40 = vld [vmem:[#allocation2 + $0x10] sm:$0xf] }
  0xbb   : > { %1450 = vmatpush.bf16.msra.mxu0 %v6286_v62  ;;  %v762_v26 = vsel %vm7315_vm5, %v754_v19, %v761_v61  ;;  %v772_v1 = vsel %vm7292_vm2, %v753_v53, %v771_v63  ;;  %6512 = vmatpush.bf16.msra.mxu2 %v7496_v6  ;;  %v901_v21 = vsel %vm7478_vm11, 0, %v900_v24  ;;  %v6290_v25 = vld [vmem:[#allocation9 + $0x108] sm:$0xff]  ;;  %v7510_v59 = vld [vmem:[#allocation2 + $0x14] sm:$0xf]  ;;  %811 = vst [vmem:[#allocation3 + $0xf4] sm:$0xf] %v7508_v40  ;;  %vm7533_vm14 = vmand %vm927_vm12, %vm928_vm13 }
  0xbc   : > { %1509 = vmatpush.bf16.msra.mxu1 %v6294_v42  ;;  %6505 = vmatpush.bf16.msra.mxu3 %v6294_v42  ;;  %773 = vst [vmem:[#allocation3 + $0x18] sm:$0xf] %v772_v1  ;;  %v7513_v4 = vld [vmem:[#allocation2] sm:$0xf]  ;;  %v6281_v54 = vld [vmem:[#allocation9 + $0xc0] sm:$0xff]  ;;  %v6234_v8 = vld [vmem:[#allocation9 + $0x38] sm:$0xff] }
  0xbd   : > { %774 = vst [vmem:[#allocation3 + $0x24] sm:$0xf] %v762_v26  ;;  %v6251_v57 = vld [vmem:[#allocation3 + $0x1c] sm:$0xf]  ;;  %v6272_v17 = vld [vmem:[#allocation3 + $0xc4] sm:$0xf] }
  0xbe   : > { %902 = vst [vmem:[#allocation3 + $0x48] sm:$0x1] %v901_v21  ;;  %v732_v23 = vshrl.u32 %v7513_v4, 16  ;;  %v6289_v9 = vld [vmem:[#allocation9 + $0x100] sm:$0xff]  ;;  %v4965_v3 = vld [vmem:[#allocation3 + $0x24] sm:$0xf0] }
  0xbf   : > { %1451 = vmatpush.bf16.msra.mxu0 %v6285_v51  ;;  %6513 = vmatpush.bf16.msra.mxu2 %v7499_v41  ;;  %812 = vst [vmem:[#allocation3 + $0x100] sm:$0xf] %v7510_v59  ;;  %v735_v35 = vshll.u32 %v7513_v4, 16  ;;  %v5049_v34 = vld [vmem:[#allocation3 + $0xcc] sm:$0xf0]  ;;  %v7522_v55 = vld [vmem:[#allocation9 + $0x158] sm:$0xff]  ;;  %v4968_v12 = vor.u32 %v6251_v57, %v4965_v3 }
  0xc0   : > { %1510 = vmatpush.bf16.msra.mxu1 %v6293_v56  ;;  %6506 = vmatpush.bf16.msra.mxu3 %v6293_v56  ;;  %727 = vst [vmem:[#allocation3 + $0x4] sm:$0xf] %v7513_v4  ;;  %v734_v5 = vrot.slane %v732_v23, 7  ;;  %v767_v15 = vld [vmem:[#allocation3] sm:$0xf]  ;;  %v5052_v18 = vor.u32 %v6272_v17, %v5049_v34  ;;  %v6232_v46 = vld [vmem:[#allocation9 + $0x28] sm:$0xff] }
  0xc1   : > { %v6233_v38 = vld [vmem:[#allocation9 + $0x30] sm:$0xff]  ;;  %v942_v42 = vld [vmem:[#allocation3 + $0x74] sm:$0x8]  ;;  %v6275_v24 = vld [vmem:[#allocation3 + $0xdc] sm:$0xf] }
  0xc2   : > { %v737_v58 = vor.u32 %v735_v35, %v734_v5  ;;  %v7530_v39 = vld [vmem:[#allocation2 + $0x4] sm:$0xf]  ;;  %v943_v63 = vsel %vm7533_vm14, 0, %v942_v42  ;;  %v903_v43 = vld [vmem:[#allocation3 + $0x60] sm:$0x1]  ;;  %v738_v53 = vrot.slane %v734_v5, 4 }
  0xc3   : > { %1452 = vmatpush.bf16.msra.mxu0 %v6284_v2  ;;  %v894_v45 = vld [vmem:[#allocation3 + $0x18] sm:$0x1]  ;;  %6514 = vmatpush.bf16.msra.mxu2 %v7505_v27  ;;  %v6299_v7 = vld [vmem:[#allocation9 + $0x150] sm:$0xff]  ;;  %v740_v30 = vshrl.u32 %v7530_v39, 16  ;;  %v743_v51 = vshll.u32 %v7530_v39, 16  ;;  %v904_v56 = vsel %vm7478_vm11, 0, %v903_v43 }
  0xc4   : > { %1511 = vmatpush.bf16.msra.mxu1 %v6292_v28  ;;  %6507 = vmatpush.bf16.msra.mxu3 %v6292_v28  ;;  %v895_v10 = vsel %vm7478_vm11, 0, %v894_v45  ;;  %v6252_v48 = vld [vmem:[#allocation3 + $0x20] sm:$0xf0]  ;;  %v768_v31 = vsel %vm7292_vm2, %v737_v58, %v767_v15  ;;  %944 = vst [vmem:[#allocation3 + $0x74] sm:$0x8] %v943_v63  ;;  %v6231_v14 = vld [vmem:[#allocation9 + $0x20] sm:$0xff] }
  0xc5   : > { %896 = vst [vmem:[#allocation3 + $0x18] sm:$0x1] %v895_v10  ;;  %v742_v19 = vrot.slane %v740_v30, 7  ;;  %v6297_v26 = vld [vmem:[#allocation9 + $0x140] sm:$0xff]  ;;  %v6255_v28 = vld [vmem:[#allocation3 + $0x38] sm:$0xf0] }
  0xc6   : > { %769 = vst [vmem:[#allocation3] sm:$0xf] %v768_v31  ;;  %v5007_v45 = vld [vmem:[#allocation3 + $0x68] sm:$0xf]  ;;  %v945_v3 = vld [vmem:[#allocation3 + $0x8c] sm:$0x8] }
  0xc7   : > { %1453 = vmatpush.bf16.msra.mxu0 %v6283_v52  ;;  %6515 = vmatpush.bf16.msra.mxu2 %v7522_v55  ;;  %905 = vst [vmem:[#allocation3 + $0x60] sm:$0x1] %v904_v56  ;;  %v745_v1 = vor.u32 %v743_v51, %v742_v19  ;;  %v4975_v52 = vld [vmem:[#allocation3 + $0x30] sm:$0xf]  ;;  %v5061_v10 = vld [vmem:[#allocation3 + $0xe4] sm:$0xf0] }
  0xc8   : > { %1512 = vmatpush.bf16.msra.mxu1 %v6291_v29  ;;  %6508 = vmatpush.bf16.msra.mxu3 %v6291_v29  ;;  %728 = vst [vmem:[#allocation3 + $0x10] sm:$0xf] %v7530_v39  ;;  %v4977_v29 = vld [vmem:[#allocation3 + $0x3c] sm:$0xf0]  ;;  %v6230_v21 = vld [vmem:[#allocation9 + $0x18] sm:$0xff]  ;;  %v5064_v17 = vor.u32 %v6275_v24, %v5061_v10  ;;  %v6228_v34 = vld [vmem:[#allocation9 + $0x8] sm:$0xff] }
  0xc9   : > { %v6257_v58 = vld [vmem:[#allocation3 + $0x4c] sm:$0xf]  ;;  %v4989_v15 = vld [vmem:[#allocation3 + $0x54] sm:$0xf0]  ;;  %v909_v63 = vld [vmem:[#allocation3 + $0x90] sm:$0x1] }
  0xca   : > { %v4992_v42 = vor.u32 %v6257_v58, %v4989_v15  ;;  %v910_v56 = vsel %vm7478_vm11, 0, %v909_v63  ;;  %v5031_v19 = vld [vmem:[#allocation3 + $0x98] sm:$0xf]  ;;  %v912_v24 = vld [vmem:[#allocation3 + $0xa8] sm:$0x1]  ;;  %v6247_v39 = vld [vmem:[#allocation9 + $0xa0] sm:$0xff] }
  0xcb   : > { %1454 = vmatpush.bf16.msra.mxu0 %v6282_v22  ;;  %6516 = vmatpush.bf16.msra.mxu2 %v6299_v7  ;;  %v6262_v22 = vld [vmem:[#allocation3 + $0x70] sm:$0xf0]  ;;  %911 = vst [vmem:[#allocation3 + $0x90] sm:$0x1] %v910_v56  ;;  %v6267_v15 = vld [vmem:[#allocation3 + $0x98] sm:$0xf0] }
  0xcc   : > { %1513 = vmatpush.bf16.msra.mxu1 %v6290_v25  ;;  %6509 = vmatpush.bf16.msra.mxu3 %v6290_v25  ;;  %v4963_v20 = vld [vmem:[#allocation3 + $0x18] sm:$0xf]  ;;  %v4976_v25 = vor.u32 %v6255_v28, %v4975_v52  ;;  %v5008_v57 = vor.u32 %v6262_v22, %v5007_v45  ;;  %v6264_v22 = vld [vmem:[#allocation3 + $0x80] sm:$0xf0]  ;;  %v824_v56 = vshrl.u32 %v7510_v59, 16 }
  0xcd   : > { %v4964_v16 = vor.u32 %v6252_v48, %v4963_v20  ;;  %v891_v61 = vld [vmem:[#allocation3] sm:$0x1]  ;;  %v906_v48 = vld [vmem:[#allocation3 + $0x78] sm:$0x1] }
  0xce   : > { %v892_v2 = vsel %vm7478_vm11, 0, %v891_v61  ;;  %v907_v5 = vsel %vm7478_vm11, 0, %v906_v48  ;;  %v5019_v20 = vld [vmem:[#allocation3 + $0x80] sm:$0xf] }
  0xcf   : > { %1455 = vmatpush.bf16.msra.mxu0 %v6281_v54  ;;  %893 = vst [vmem:[#allocation3] sm:$0x1] %v892_v2  ;;  %v4999_v61 = vld [vmem:[#allocation3 + $0x60] sm:$0xf] }
  0xd0   : > { %1514 = vmatpush.bf16.msra.mxu1 %v6289_v9  ;;  %6510 = vmatpush.bf16.msra.mxu3 %v6289_v9  ;;  %v6229_v9 = vld [vmem:[#allocation9 + $0x10] sm:$0xff]  ;;  %908 = vst [vmem:[#allocation3 + $0x78] sm:$0x1] %v907_v5 }
  0xd2   : > { %1456 = vmatmul.bf16.vlgmr.msra.gmra.mxu0 %v4964_v16  ;;  %v6278_v16 = vld [vmem:[#allocation3 + $0xf4] sm:$0xf] }
  0xd3   : > { %1566 = vmatpush.bf16.msrb.mxu0 %v7483_v44  ;;  %1515 = vmatmul.bf16.vlgmr.msra.gmra.mxu1 %v4968_v12  ;;  %v6298_v44 = vld [vmem:[#allocation9 + $0x148] sm:$0xff]  ;;  %v4987_v12 = vld [vmem:[#allocation3 + $0x48] sm:$0xf] }
  0xd4   : > { %1929 = vmatpush.bf16.msrb.mxu3 %v6234_v8  ;;  %6517 = vmatpush.bf16.msra.mxu2 %v6298_v44  ;;  %v6227_v8 = vld [vmem:[#allocation9] sm:$0xff] }
  0xd5   : > { %1550 = vmatmul.bf16.vlgmr.msra.gmra.mxu3 %v5052_v18  ;;  %v5073_v18 = vld [vmem:[#allocation3 + $0xfc] sm:$0xf0] }
  0xd7   : > { %1567 = vmatpush.bf16.msrb.mxu0 %v7496_v6  ;;  %v6254_v6 = vld [vmem:[#allocation3 + $0x34] sm:$0xf] }
  0xd8   : > { %1930 = vmatpush.bf16.msrb.mxu3 %v6233_v38  ;;  %6518 = vmatpush.bf16.msra.mxu2 %v6297_v26  ;;  %v4980_v54 = vor.u32 %v6254_v6, %v4977_v29 }
  0xdb   : > { %1568 = vmatpush.bf16.msrb.mxu0 %v7499_v41  ;;  %v746_v41 = vsel %vm7315_vm5, %v738_v53, %v745_v1  ;;  %1589 = vmatmul.bf16.vlgmr.msra.gmra.mxu2 %v5008_v57  ;;  %v6261_v53 = vld [vmem:[#allocation3 + $0x68] sm:$0xf0]  ;;  %v5179_v1 = vld [vmem:[#allocation3] sm:$0xf]  ;;  %v6263_v57 = vld [vmem:[#allocation3 + $0x7c] sm:$0xf] }
  0xdc   : > { %1931 = vmatpush.bf16.msrb.mxu3 %v6232_v46  ;;  %770 = vst [vmem:[#allocation3 + $0xc] sm:$0xf] %v746_v41  ;;  %v5076_v46 = vor.u32 %v6278_v16, %v5073_v18  ;;  %v5000_v52 = vor.u32 %v6261_v53, %v4999_v61  ;;  %v951_v41 = vld [vmem:[#allocation3 + $0xbc] sm:$0x8]  ;;  %v5055_v16 = vld [vmem:[#allocation3 + $0xc8] sm:$0xf] }
  0xdd   : > { %v952_v10 = vsel %vm7533_vm14, 0, %v951_v41  ;;  %v5023_v18 = vld [vmem:[#allocation3 + $0x90] sm:$0xf]  ;;  %v865_v61 = vrot.slane %v824_v56, 4 }
  0xde   : > { %953 = vst [vmem:[#allocation3 + $0xbc] sm:$0x8] %v952_v10  ;;  %v5024_v63 = vor.u32 %v6267_v15, %v5023_v18  ;;  %v5067_v10 = vld [vmem:[#allocation3 + $0xe0] sm:$0xf] }
  0xdf   : > { %1569 = vmatpush.bf16.msrb.mxu0 %v7505_v27  ;;  %v946_v27 = vsel %vm7533_vm14, 0, %v945_v3  ;;  %v6201_v3 = vld [vmem:[#allocation3 + $0x20] sm:$0xf0] }
  0xe0   : > { %1932 = vmatpush.bf16.msrb.mxu3 %v6231_v14  ;;  %947 = vst [vmem:[#allocation3 + $0x8c] sm:$0x8] %v946_v27  ;;  %v6260_v14 = vld [vmem:[#allocation3 + $0x64] sm:$0xf] }
  0xe2   : > { %1461 = vmatmul.bf16.gmra.mxu0 %v4976_v25  ;;  %v5043_v25 = vld [vmem:[#allocation3 + $0xb0] sm:$0xf] }
  0xe3   : > { %1570 = vmatpush.bf16.msrb.mxu0 %v7522_v55  ;;  %1520 = vmatmul.bf16.gmra.mxu1 %v4980_v54  ;;  %v6258_v55 = vld [vmem:[#allocation3 + $0x50] sm:$0xf0]  ;;  %v6198_v2 = vld [vmem:[#allocation3 + $0x8] sm:$0xf0]  ;;  %v5011_v54 = vld [vmem:[#allocation3 + $0x78] sm:$0xf] }
  0xe4   : > { %1933 = vmatpush.bf16.msrb.mxu3 %v6230_v21  ;;  %v5180_v45 = vor.u32 %v6198_v2, %v5179_v1  ;;  %v913_v21 = vsel %vm7478_vm11, 0, %v912_v24  ;;  %v816_v2 = vshrl.u32 %v7508_v40, 16  ;;  %v6269_v24 = vld [vmem:[#allocation3 + $0xac] sm:$0xf] }
  0xe5   : > { %1555 = vmatmul.bf16.gmra.mxu3 %v5064_v17  ;;  %914 = vst [vmem:[#allocation3 + $0xa8] sm:$0x1] %v913_v21  ;;  %v5013_v17 = vld [vmem:[#allocation3 + $0x84] sm:$0xf0]  ;;  %v6271_v27 = vld [vmem:[#allocation3 + $0xb8] sm:$0xf0] }
  0xe6   : > { %v5044_v48 = vor.u32 %v6271_v27, %v5043_v25  ;;  %v5016_v5 = vor.u32 %v6263_v57, %v5013_v17  ;;  %v882_v21 = vld [vmem:[#allocation3 + $0x104] sm:$0xf]  ;;  %v5215_v25 = vld [vmem:[#allocation3 + $0x48] sm:$0xf]  ;;  %v818_v57 = vrot.slane %v816_v2, 7 }
  0xe7   : > { %1571 = vmatpush.bf16.msrb.mxu0 %v6299_v7  ;;  %v6265_v31 = vld [vmem:[#allocation3 + $0x88] sm:$0xf0]  ;;  %v4988_v7 = vor.u32 %v6258_v55, %v4987_v12  ;;  %v954_v55 = vld [vmem:[#allocation3 + $0xd4] sm:$0x8] }
  0xe8   : > { %1934 = vmatpush.bf16.msrb.mxu3 %v6229_v9  ;;  %v5020_v38 = vor.u32 %v6265_v31, %v5019_v20  ;;  %v5191_v9 = vld [vmem:[#allocation3 + $0x18] sm:$0xf]  ;;  %v915_v20 = vld [vmem:[#allocation3 + $0xc0] sm:$0x1]  ;;  %v955_v12 = vsel %vm7533_vm14, 0, %v954_v55 }
  0xe9   : > { %v916_v58 = vsel %vm7478_vm11, 0, %v915_v20  ;;  %956 = vst [vmem:[#allocation3 + $0xd4] sm:$0x8] %v955_v12  ;;  %v6266_v31 = vld [vmem:[#allocation3 + $0x94] sm:$0xf] }
  0xea   : > { %917 = vst [vmem:[#allocation3 + $0xc0] sm:$0x1] %v916_v58  ;;  %v6207_v17 = vld [vmem:[#allocation3 + $0x50] sm:$0xf0] }
  0xeb   : > { %1572 = vmatpush.bf16.msrb.mxu0 %v6298_v44  ;;  %1594 = vmatmul.bf16.gmra.mxu2 %v5020_v38  ;;  %v948_v44 = vld [vmem:[#allocation3 + $0xa4] sm:$0x8]  ;;  %v5025_v38 = vld [vmem:[#allocation3 + $0x9c] sm:$0xf0]  ;;  %v5216_v55 = vor.u32 %v6207_v17, %v5215_v25  ;;  %v5239_v25 = vld [vmem:[#allocation3 + $0x78] sm:$0xf] }
  0xec   : > { %1935 = vmatpush.bf16.msrb.mxu3 %v6228_v34  ;;  %v949_v43 = vsel %vm7533_vm14, 0, %v948_v44  ;;  %v5012_v34 = vor.u32 %v6264_v22, %v5011_v54  ;;  %v5037_v22 = vld [vmem:[#allocation3 + $0xb4] sm:$0xf0] }
  0xed   : > { %950 = vst [vmem:[#allocation3 + $0xa4] sm:$0x8] %v949_v43  ;;  %v5028_v43 = vor.u32 %v6266_v31, %v5025_v38  ;;  %v826_v31 = vrot.slane %v824_v56, 7  ;;  %v822_v38 = vrot.slane %v818_v57, 4 }
  0xef   : > { %1573 = vmatpush.bf16.msrb.mxu0 %v6297_v26  ;;  %v5001_v26 = vld [vmem:[#allocation3 + $0x6c] sm:$0xf0] }
  0xf0   : > { %1936 = vmatpush.bf16.msrb.mxu3 %v6227_v8  ;;  %v5004_v29 = vor.u32 %v6260_v14, %v5001_v26  ;;  %v5192_v8 = vor.u32 %v6201_v3, %v5191_v9  ;;  %v957_v14 = vld [vmem:[#allocation3 + $0xec] sm:$0x8] }
  0xf1   : > { %v958_v26 = vsel %vm7533_vm14, 0, %v957_v14  ;;  %v5047_v56 = vld [vmem:[#allocation3 + $0xc0] sm:$0xf] }
  0xf2   : > { %1466 = vmatmul.bf16.gmra.mxu0 %v4988_v7  ;;  %v5203_v7 = vld [vmem:[#allocation3 + $0x30] sm:$0xf]  ;;  %959 = vst [vmem:[#allocation3 + $0xec] sm:$0x8] %v958_v26  ;;  %v5227_v14 = vld [vmem:[#allocation3 + $0x60] sm:$0xf] }
  0xf3   : > { %1525 = vmatmul.bf16.gmra.mxu1 %v4992_v42  ;;  %v6204_v42 = vld [vmem:[#allocation3 + $0x38] sm:$0xf0] }
  0xf4   : > { %v6268_v28 = vld [vmem:[#allocation3 + $0xa0] sm:$0xf0]  ;;  %v5204_v53 = vor.u32 %v6204_v42, %v5203_v7  ;;  %v790_v42 = vrot.slane %v756_v0, 4 }
  0xf5   : > { %1560 = vmatmul.bf16.gmra.mxu3 %v5076_v46  ;;  %v5032_v6 = vor.u32 %v6268_v28, %v5031_v19  ;;  %v6274_v46 = vld [vmem:[#allocation3 + $0xd0] sm:$0xf0]  ;;  %v827_v19 = vshll.u32 %v7510_v59, 16  ;;  %v918_v28 = vld [vmem:[#allocation3 + $0xd8] sm:$0x1] }
  0xf6   : > { %v5056_v44 = vor.u32 %v6274_v46, %v5055_v16  ;;  %v5035_v59 = vld [vmem:[#allocation3 + $0xa8] sm:$0xf] }
  0xf7   : > { %v863_v1 = vrot.slane %v827_v19, 5  ;;  %v829_v7 = vor.u32 %v827_v19, %v826_v31  ;;  %v6210_v19 = vld [vmem:[#allocation3 + $0x68] sm:$0xf0] }
  0xf9   : > { %v6277_v9 = vld [vmem:[#allocation3 + $0xe8] sm:$0xf0]  ;;  %v830_v46 = vsel %vm7315_vm5, %v822_v38, %v829_v7 }
  0xfa   : > { %v5068_v3 = vor.u32 %v6277_v9, %v5067_v10  ;;  %854 = vst [vmem:[#allocation3 + $0xfc] sm:$0xf] %v830_v46  ;;  %v6242_v9 = vld [vmem:[#allocation9 + $0x78] sm:$0xff] }
  0xfb   : > { %1599 = vmatmul.bf16.gmra.mxu2 %v5032_v6  ;;  %v866_v6 = vor.u32 %v865_v61, %v863_v1  ;;  %1988 = vmatpush.bf16.msra.mxu0 %v6242_v9  ;;  %v6250_v46 = vld [vmem:[#allocation9 + $0xb8] sm:$0xff] }
  0xfc   : > { %2047 = vmatpush.bf16.msrb.mxu1 %v6250_v46 }
  0xfd   : > { %v867_v41 = vrot.slane %v866_v6, 4  ;;  %v802_v6 = vld [vmem:[#allocation3 + $0x2c] sm:$0xf] }
  0xff   : > { %v883_v54 = vsel %vm7393_vm9, %v867_v41, %v882_v21 }
 0x100   : > { %884 = vst [vmem:[#allocation3 + $0x104] sm:$0xf] %v883_v54  ;;  %v6213_v54 = vld [vmem:[#allocation3 + $0x80] sm:$0xf0] }
 0x102   : > { %1471 = vmatmul.bf16.gmra.mxu0 %v5000_v52  ;;  %v919_v52 = vsel %vm7478_vm11, 0, %v918_v28 }
 0x103   : > { %1530 = vmatmul.bf16.gmra.mxu1 %v5004_v29  ;;  %v819_v29 = vshll.u32 %v7508_v40, 16  ;;  %920 = vst [vmem:[#allocation3 + $0xd8] sm:$0x1] %v919_v52  ;;  %v5040_v40 = vor.u32 %v6269_v24, %v5037_v22  ;;  %v5228_v52 = vor.u32 %v6210_v19, %v5227_v14  ;;  %v6276_v22 = vld [vmem:[#allocation3 + $0xe0] sm:$0xf0]  ;;  %v6238_v19 = vld [vmem:[#allocation9 + $0x58] sm:$0xff] }
 0x105   : > { %1937 = vmatmul.bf16.vlgmr.msrb.gmra.mxu3 %v5180_v45  ;;  %v6270_v45 = vld [vmem:[#allocation3 + $0xb0] sm:$0xf0]  ;;  %v821_v27 = vor.u32 %v819_v29, %v818_v57 }
 0x107   : > { %v960_v15 = vld [vmem:[#allocation3 + $0x104] sm:$0x8] }
 0x108   : > { %v961_v18 = vsel %vm7533_vm14, 0, %v960_v15 }
 0x109   : > { %962 = vst [vmem:[#allocation3 + $0x104] sm:$0x8] %v961_v18 }
 0x10a   : > { %v5059_v21 = vld [vmem:[#allocation3 + $0xd8] sm:$0xf] }
 0x10b   : > { %1604 = vmatmul.bf16.gmra.mxu2 %v5044_v48  ;;  %v5036_v48 = vor.u32 %v6270_v45, %v5035_v59  ;;  %v5060_v11 = vor.u32 %v6276_v22, %v5059_v21 }
 0x112   : > { %1476 = vmatmul.bf16.gmra.mxu0 %v5012_v34  ;;  %v859_v34 = vrot.slane %v816_v2, 4 }
 0x113   : > { %1535 = vmatmul.bf16.gmra.mxu1 %v5016_v5  ;;  %v860_v5 = vrot.slane %v819_v29, 5 }
 0x115   : > { %1942 = vmatmul.bf16.gmra.mxu3 %v5192_v8  ;;  %v851_v8 = vld [vmem:[#allocation3 + $0xf0] sm:$0xf]  ;;  %v861_v12 = vor.u32 %v860_v5, %v859_v34  ;;  %v6241_v34 = vld [vmem:[#allocation9 + $0x70] sm:$0xff] }
 0x116   : > { %v852_v20 = vsel %vm7292_vm2, %v821_v27, %v851_v8  ;;  %1989 = vmatpush.bf16.msra.mxu0 %v6241_v34  ;;  %v6245_v34 = vld [vmem:[#allocation9 + $0x90] sm:$0xff] }
 0x117   : > { %853 = vst [vmem:[#allocation3 + $0xf0] sm:$0xf] %v852_v20  ;;  %v862_v58 = vrot.slane %v861_v12, 4  ;;  %v5251_v20 = vld [vmem:[#allocation3 + $0x90] sm:$0xf] }
 0x118   : > { %v6216_v12 = vld [vmem:[#allocation3 + $0x98] sm:$0xf0] }
 0x119   : > { %v864_v16 = vsel %vm7384_vm8, %v862_v58, %v863_v1  ;;  %v6280_v1 = vld [vmem:[#allocation3 + $0x100] sm:$0xf0]  ;;  %v5252_v38 = vor.u32 %v6216_v12, %v5251_v20  ;;  %v6235_v20 = vld [vmem:[#allocation9 + $0x40] sm:$0xff] }
 0x11a   : > { %881 = vst [vmem:[#allocation3 + $0xf8] sm:$0xf] %v864_v16  ;;  %v6240_v16 = vld [vmem:[#allocation9 + $0x68] sm:$0xff] }
 0x11b   : > { %1609 = vmatmul.bf16.gmra.mxu2 %v5056_v44  ;;  %1990 = vmatpush.bf16.msra.mxu0 %v6240_v16  ;;  %v6222_v16 = vld [vmem:[#allocation3 + $0xc8] sm:$0xf0] }
 0x11e   : > { %v921_v44 = vld [vmem:[#allocation3 + $0xf0] sm:$0x1] }
 0x121   : > { %v5079_v26 = vld [vmem:[#allocation3 + $0xf8] sm:$0xf] }
 0x122   : > { %1481 = vmatmul.bf16.gmra.mxu0 %v5024_v63  ;;  %v922_v63 = vsel %vm7478_vm11, 0, %v921_v44  ;;  %v5080_v28 = vor.u32 %v6280_v1, %v5079_v26 }
 0x123   : > { %1540 = vmatmul.bf16.gmra.mxu1 %v5028_v43  ;;  %v788_v43 = vrot.slane %v759_v50, 5  ;;  %923 = vst [vmem:[#allocation3 + $0xf0] sm:$0x1] %v922_v63  ;;  %v785_v50 = vrot.slane %v751_v47, 5  ;;  %v5240_v47 = vor.u32 %v6213_v54, %v5239_v25  ;;  %v6246_v25 = vld [vmem:[#allocation9 + $0x98] sm:$0xff]  ;;  %v775_v54 = vrot.slane %v732_v23, 4 }
 0x124   : > { %v6350_v23 = vld [vmem:[#allocation9 + $0x1f8] sm:$0xff] }
 0x125   : > { %1947 = vmatmul.bf16.gmra.mxu3 %v5204_v53  ;;  %v6273_v53 = vld [vmem:[#allocation3 + $0xc8] sm:$0xf0]  ;;  %v791_v61 = vor.u32 %v790_v42, %v788_v43  ;;  %v786_v59 = vor.u32 %v785_v50, %v784_v36  ;;  %v6239_v42 = vld [vmem:[#allocation9 + $0x60] sm:$0xff] }
 0x126   : > { %v5048_v2 = vor.u32 %v6273_v53, %v5047_v56  ;;  %1991 = vmatpush.bf16.msra.mxu0 %v6239_v42  ;;  %v939_v53 = vld [vmem:[#allocation3 + $0x5c] sm:$0x8]  ;;  %2558 = vmatpush.bf16.msra.mxu3 %v6350_v23 }
 0x127   : > { %v792_v0 = vrot.slane %v791_v61, 4  ;;  %v787_v45 = vrot.slane %v786_v59, 4  ;;  %v6249_v61 = vld [vmem:[#allocation9 + $0xb0] sm:$0xff]  ;;  %v940_v14 = vsel %vm7533_vm14, 0, %v939_v53 }
 0x128   : > { %941 = vst [vmem:[#allocation3 + $0x5c] sm:$0x8] %v940_v14  ;;  %2048 = vmatpush.bf16.msrb.mxu1 %v6249_v61 }
 0x129   : > { %v803_v29 = vsel %vm7393_vm9, %v792_v0, %v802_v6  ;;  %v789_v41 = vsel %vm7384_vm8, %v787_v45, %v788_v43  ;;  %v779_v0 = vrot.slane %v743_v51, 5  ;;  %v6219_v6 = vld [vmem:[#allocation3 + $0xb0] sm:$0xf0]  ;;  %v6237_v51 = vld [vmem:[#allocation9 + $0x50] sm:$0xff] }
 0x12a   : > { %804 = vst [vmem:[#allocation3 + $0x2c] sm:$0xf] %v803_v29  ;;  %v5071_v8 = vld [vmem:[#allocation3 + $0xf0] sm:$0xf]  ;;  %1992 = vmatpush.bf16.msra.mxu0 %v6238_v19 }
 0x12b   : > { %1614 = vmatmul.bf16.gmra.mxu2 %v5068_v3  ;;  %801 = vst [vmem:[#allocation3 + $0x20] sm:$0xf] %v789_v41  ;;  %v6243_v19 = vld [vmem:[#allocation9 + $0x80] sm:$0xff] }
 0x12e   : > { %1993 = vmatpush.bf16.msra.mxu0 %v6237_v51 }
 0x131   : > { %v933_v24 = vld [vmem:[#allocation3 + $0x2c] sm:$0x8] }
 0x132   : > { %1486 = vmatmul.bf16.gmra.mxu0 %v5036_v48  ;;  %v934_v10 = vsel %vm7533_vm14, 0, %v933_v24  ;;  %v4971_v26 = vld [vmem:[#allocation3 + $0x20] sm:$0xf] }
 0x133   : > { %1545 = vmatmul.bf16.gmra.mxu1 %v5040_v40  ;;  %935 = vst [vmem:[#allocation3 + $0x2c] sm:$0x8] %v934_v10  ;;  %v936_v40 = vld [vmem:[#allocation3 + $0x44] sm:$0x8] }
 0x134   : > { %v937_v5 = vsel %vm7533_vm14, 0, %v936_v40 }
 0x135   : > { %1952 = vmatmul.bf16.gmra.mxu3 %v5216_v55  ;;  %938 = vst [vmem:[#allocation3 + $0x44] sm:$0x8] %v937_v5  ;;  %v6279_v55 = vld [vmem:[#allocation3 + $0xf8] sm:$0xf0] }
 0x136   : > { %v5072_v15 = vor.u32 %v6279_v55, %v5071_v8  ;;  %v4983_v8 = vld [vmem:[#allocation3 + $0x38] sm:$0xf] }
 0x13a   : > { %v6253_v1 = vld [vmem:[#allocation3 + $0x28] sm:$0xf0] }
 0x13b   : > { %1619 = vmatmul.bf16.gmra.mxu2 %v5080_v28  ;;  %v5263_v28 = vld [vmem:[#allocation3 + $0xa8] sm:$0xf]  ;;  %v4972_v50 = vor.u32 %v6253_v1, %v4971_v26 }
 0x13c   : > { %v5264_v41 = vor.u32 %v6219_v6, %v5263_v28  ;;  %v6358_v1 = vld [vmem:[#allocation9 + $0x238] sm:$0xff] }
 0x142   : > { %1491 = vmatmul.bf16.gmra.mxu0 %v5048_v2  ;;  %v781_v2 = vrot.slane %v740_v30, 4  ;;  %v798_v30 = vld [vmem:[#allocation3 + $0x14] sm:$0xf] }
 0x144   : > { %v782_v29 = vor.u32 %v781_v2, %v779_v0 }
 0x145   : > { %1957 = vmatmul.bf16.gmra.mxu3 %v5228_v52  ;;  %v6248_v52 = vld [vmem:[#allocation9 + $0xa8] sm:$0xff] }
 0x146   : > { %2049 = vmatpush.bf16.msrb.mxu1 %v6248_v52  ;;  %v783_v24 = vrot.slane %v782_v29, 4 }
 0x148   : > { %v799_v22 = vsel %vm7393_vm9, %v783_v24, %v798_v30  ;;  %v6349_v30 = vld [vmem:[#allocation9 + $0x1f0] sm:$0xff] }
 0x149   : > { %800 = vst [vmem:[#allocation3 + $0x14] sm:$0xf] %v799_v22  ;;  %2559 = vmatpush.bf16.msra.mxu3 %v6349_v30 }
 0x14a   : > { %2050 = vmatpush.bf16.msrb.mxu1 %v6247_v39 }
 0x14e   : > { %2051 = vmatpush.bf16.msrb.mxu1 %v6246_v25 }
 0x14f   : > { %v1457_v57 = vpop.f32.mrf.mxu0 }
 0x150   : > { %v1516_v60 = vpop.f32.mrf.mxu1  ;;  %v930_v12 = vld [vmem:[#allocation3 + $0x14] sm:$0x8] }
 0x151   : > { %v7605_v17 = vadd.f32 %v1516_v60, %v1457_v57  ;;  %v6236_v60 = vld [vmem:[#allocation9 + $0x48] sm:$0xff] }
 0x152   : > { %1496 = vmatmul.bf16.gmra.mxu0 %v5060_v11  ;;  %v776_v11 = vrot.slane %v735_v35, 5  ;;  %2052 = vmatpush.bf16.msrb.mxu1 %v6245_v34  ;;  %v6256_v35 = vld [vmem:[#allocation3 + $0x40] sm:$0xf0]  ;;  %v6202_v34 = vld [vmem:[#allocation3 + $0x28] sm:$0xf0] }
 0x153   : > { %1994 = vmatpush.bf16.msra.mxu0 %v6236_v60  ;;  %v4984_v42 = vor.u32 %v6256_v35, %v4983_v8 }
 0x155   : > { %1962 = vmatmul.bf16.gmra.mxu3 %v5240_v47  ;;  %v777_v47 = vor.u32 %v776_v11, %v775_v54 }
 0x157   : > { %v7609_v27 = vpop.f32.mrf.mxu0  ;;  %v778_v5 = vrot.slane %v777_v47, 4  ;;  %1995 = vmatpush.bf16.msra.mxu0 %v6235_v20  ;;  %v5199_v47 = vld [vmem:[#allocation3 + $0x20] sm:$0xf] }
 0x158   : > { %v7607_v3 = vpop.f32.mrf.mxu3  ;;  %v7611_v48 = vpop.f32.mrf.mxu1 }
 0x159   : > { %v780_v4 = vsel %vm7384_vm8, %v778_v5, %v779_v0  ;;  %v5200_v5 = vor.u32 %v6202_v34, %v5199_v47  ;;  %v5223_v34 = vld [vmem:[#allocation3 + $0x50] sm:$0xf] }
 0x15a   : > { %797 = vst [vmem:[#allocation3 + $0x8] sm:$0xf] %v780_v4  ;;  %v6357_v4 = vld [vmem:[#allocation9 + $0x230] sm:$0xff] }
 0x15e   : > { %v7621_v63 = vpop.f32.mrf.mxu2 }
 0x15f   : > { %v1462_v18 = vpop.f32.mrf.mxu0 }
 0x160   : > { %v7615_v58 = vpop.f32.mrf.mxu3  ;;  %v1521_v31 = vpop.f32.mrf.mxu1 }
 0x161   : > { %v7617_v7 = vadd.f32 %v1521_v31, %v1462_v18  ;;  %v6244_v18 = vld [vmem:[#allocation9 + $0x88] sm:$0xff]  ;;  %v931_v31 = vsel %vm7533_vm14, 0, %v930_v12  ;;  %v5187_v0 = vld [vmem:[#allocation3 + $0x8] sm:$0xf]  ;;  %v6197_v12 = vld [vmem:[#allocation3 + $0x4] sm:$0xf] }
 0x162   : > { %1501 = vmatmul.bf16.gmra.mxu0 %v5072_v15  ;;  %v5275_v15 = vld [vmem:[#allocation3 + $0xc0] sm:$0xf]  ;;  %932 = vst [vmem:[#allocation3 + $0x14] sm:$0x8] %v931_v31  ;;  %2053 = vmatpush.bf16.msrb.mxu1 %v6244_v18 }
 0x163   : > { %v5276_v61 = vor.u32 %v6222_v16, %v5275_v15  ;;  %v5181_v15 = vld [vmem:[#allocation3 + $0xc] sm:$0xf0] }
 0x164   : > { %v5184_v16 = vor.u32 %v6197_v12, %v5181_v15 }
 0x165   : > { %1967 = vmatmul.bf16.gmra.mxu3 %v5252_v38 }
 0x166   : > { %v7637_v21 = vpop.f32.mrf.mxu2  ;;  %2054 = vmatpush.bf16.msrb.mxu1 %v6243_v19 }
 0x167   : > { %v7623_v43 = vpop.f32.mrf.mxu0 }
 0x168   : > { %v7619_v44 = vpop.f32.mrf.mxu3  ;;  %v7625_v56 = vpop.f32.mrf.mxu1 }
 0x169   : > { %v6199_v28 = vld [vmem:[#allocation3 + $0x10] sm:$0xf0] }
 0x16a   : > { %v5188_v6 = vor.u32 %v6199_v28, %v5187_v0 }
 0x16c   : > { %2055 = vmatmul.bf16.vlgmr.msrb.gmra.mxu1 %v5188_v6 }
 0x16e   : > { %v1595_v55 = vpop.f32.mrf.mxu2 }
 0x16f   : > { %v1467_v59 = vpop.f32.mrf.mxu0 }
 0x170   : > { %v7633_v36 = vpop.f32.mrf.mxu3  ;;  %v1526_v45 = vpop.f32.mrf.mxu1 }
 0x171   : > { %v7635_v10 = vadd.f32 %v1526_v45, %v1467_v59  ;;  %v4995_v59 = vld [vmem:[#allocation3 + $0x50] sm:$0xf]  ;;  %v5287_v45 = vld [vmem:[#allocation3 + $0xd8] sm:$0xf] }
 0x172   : > { %1574 = vmatmul.bf16.vlgmr.msrb.gmra.mxu0 %v4972_v50 }
 0x173   : > { %2617 = vmatpush.bf16.msrb.mxu0 %v6358_v1 }
 0x175   : > { %1972 = vmatmul.bf16.gmra.mxu3 %v5264_v41  ;;  %v6225_v41 = vld [vmem:[#allocation3 + $0xe0] sm:$0xf0] }
 0x176   : > { %v7660_v2 = vpop.f32.mrf.mxu2  ;;  %v5288_v54 = vor.u32 %v6225_v41, %v5287_v45  ;;  %v6356_v45 = vld [vmem:[#allocation9 + $0x228] sm:$0xff] }
 0x177   : > { %v7647_v9 = vpop.f32.mrf.mxu0  ;;  %2618 = vmatpush.bf16.msrb.mxu0 %v6357_v4  ;;  %v6200_v41 = vld [vmem:[#allocation3 + $0x1c] sm:$0xf] }
 0x178   : > { %v7645_v57 = vpop.f32.mrf.mxu3  ;;  %v7649_v40 = vpop.f32.mrf.mxu1 }
 0x17b   : > { %2619 = vmatpush.bf16.msrb.mxu0 %v6356_v45  ;;  %v5235_v45 = vld [vmem:[#allocation3 + $0x68] sm:$0xf] }
 0x17c   : > { %2060 = vmatmul.bf16.gmra.mxu1 %v5200_v5  ;;  %v6208_v5 = vld [vmem:[#allocation3 + $0x58] sm:$0xf0] }
 0x17d   : > { %v5224_v4 = vor.u32 %v6208_v5, %v5223_v34  ;;  %v6346_v34 = vld [vmem:[#allocation9 + $0x1d8] sm:$0xff] }
 0x17e   : > { %v1600_v39 = vpop.f32.mrf.mxu2  ;;  %v6206_v5 = vld [vmem:[#allocation3 + $0x4c] sm:$0xf] }
 0x17f   : > { %v1472_v46 = vpop.f32.mrf.mxu0 }
 0x180   : > { %v7655_v38 = vpop.f32.mrf.mxu3  ;;  %v1531_v53 = vpop.f32.mrf.mxu1 }
 0x181   : > { %8371 = vst [vmem:[#allocation28_spill] sm:$0xff] %v7655_v38  ;;  %v1532_v14 = vadd.f32 %v1531_v53, %v1472_v46  ;;  %v6348_v53 = vld [vmem:[#allocation9 + $0x1e8] sm:$0xff] }
 0x182   : > { %1579 = vmatmul.bf16.gmra.mxu0 %v4984_v42  ;;  %2560 = vmatpush.bf16.msra.mxu3 %v6348_v53  ;;  %v6203_v53 = vld [vmem:[#allocation3 + $0x34] sm:$0xf] }
 0x183   : > { %v7658_v26 = vadd.f32 %v7621_v63, %v1532_v14  ;;  %v6259_v63 = vld [vmem:[#allocation3 + $0x58] sm:$0xf0]  ;;  %v6205_v14 = vld [vmem:[#allocation3 + $0x40] sm:$0xf0] }
 0x184   : > { %v4996_v51 = vor.u32 %v6259_v63, %v4995_v59  ;;  %v6342_v63 = vld [vmem:[#allocation9 + $0x1b8] sm:$0xff] }
 0x185   : > { %1977 = vmatmul.bf16.gmra.mxu3 %v5276_v61  ;;  %v5211_v61 = vld [vmem:[#allocation3 + $0x38] sm:$0xf]  ;;  %2499 = vmatpush.bf16.msrb.mxu2 %v6342_v63 }
 0x186   : > { %v7678_v35 = vpop.f32.mrf.mxu2  ;;  %v5212_v1 = vor.u32 %v6205_v14, %v5211_v61  ;;  %v5205_v61 = vld [vmem:[#allocation3 + $0x3c] sm:$0xf0] }
 0x187   : > { %v7664_v29 = vpop.f32.mrf.mxu0 }
 0x188   : > { %v7662_v52 = vpop.f32.mrf.mxu3  ;;  %v7666_v50 = vpop.f32.mrf.mxu1 }
 0x18c   : > { %2065 = vmatmul.bf16.gmra.mxu1 %v5212_v1 }
 0x18e   : > { %v1605_v19 = vpop.f32.mrf.mxu2 }
 0x18f   : > { %v1477_v22 = vpop.f32.mrf.mxu0 }
 0x190   : > { %v7668_v24 = vpop.f32.mrf.mxu3  ;;  %v1536_v25 = vpop.f32.mrf.mxu1 }
 0x191   : > { %v1537_v11 = vadd.f32 %v1536_v25, %v1477_v22 }
 0x192   : > { %1584 = vmatmul.bf16.gmra.mxu0 %v4996_v51  ;;  %v5193_v51 = vld [vmem:[#allocation3 + $0x24] sm:$0xf0] }
 0x193   : > { %v7670_v60 = vadd.f32 %v1595_v55, %v1537_v11  ;;  %v5196_v22 = vor.u32 %v6200_v41, %v5193_v51  ;;  %v6211_v41 = vld [vmem:[#allocation3 + $0x70] sm:$0xf0] }
 0x194   : > { %v5236_v51 = vor.u32 %v6211_v41, %v5235_v45 }
 0x195   : > { %1982 = vmatmul.bf16.gmra.mxu3 %v5288_v54 }
 0x197   : > { %v7674_v23 = vpop.f32.mrf.mxu0 }
 0x198   : > { %v7672_v8 = vpop.f32.mrf.mxu3  ;;  %v7676_v20 = vpop.f32.mrf.mxu1 }
 0x19c   : > { %2070 = vmatmul.bf16.gmra.mxu1 %v5224_v4  ;;  %v5217_v4 = vld [vmem:[#allocation3 + $0x54] sm:$0xf0] }
 0x19f   : > { %v1482_v18 = vpop.f32.mrf.mxu0 }
 0x1a0   : > { %v7680_v55 = vpop.f32.mrf.mxu3  ;;  %v1541_v31 = vpop.f32.mrf.mxu1 }
 0x1a1   : > { %v1542_v42 = vadd.f32 %v1541_v31, %v1482_v18  ;;  %v6347_v31 = vld [vmem:[#allocation9 + $0x1e0] sm:$0xff] }
 0x1a2   : > { %1996 = vmatmul.bf16.vlgmr.msra.gmra.mxu0 %v5184_v16  ;;  %2561 = vmatpush.bf16.msra.mxu3 %v6347_v31 }
 0x1a3   : > { %v7682_v46 = vadd.f32 %v1600_v39, %v1542_v42  ;;  %v7688_v39 = vpop.f32.mrf.mxu2  ;;  %v6341_v42 = vld [vmem:[#allocation9 + $0x1b0] sm:$0xff] }
 0x1a4   : > { %2500 = vmatpush.bf16.msrb.mxu2 %v6341_v42 }
 0x1a6   : > { %2562 = vmatpush.bf16.msra.mxu3 %v6346_v34  ;;  %v5229_v34 = vld [vmem:[#allocation3 + $0x6c] sm:$0xf0] }
 0x1a7   : > { %v1484_v28 = vpop.f32.mrf.mxu0 }
 0x1a8   : > { %v7684_v0 = vpop.f32.mrf.mxu3  ;;  %v1543_v6 = vpop.f32.mrf.mxu1 }
 0x1a9   : > { %v7686_v59 = vadd.f32 %v1543_v6, %v1484_v28  ;;  %v6355_v28 = vld [vmem:[#allocation9 + $0x220] sm:$0xff] }
 0x1aa   : > { %2620 = vmatpush.bf16.msrb.mxu0 %v6355_v28  ;;  %v6339_v28 = vld [vmem:[#allocation9 + $0x1a0] sm:$0xff] }
 0x1ab   : > { %v1610_v18 = vpop.f32.mrf.mxu2 }
 0x1ac   : > { %2075 = vmatmul.bf16.gmra.mxu1 %v5236_v51 }
 0x1af   : > { %v1487_v25 = vpop.f32.mrf.mxu0 }
 0x1b0   : > { %v7690_v30 = vpop.f32.mrf.mxu3  ;;  %v1546_v54 = vpop.f32.mrf.mxu1 }
 0x1b1   : > { %v1547_v11 = vadd.f32 %v1546_v54, %v1487_v25 }
 0x1b2   : > { %2001 = vmatmul.bf16.gmra.mxu0 %v5196_v22 }
 0x1b3   : > { %v7692_v47 = vadd.f32 %v1605_v19, %v1547_v11  ;;  %v5208_v19 = vor.u32 %v6203_v53, %v5205_v61  ;;  %v7702_v63 = vpop.f32.mrf.mxu2  ;;  %v6340_v11 = vld [vmem:[#allocation9 + $0x1a8] sm:$0xff]  ;;  %v5247_v61 = vld [vmem:[#allocation3 + $0x80] sm:$0xf] }
 0x1b4   : > { %2501 = vmatpush.bf16.msrb.mxu2 %v6340_v11  ;;  %v6209_v11 = vld [vmem:[#allocation3 + $0x64] sm:$0xf] }
 0x1b7   : > { %v7697_v16 = vpop.f32.mrf.mxu0 }
 0x1b8   : > { %v1953_v12 = vpop.f32.mrf.mxu3  ;;  %2502 = vmatpush.bf16.msrb.mxu2 %v6339_v28 }
 0x1b9   : > { %v7695_v15 = vadd.f32 %v1953_v12, %v7658_v26 }
 0x1bf   : > { %v1492_v1 = vpop.f32.mrf.mxu0 }
 0x1c0   : > { %v7699_v14 = vpop.f32.mrf.mxu3  ;;  %v1552_v6 = vadd.f32 %v7607_v3, %v1492_v1  ;;  %v1615_v3 = vpop.f32.mrf.mxu2 }
 0x1c2   : > { %v7704_v26 = vadd.f32 %v1610_v18, %v1552_v6  ;;  %2006 = vmatmul.bf16.gmra.mxu0 %v5208_v19  ;;  %v5220_v18 = vor.u32 %v6206_v5, %v5217_v4  ;;  %v6214_v19 = vld [vmem:[#allocation3 + $0x88] sm:$0xf0]  ;;  %v5232_v5 = vor.u32 %v6209_v11, %v5229_v34 }
 0x1c3   : > { %v5248_v1 = vor.u32 %v6214_v19, %v5247_v61  ;;  %v5259_v61 = vld [vmem:[#allocation3 + $0x98] sm:$0xf]  ;;  %v6217_v19 = vld [vmem:[#allocation3 + $0xa0] sm:$0xf0] }
 0x1c5   : > { %2080 = vmatmul.bf16.gmra.mxu1 %v5248_v1 }
 0x1c7   : > { %v7709_v54 = vpop.f32.mrf.mxu0 }
 0x1c8   : > { %v1958_v22 = vpop.f32.mrf.mxu3  ;;  %v1617_v6 = vpop.f32.mrf.mxu2 }
 0x1c9   : > { %v7707_v25 = vadd.f32 %v1958_v22, %v7670_v60  ;;  %v6354_v60 = vld [vmem:[#allocation9 + $0x218] sm:$0xff] }
 0x1ca   : > { %2621 = vmatpush.bf16.msrb.mxu0 %v6354_v60 }
 0x1cf   : > { %v1497_v31 = vpop.f32.mrf.mxu0 }
 0x1d0   : > { %v7711_v12 = vpop.f32.mrf.mxu3  ;;  %v1557_v42 = vadd.f32 %v7619_v44, %v1497_v31  ;;  %v6345_v31 = vld [vmem:[#allocation9 + $0x1d0] sm:$0xff] }
 0x1d1   : > { %2563 = vmatpush.bf16.msra.mxu3 %v6345_v31  ;;  %v6220_v31 = vld [vmem:[#allocation3 + $0xb8] sm:$0xf0] }
 0x1d2   : > { %v7714_v53 = vadd.f32 %v1615_v3, %v1557_v42  ;;  %2011 = vmatmul.bf16.gmra.mxu0 %v5220_v18  ;;  %v1620_v18 = vpop.f32.mrf.mxu2 }
 0x1d7   : > { %v1499_v51 = vpop.f32.mrf.mxu0 }
 0x1d8   : > { %v1963_v45 = vpop.f32.mrf.mxu3  ;;  %v1559_v22 = vadd.f32 %v7633_v36, %v1499_v51  ;;  %v5260_v36 = vor.u32 %v6217_v19, %v5259_v61  ;;  %v6212_v51 = vld [vmem:[#allocation3 + $0x7c] sm:$0xf] }
 0x1d9   : > { %v7717_v41 = vadd.f32 %v1963_v45, %v7682_v46  ;;  %v6338_v46 = vld [vmem:[#allocation9 + $0x198] sm:$0xff]  ;;  %v6353_v45 = vld [vmem:[#allocation9 + $0x210] sm:$0xff] }
 0x1da   : > { %v7720_v44 = vadd.f32 %v1617_v6, %v1559_v22  ;;  %2503 = vmatpush.bf16.msrb.mxu2 %v6338_v46  ;;  %2085 = vmatmul.bf16.gmra.mxu1 %v5260_v36  ;;  %v1519_v46 = vadd.f32 %v7611_v48, %v7609_v27  ;;  %v5283_v27 = vld [vmem:[#allocation3 + $0xc8] sm:$0xf]  ;;  %v6223_v48 = vld [vmem:[#allocation3 + $0xd0] sm:$0xf0] }
 0x1db   : > { %2622 = vmatpush.bf16.msrb.mxu0 %v6353_v45  ;;  %v6215_v45 = vld [vmem:[#allocation3 + $0x94] sm:$0xf] }
 0x1df   : > { %v1502_v4 = vpop.f32.mrf.mxu0 }
 0x1e0   : > { %v7722_v3 = vpop.f32.mrf.mxu3  ;;  %v1562_v42 = vadd.f32 %v7645_v57, %v1502_v4  ;;  %v5241_v57 = vld [vmem:[#allocation3 + $0x84] sm:$0xf0]  ;;  %v6337_v4 = vld [vmem:[#allocation9 + $0x190] sm:$0xff] }
 0x1e1   : > { %v5244_v11 = vor.u32 %v6212_v51, %v5241_v57  ;;  %2504 = vmatpush.bf16.msrb.mxu2 %v6337_v4  ;;  %v5253_v51 = vld [vmem:[#allocation3 + $0x9c] sm:$0xf0]  ;;  %v6336_v4 = vld [vmem:[#allocation9 + $0x188] sm:$0xff] }
 0x1e2   : > { %v7725_v60 = vadd.f32 %v1620_v18, %v1562_v42  ;;  %2016 = vmatmul.bf16.gmra.mxu0 %v5232_v5  ;;  %v6344_v18 = vld [vmem:[#allocation9 + $0x1c8] sm:$0xff] }
 0x1e3   : > { %2564 = vmatpush.bf16.msra.mxu3 %v6344_v18 }
 0x1e5   : > { %2505 = vmatpush.bf16.msrb.mxu2 %v6336_v4 }
 0x1e7   : > { %v7730_v6 = vpop.f32.mrf.mxu0 }
 0x1e8   : > { %v1968_v1 = vpop.f32.mrf.mxu3 }
 0x1e9   : > { %v7728_v28 = vadd.f32 %v1968_v1, %v7692_v47  ;;  %v5271_v47 = vld [vmem:[#allocation3 + $0xb0] sm:$0xf] }
 0x1ea   : > { %v5272_v42 = vor.u32 %v6220_v31, %v5271_v47  ;;  %v5284_v47 = vor.u32 %v6223_v48, %v5283_v27  ;;  %v1524_v31 = vadd.f32 %v7625_v56, %v7623_v43  ;;  %v6306_v27 = vld [vmem:[#allocation3 + $0x38] sm:$0xf0]  ;;  %v6305_v48 = vld [vmem:[#allocation3 + $0x34] sm:$0xf] }
 0x1ec   : > { %2090 = vmatmul.bf16.gmra.mxu1 %v5272_v42 }
 0x1ef   : > { %v1575_v34 = vpop.f32.mrf.mxu0 }
 0x1f0   : > { %v7732_v22 = vpop.f32.mrf.mxu3  ;;  %v7735_v5 = vadd.f32 %v1575_v34, %v7605_v17  ;;  %v6352_v17 = vld [vmem:[#allocation9 + $0x208] sm:$0xff] }
 0x1f1   : > { %2623 = vmatpush.bf16.msrb.mxu0 %v6352_v17  ;;  %v6351_v17 = vld [vmem:[#allocation9 + $0x200] sm:$0xff] }
 0x1f2   : > { %2021 = vmatmul.bf16.gmra.mxu0 %v5244_v11  ;;  %v5256_v11 = vor.u32 %v6215_v45, %v5253_v51  ;;  %v6218_v45 = vld [vmem:[#allocation3 + $0xac] sm:$0xf]  ;;  %v5265_v51 = vld [vmem:[#allocation3 + $0xb4] sm:$0xf0] }
 0x1f5   : > { %2624 = vmatpush.bf16.msrb.mxu0 %v6351_v17 }
 0x1f7   : > { %v1577_v36 = vpop.f32.mrf.mxu0 }
 0x1f8   : > { %v1973_v61 = vpop.f32.mrf.mxu3  ;;  %v7742_v1 = vadd.f32 %v1577_v36, %v1519_v46 }
 0x1f9   : > { %v7740_v19 = vadd.f32 %v1973_v61, %v7704_v26  ;;  %v6343_v26 = vld [vmem:[#allocation9 + $0x1c0] sm:$0xff] }
 0x1fa   : > { %2565 = vmatpush.bf16.msra.mxu3 %v6343_v26  ;;  %v5397_v26 = vld [vmem:[#allocation3 + $0x3c] sm:$0xf0] }
 0x1fc   : > { %2095 = vmatmul.bf16.gmra.mxu1 %v5284_v47 }
 0x1ff   : > { %v1580_v34 = vpop.f32.mrf.mxu0 }
 0x200   : > { %v7744_v57 = vpop.f32.mrf.mxu3  ;;  %v7747_v18 = vadd.f32 %v1580_v34, %v7617_v7  ;;  %v6335_v7 = vld [vmem:[#allocation9 + $0x180] sm:$0xff]  ;;  %v5268_v34 = vor.u32 %v6218_v45, %v5265_v51  ;;  %v6221_v51 = vld [vmem:[#allocation3 + $0xc4] sm:$0xf] }
 0x201   : > { %2506 = vmatpush.bf16.msrb.mxu2 %v6335_v7  ;;  %v1529_v7 = vadd.f32 %v7649_v40, %v7647_v9  ;;  %v5409_v40 = vld [vmem:[#allocation3 + $0x54] sm:$0xf0] }
 0x202   : > { %2026 = vmatmul.bf16.gmra.mxu0 %v5256_v11 }
 0x207   : > { %v1582_v61 = vpop.f32.mrf.mxu0 }
 0x208   : > { %v1978_v42 = vpop.f32.mrf.mxu3  ;;  %v7754_v36 = vadd.f32 %v1582_v61, %v1524_v31  ;;  %v5400_v31 = vor.u32 %v6305_v48, %v5397_v26  ;;  %v6226_v61 = vld [vmem:[#allocation3 + $0xe8] sm:$0xf0]  ;;  %v5407_v48 = vld [vmem:[#allocation3 + $0x48] sm:$0xf]  ;;  %v6309_v26 = vld [vmem:[#allocation3 + $0x50] sm:$0xf0] }
 0x209   : > { %v7752_v46 = vadd.f32 %v1978_v42, %v7714_v53  ;;  %v5395_v53 = vld [vmem:[#allocation3 + $0x30] sm:$0xf]  ;;  %v5295_v42 = vld [vmem:[#allocation3 + $0xe0] sm:$0xf]  ;;  %v5408_v9 = vor.u32 %v6309_v26, %v5407_v48 }
 0x20a   : > { %v5396_v47 = vor.u32 %v6306_v27, %v5395_v53  ;;  %v5296_v38 = vor.u32 %v6226_v61, %v5295_v42  ;;  %2566 = vmatmul.bf16.vlgmr.msra.gmra.mxu3 %v5400_v31  ;;  %v1944_v61 = vadd.f32 %v7672_v8, %v7747_v18  ;;  %v5403_v8 = vld [vmem:[#allocation3 + $0x38] sm:$0xf]  ;;  %v6307_v18 = vld [vmem:[#allocation3 + $0x40] sm:$0xf0] }
 0x20c   : > { %2507 = vmatmul.bf16.vlgmr.msrb.gmra.mxu2 %v5396_v47  ;;  %2100 = vmatmul.bf16.gmra.mxu1 %v5296_v38  ;;  %v6308_v47 = vld [vmem:[#allocation3 + $0x4c] sm:$0xf]  ;;  %v1941_v38 = vadd.f32 %v7668_v24, %v7742_v1  ;;  %v1946_v24 = vadd.f32 %v7680_v55, %v7754_v36 }
 0x20f   : > { %v1585_v43 = vpop.f32.mrf.mxu0 }
 0x210   : > { %v1980_v11 = vpop.f32.mrf.mxu3  ;;  %v1586_v56 = vadd.f32 %v1585_v43, %v7635_v10 }
 0x211   : > { %v7757_v4 = vadd.f32 %v1980_v11, %v7720_v44  ;;  %v5277_v11 = vld [vmem:[#allocation3 + $0xcc] sm:$0xf0] }
 0x212   : > { %2031 = vmatmul.bf16.gmra.mxu0 %v5268_v34  ;;  %v1939_v34 = vadd.f32 %v7662_v52, %v7735_v5  ;;  %v5280_v43 = vor.u32 %v6221_v51, %v5277_v11  ;;  %v6224_v52 = vld [vmem:[#allocation3 + $0xdc] sm:$0xf]  ;;  %v5289_v5 = vld [vmem:[#allocation3 + $0xe4] sm:$0xf0]  ;;  %v5419_v51 = vld [vmem:[#allocation3 + $0x60] sm:$0xf] }
 0x213   : > { %v6312_v11 = vld [vmem:[#allocation3 + $0x68] sm:$0xf0] }
 0x217   : > { %v1587_v10 = vpop.f32.mrf.mxu0 }
 0x218   : > { %v1983_v44 = vpop.f32.mrf.mxu3  ;;  %v1588_v45 = vadd.f32 %v1587_v10, %v1529_v7  ;;  %v5292_v7 = vor.u32 %v6224_v52, %v5289_v5  ;;  %v6314_v52 = vld [vmem:[#allocation3 + $0x7c] sm:$0xf] }
 0x219   : > { %v7763_v17 = vadd.f32 %v1983_v44, %v7725_v60  ;;  %v5412_v60 = vor.u32 %v6308_v47, %v5409_v40  ;;  %v1949_v47 = vadd.f32 %v7684_v0, %v1586_v56  ;;  %v6310_v0 = vld [vmem:[#allocation3 + $0x58] sm:$0xf0] }
 0x21a   : > { %v1951_v55 = vadd.f32 %v7690_v30, %v1588_v45 }
 0x21b   : > { %2571 = vmatmul.bf16.gmra.mxu3 %v5412_v60 }
 0x21c   : > { %2512 = vmatmul.bf16.gmra.mxu2 %v5408_v9  ;;  %v5404_v9 = vor.u32 %v6307_v18, %v5403_v8  ;;  %v5445_v8 = vld [vmem:[#allocation3 + $0x9c] sm:$0xf0] }
 0x21f   : > { %v1997_v53 = vpop.f32.mrf.mxu0 }
 0x220   : > { %v7767_v27 = vadd.f32 %v1997_v53, %v1939_v34  ;;  %v6311_v34 = vld [vmem:[#allocation3 + $0x64] sm:$0xf]  ;;  %v5421_v53 = vld [vmem:[#allocation3 + $0x6c] sm:$0xf0] }
 0x221   : > { %v5424_v48 = vor.u32 %v6311_v34, %v5421_v53  ;;  %v1534_v34 = vadd.f32 %v7666_v50, %v7664_v29  ;;  %v5443_v53 = vld [vmem:[#allocation3 + $0x90] sm:$0xf]  ;;  %v5427_v29 = vld [vmem:[#allocation3 + $0x68] sm:$0xf]  ;;  %v6313_v50 = vld [vmem:[#allocation3 + $0x70] sm:$0xf0] }
 0x222   : > { %2036 = vmatmul.bf16.gmra.mxu0 %v5280_v43  ;;  %v5420_v43 = vor.u32 %v6312_v11, %v5419_v51  ;;  %v5415_v51 = vld [vmem:[#allocation3 + $0x50] sm:$0xf] }
 0x223   : > { %v5416_v56 = vor.u32 %v6310_v0, %v5415_v51  ;;  %v1593_v45 = vadd.f32 %v7637_v21, %v1534_v34  ;;  %v6320_v21 = vld [vmem:[#allocation3 + $0xac] sm:$0xf]  ;;  %v5467_v34 = vld [vmem:[#allocation3 + $0xc0] sm:$0xf] }
 0x225   : > { %v1956_v18 = vadd.f32 %v7699_v14, %v1593_v45 }
 0x227   : > { %v1999_v31 = vpop.f32.mrf.mxu0 }
 0x228   : > { %v7771_v42 = vadd.f32 %v1999_v31, %v1941_v38  ;;  %v5431_v38 = vld [vmem:[#allocation3 + $0x78] sm:$0xf]  ;;  %v6315_v31 = vld [vmem:[#allocation3 + $0x80] sm:$0xf0] }
 0x229   : > { %v5432_v5 = vor.u32 %v6315_v31, %v5431_v38  ;;  %v1539_v38 = vadd.f32 %v7676_v20, %v7674_v23  ;;  %v5439_v23 = vld [vmem:[#allocation3 + $0x80] sm:$0xf]  ;;  %v6316_v20 = vld [vmem:[#allocation3 + $0x88] sm:$0xf0] }
 0x22b   : > { %2576 = vmatmul.bf16.gmra.mxu3 %v5424_v48  ;;  %v6318_v48 = vld [vmem:[#allocation3 + $0x98] sm:$0xf0] }
 0x22c   : > { %2517 = vmatmul.bf16.gmra.mxu2 %v5420_v43 }
 0x22f   : > { %v2002_v44 = vpop.f32.mrf.mxu0 }
 0x230   : > { %v7775_v10 = vadd.f32 %v2002_v44, %v1944_v61  ;;  %v5433_v61 = vld [vmem:[#allocation3 + $0x84] sm:$0xf0] }
 0x232   : > { %2041 = vmatmul.bf16.gmra.mxu0 %v5292_v7  ;;  %v5436_v7 = vor.u32 %v6314_v52, %v5433_v61  ;;  %v5455_v52 = vld [vmem:[#allocation3 + $0xa8] sm:$0xf] }
 0x237   : > { %v2004_v1 = vpop.f32.mrf.mxu0 }
 0x238   : > { %v7779_v26 = vadd.f32 %v2004_v1, %v1946_v24  ;;  %v6317_v24 = vld [vmem:[#allocation3 + $0x94] sm:$0xf]  ;;  %v5444_v1 = vor.u32 %v6318_v48, %v5443_v53  ;;  %v6324_v53 = vld [vmem:[#allocation3 + $0xc8] sm:$0xf0]  ;;  %v6323_v48 = vld [vmem:[#allocation3 + $0xc4] sm:$0xf] }
 0x239   : > { %v5448_v30 = vor.u32 %v6317_v24, %v5445_v8  ;;  %v5468_v24 = vor.u32 %v6324_v53, %v5467_v34  ;;  %v1554_v53 = vadd.f32 %v7615_v58, %v7709_v54 }
 0x23b   : > { %2581 = vmatmul.bf16.gmra.mxu3 %v5436_v7  ;;  %v5457_v7 = vld [vmem:[#allocation3 + $0xb4] sm:$0xf0] }
 0x23c   : > { %2522 = vmatmul.bf16.gmra.mxu2 %v5432_v5  ;;  %v6321_v5 = vld [vmem:[#allocation3 + $0xb0] sm:$0xf0]  ;;  %v5460_v14 = vor.u32 %v6320_v21, %v5457_v7 }
 0x23d   : > { %v5456_v61 = vor.u32 %v6321_v5, %v5455_v52  ;;  %v6327_v52 = vld [vmem:[#allocation3 + $0xe0] sm:$0xf0]  ;;  %v5481_v5 = vld [vmem:[#allocation3 + $0xe4] sm:$0xf0] }
 0x23f   : > { %v2007_v40 = vpop.f32.mrf.mxu0 }
 0x240   : > { %v7782_v60 = vadd.f32 %v2007_v40, %v1949_v47 }
 0x242   : > { %2625 = vmatmul.bf16.vlgmr.msrb.gmra.mxu0 %v5404_v9 }
 0x247   : > { %v2009_v36 = vpop.f32.mrf.mxu0 }
 0x248   : > { %v7785_v44 = vadd.f32 %v2009_v36, %v1951_v55  ;;  %v1598_v55 = vadd.f32 %v7660_v2, %v1539_v38  ;;  %v5479_v38 = vld [vmem:[#allocation3 + $0xd8] sm:$0xf] }
 0x24a   : > { %v1961_v36 = vadd.f32 %v7711_v12, %v1598_v55  ;;  %v1603_v12 = vadd.f32 %v7678_v35, %v7686_v59  ;;  %v6326_v35 = vld [vmem:[#allocation3 + $0xdc] sm:$0xf]  ;;  %v5480_v59 = vor.u32 %v6327_v52, %v5479_v38  ;;  %v5463_v55 = vld [vmem:[#allocation3 + $0xb0] sm:$0xf] }
 0x24b   : > { %2586 = vmatmul.bf16.gmra.mxu3 %v5448_v30 }
 0x24c   : > { %2527 = vmatmul.bf16.gmra.mxu2 %v5444_v1  ;;  %v5469_v1 = vld [vmem:[#allocation3 + $0xcc] sm:$0xf0]  ;;  %v1966_v8 = vadd.f32 %v7722_v3, %v1603_v12  ;;  %v5484_v3 = vor.u32 %v6326_v35, %v5481_v5  ;;  %v6329_v12 = vld [vmem:[#allocation3 + $0xf4] sm:$0xf] }
 0x24d   : > { %v5472_v2 = vor.u32 %v6323_v48, %v5469_v1  ;;  %v7834_v48 = vpop.f32.mrf.mxu3  ;;  %v5491_v1 = vld [vmem:[#allocation3 + $0xf0] sm:$0xf] }
 0x24f   : > { %v2012_v11 = vpop.f32.mrf.mxu0 }
 0x250   : > { %v7790_v43 = vadd.f32 %v2012_v11, %v7695_v15  ;;  %v5428_v15 = vor.u32 %v6313_v50, %v5427_v29 }
 0x252   : > { %2630 = vmatmul.bf16.gmra.mxu0 %v5416_v56 }
 0x257   : > { %v2014_v47 = vpop.f32.mrf.mxu0 }
 0x258   : > { %v7794_v9 = vadd.f32 %v2014_v47, %v1956_v18  ;;  %v5451_v18 = vld [vmem:[#allocation3 + $0x98] sm:$0xf]  ;;  %v1548_v47 = vpop.f32.mrf.mxu1 }
 0x25b   : > { %2591 = vmatmul.bf16.gmra.mxu3 %v5460_v14 }
 0x25c   : > { %2532 = vmatmul.bf16.gmra.mxu2 %v5456_v61 }
 0x25f   : > { %v2017_v40 = vpop.f32.mrf.mxu0 }
 0x260   : > { %v7799_v31 = vadd.f32 %v2017_v40, %v7707_v25  ;;  %v5440_v25 = vor.u32 %v6316_v20, %v5439_v23 }
 0x262   : > { %2635 = vmatmul.bf16.gmra.mxu0 %v5428_v15  ;;  %v1549_v15 = vadd.f32 %v1548_v47, %v7697_v16  ;;  %v7821_v16 = vld [vmem:[#allocation2 + $0x18] sm:$0xf] }
 0x263   : > { %813 = vst [vmem:[#allocation3 + $0x10c] sm:$0xf] %v7821_v16 }
 0x264   : > { %v1608_v21 = vadd.f32 %v7688_v39, %v1549_v15  ;;  %v835_v39 = vshll.u32 %v7821_v16, 16 }
 0x266   : > { %v1971_v61 = vadd.f32 %v7732_v22, %v1608_v21  ;;  %v7828_v22 = vpop.f32.mrf.mxu2 }
 0x267   : > { %v2019_v51 = vpop.f32.mrf.mxu0 }
 0x268   : > { %v7803_v0 = vadd.f32 %v2019_v51, %v1961_v36  ;;  %v6322_v36 = vld [vmem:[#allocation3 + $0xb8] sm:$0xf0] }
 0x269   : > { %v5464_v20 = vor.u32 %v6322_v36, %v5463_v55  ;;  %v6325_v55 = vld [vmem:[#allocation3 + $0xd0] sm:$0xf0] }
 0x26b   : > { %2596 = vmatmul.bf16.gmra.mxu3 %v5472_v2  ;;  %v6330_v2 = vld [vmem:[#allocation3 + $0xf8] sm:$0xf0] }
 0x26c   : > { %2537 = vmatmul.bf16.gmra.mxu2 %v5468_v24 }
 0x26f   : > { %v2022_v56 = vpop.f32.mrf.mxu0 }
 0x270   : > { %v7806_v11 = vadd.f32 %v2022_v56, %v7717_v41  ;;  %v6319_v41 = vld [vmem:[#allocation3 + $0xa0] sm:$0xf0] }
 0x271   : > { %v5452_v29 = vor.u32 %v6319_v41, %v5451_v18  ;;  %v809_v41 = vld [vmem:[#allocation2 + $0x1c] sm:$0xf] }
 0x272   : > { %2640 = vmatmul.bf16.gmra.mxu0 %v5440_v25  ;;  %v855_v25 = vld [vmem:[#allocation3 + $0x108] sm:$0xf]  ;;  %v840_v47 = vshrl.u32 %v809_v41, 16  ;;  %814 = vst [vmem:[#allocation3 + $0x118] sm:$0xf] %v809_v41  ;;  %v843_v58 = vshll.u32 %v809_v41, 16 }
 0x274   : > { %v842_v54 = vrot.slane %v840_v47, 7 }
 0x276   : > { %v845_v35 = vor.u32 %v843_v58, %v842_v54 }
 0x277   : > { %v2024_v30 = vpop.f32.mrf.mxu0 }
 0x278   : > { %v7811_v45 = vadd.f32 %v2024_v30, %v1966_v8  ;;  %v5492_v8 = vor.u32 %v6330_v2, %v5491_v1  ;;  %v5493_v30 = vld [vmem:[#allocation3 + $0xfc] sm:$0xf0]  ;;  %v6332_v2 = vld [vmem:[#allocation3 + $0x10c] sm:$0xf] }
 0x279   : > { %v5496_v18 = vor.u32 %v6329_v12, %v5493_v30  ;;  %v5505_v12 = vld [vmem:[#allocation3 + $0x114] sm:$0xf0] }
 0x27b   : > { %2601 = vmatmul.bf16.gmra.mxu3 %v5484_v3 }
 0x27c   : > { %2542 = vmatmul.bf16.gmra.mxu2 %v5480_v59 }
 0x27f   : > { %v2027_v50 = vpop.f32.mrf.mxu0 }
 0x280   : > { %v7815_v40 = vadd.f32 %v2027_v50, %v7728_v28  ;;  %v832_v28 = vshrl.u32 %v7821_v16, 16  ;;  %v7841_v50 = vpop.f32.mrf.mxu1 }
 0x282   : > { %2645 = vmatmul.bf16.gmra.mxu0 %v5452_v29  ;;  %v834_v51 = vrot.slane %v832_v28, 7  ;;  %v1613_v29 = vadd.f32 %v7702_v63, %v1554_v53 }
 0x284   : > { %v837_v23 = vor.u32 %v835_v39, %v834_v51  ;;  %v838_v15 = vrot.slane %v834_v51, 4 }
 0x286   : > { %v856_v34 = vsel %vm7292_vm2, %v837_v23, %v855_v25  ;;  %v846_v3 = vsel %vm7315_vm5, %v838_v15, %v845_v35 }
 0x287   : > { %v2029_v7 = vpop.f32.mrf.mxu0  ;;  %857 = vst [vmem:[#allocation3 + $0x108] sm:$0xf] %v856_v34 }
 0x288   : > { %v7819_v14 = vadd.f32 %v2029_v7, %v1971_v61  ;;  %858 = vst [vmem:[#allocation3 + $0x114] sm:$0xf] %v846_v3  ;;  %v872_v61 = vrot.slane %v843_v58, 5  ;;  %v5475_v7 = vld [vmem:[#allocation3 + $0xc8] sm:$0xf]  ;;  %v2058_v34 = vpop.f32.mrf.mxu1  ;;  %v869_v58 = vrot.slane %v835_v39, 5 }
 0x289   : > { %v5476_v51 = vor.u32 %v6325_v55, %v5475_v7  ;;  %v6328_v39 = vld [vmem:[#allocation3 + $0xe8] sm:$0xf0]  ;;  %v8372_v55 = vld [vmem:[#allocation28_spill] sm:$0xff] }
 0x28b   : > { %2606 = vmatmul.bf16.gmra.mxu3 %v5496_v18  ;;  %v5508_v18 = vor.u32 %v6332_v2, %v5505_v12 }
 0x28c   : > { %2547 = vmatmul.bf16.gmra.mxu2 %v5492_v8 }
 0x28d   : > { %v2567_v5 = vpop.f32.mrf.mxu3 }
 0x28e   : > { %v924_v63 = vld [vmem:[#allocation3 + $0x108] sm:$0x1] }
 0x28f   : > { %v2032_v56 = vpop.f32.mrf.mxu0  ;;  %v7843_v52 = vpop.f32.mrf.mxu2  ;;  %v925_v21 = vsel %vm7478_vm11, 0, %v924_v63  ;;  %v6333_v30 = vld [vmem:[#allocation3 + $0x110] sm:$0xf0] }
 0x290   : > { %v7837_v24 = vadd.f32 %v2032_v56, %v7740_v19  ;;  %v1976_v19 = vadd.f32 %v7744_v57, %v1613_v29  ;;  %v874_v57 = vrot.slane %v840_v47, 4  ;;  %926 = vst [vmem:[#allocation3 + $0x108] sm:$0x1] %v925_v21  ;;  %v886_v56 = vld [vmem:[#allocation3 + $0x11c] sm:$0xf]  ;;  %v868_v29 = vrot.slane %v832_v28, 4  ;;  %v2061_v16 = vpop.f32.mrf.mxu1 }
 0x291   : > { %v5487_v28 = vld [vmem:[#allocation3 + $0xe0] sm:$0xf] }
 0x292   : > { %2650 = vmatmul.bf16.gmra.mxu0 %v5464_v20  ;;  %v875_v36 = vor.u32 %v874_v57, %v872_v61  ;;  %v5488_v57 = vor.u32 %v6328_v39, %v5487_v28 }
 0x294   : > { %v876_v23 = vrot.slane %v875_v36, 4 }
 0x295   : > { %v2569_v1 = vpop.f32.mrf.mxu3 }
 0x296   : > { %v887_v8 = vsel %vm7393_vm9, %v876_v23, %v886_v56 }
 0x297   : > { %v2034_v38 = vpop.f32.mrf.mxu0  ;;  %v2510_v25 = vpop.f32.mrf.mxu2  ;;  %888 = vst [vmem:[#allocation3 + $0x11c] sm:$0xf] %v887_v8  ;;  %v5503_v41 = vld [vmem:[#allocation3 + $0x108] sm:$0xf]  ;;  %v5499_v8 = vld [vmem:[#allocation3 + $0xf8] sm:$0xf] }
 0x298   : > { %v7845_v59 = vadd.f32 %v2034_v38, %v1976_v19  ;;  %v5504_v47 = vor.u32 %v6333_v30, %v5503_v41  ;;  %v6331_v30 = vld [vmem:[#allocation3 + $0x100] sm:$0xf0] }
 0x29b   : > { %2611 = vmatmul.bf16.gmra.mxu3 %v5508_v18 }
 0x29c   : > { %2552 = vmatmul.bf16.gmra.mxu2 %v5504_v47  ;;  %v5500_v47 = vor.u32 %v6331_v30, %v5499_v8  ;;  %v2960_v8 = vld [vmem:[#allocation4] sm:$0xf] }
 0x29e   : > { %v2572_v35 = vpop.f32.mrf.mxu3  ;;  %v963_v3 = vld [vmem:[#allocation3 + $0x11c] sm:$0x8] }
 0x29f   : > { %v2037_v20 = vpop.f32.mrf.mxu0  ;;  %v2513_v38 = vpop.f32.mrf.mxu2  ;;  %v964_v21 = vsel %vm7533_vm14, 0, %v963_v3 }
 0x2a0   : > { %v7852_v53 = vadd.f32 %v2037_v20, %v7752_v46  ;;  %v870_v46 = vor.u32 %v869_v58, %v868_v29  ;;  %965 = vst [vmem:[#allocation3 + $0x11c] sm:$0x8] %v964_v21  ;;  %v7875_v20 = vpop.f32.mrf.mxu1  ;;  %v2059_v21 = vadd.f32 %v2058_v34, %v7771_v42 }
 0x2a2   : > { %2655 = vmatmul.bf16.gmra.mxu0 %v5476_v51  ;;  %v871_v19 = vrot.slane %v870_v46, 4 }
 0x2a4   : > { %v873_v63 = vsel %vm7384_vm8, %v871_v19, %v872_v61 }
 0x2a5   : > { %885 = vst [vmem:[#allocation3 + $0x110] sm:$0xf] %v873_v63 }
 0x2a6   : > { %v7872_v61 = vpop.f32.mrf.mxu3 }
 0x2a7   : > { %v2039_v54 = vpop.f32.mrf.mxu0  ;;  %v7870_v51 = vpop.f32.mrf.mxu2 }
 0x2a8   : > { %v7859_v15 = vadd.f32 %v2039_v54, %v7757_v4  ;;  %v1564_v4 = vadd.f32 %v8372_v55, %v7730_v6  ;;  %v2568_v6 = vadd.f32 %v2567_v5, %v7843_v52  ;;  %v7885_v41 = vpop.f32.mrf.mxu1  ;;  %v2570_v5 = vadd.f32 %v2569_v1, %v2510_v25 }
 0x2a9   : > { %v2573_v55 = vadd.f32 %v2572_v35, %v2513_v38 }
 0x2aa   : > { %v1623_v23 = vadd.f32 %v7828_v22, %v1564_v4  ;;  %v2057_v22 = vadd.f32 %v7841_v50, %v7767_v27 }
 0x2ac   : > { %v1986_v56 = vadd.f32 %v7834_v48, %v1623_v23  ;;  %v7892_v48 = vld [vmem:[%s8373_s6] ss:$0 sm:$0xff]  ;;  %v5511_v4 = vld [vmem:[#allocation3 + $0x110] sm:$0xf]  ;;  %v6334_v23 = vld [vmem:[#allocation3 + $0x118] sm:$0xf0] }
 0x2ad   : > { %v5512_v42 = vor.u32 %v6334_v23, %v5511_v4 }
 0x2ae   : > { %v7883_v18 = vpop.f32.mrf.mxu3 }
 0x2af   : > { %v2042_v7 = vpop.f32.mrf.mxu0 }
 0x2b0   : > { %v7868_v36 = vadd.f32 %v2042_v7, %v7763_v17  ;;  %v7881_v17 = vpop.f32.mrf.mxu2  ;;  %v7900_v27 = vpop.f32.mrf.mxu1 }
 0x2b2   : > { %2660 = vmatmul.bf16.gmra.mxu0 %v5488_v57 }
 0x2b6   : > { %v7897_v3 = vpop.f32.mrf.mxu3 }
 0x2b7   : > { %v2044_v2 = vpop.f32.mrf.mxu0 }
 0x2b8   : > { %v7878_v12 = vadd.f32 %v2044_v2, %v1986_v56  ;;  %v7895_v19 = vpop.f32.mrf.mxu2 }
 0x2bf   : > { %v2626_v29 = vpop.f32.mrf.mxu0 }
 0x2c0   : > { %v2627_v58 = vadd.f32 %v2626_v29, %v2568_v6  ;;  %v2062_v29 = vadd.f32 %v2061_v16, %v7775_v10  ;;  %v7906_v35 = vpop.f32.mrf.mxu2 }
 0x2c2   : > { %v2676_v46 = vadd.f32 %v2627_v58, %v2057_v22  ;;  %2665 = vmatmul.bf16.gmra.mxu0 %v5500_v47 }
 0x2c4   : > { %v2700_v52 = vadd.f32 %v7892_v48, %v2676_v46  ;;  %v7908_v46 = vpop.f32.mrf.mxu3 }
 0x2c6   : > { %v2720_v54 = vmax.f32 %v2700_v52, 0.0  ;;  %v7910_v52 = vpop.f32.mrf.mxu1 }
 0x2c7   : > { %v2628_v63 = vpop.f32.mrf.mxu0 }
 0x2c8   : > { %v2740_v50 = vpack.c.bf16 %v2720_v54, %v2720_v54  ;;  %v2629_v28 = vadd.f32 %v2628_v63, %v2570_v5 }
 0x2ca   : > { %2760 = vst [vmem:[#allocation4 + $0x4] sm:$0xf] %v2740_v50  ;;  %v2781_v39 = vshrl.u32 %v2740_v50, 16  ;;  %v2784_v57 = vshll.u32 %v2740_v50, 16  ;;  %v2677_v7 = vadd.f32 %v2629_v28, %v2059_v21 }
 0x2cc   : > { %v2783_v25 = vrot.slane %v2781_v39, 7  ;;  %v3000_v1 = vrot.slane %v2781_v39, 4  ;;  %v3001_v56 = vrot.slane %v2784_v57, 5  ;;  %v2701_v2 = vadd.f32 %v7892_v48, %v2677_v7 }
 0x2ce   : > { %v2786_v30 = vor.u32 %v2784_v57, %v2783_v25  ;;  %v2721_v6 = vmax.f32 %v2701_v2, 0.0  ;;  %v3002_v34 = vor.u32 %v3001_v56, %v3000_v1  ;;  %v2787_v39 = vrot.slane %v2783_v25, 4  ;;  %v3111_v56 = vld [vmem:[#allocation4 + $0x14] sm:$0xf] }
 0x2cf   : > { %v2631_v47 = vpop.f32.mrf.mxu0  ;;  %v2575_v57 = vadd.f32 %v7872_v61, %v7870_v51  ;;  %v2064_v1 = vadd.f32 %v7875_v20, %v7779_v26 }
 0x2d0   : > { %v2961_v22 = vsel %vm7292_vm2, %v2786_v30, %v2960_v8  ;;  %v2741_v58 = vpack.c.bf16 %v2721_v6, %v2721_v6  ;;  %v2632_v38 = vadd.f32 %v2631_v47, %v2573_v55  ;;  %v3003_v21 = vrot.slane %v3002_v34, 4  ;;  %v7925_v47 = vpop.f32.mrf.mxu2 }
 0x2d1   : > { %2962 = vst [vmem:[#allocation4] sm:$0xf] %v2961_v22  ;;  %v2578_v22 = vadd.f32 %v7883_v18, %v7881_v17 }
 0x2d2   : > { %2761 = vst [vmem:[#allocation4 + $0x10] sm:$0xf] %v2741_v58  ;;  %v2789_v5 = vshrl.u32 %v2741_v58, 16  ;;  %v2792_v54 = vshll.u32 %v2741_v58, 16  ;;  %v2678_v63 = vadd.f32 %v2632_v38, %v2062_v29  ;;  %2670 = vmatmul.bf16.gmra.mxu0 %v5512_v42  ;;  %v7927_v29 = vpop.f32.mrf.mxu3  ;;  %v7931_v58 = vpop.f32.mrf.mxu1 }
 0x2d4   : > { %v2791_v50 = vrot.slane %v2789_v5, 7  ;;  %v3004_v10 = vrot.slane %v2792_v54, 5  ;;  %v3006_v16 = vrot.slane %v2789_v5, 4  ;;  %v2702_v28 = vadd.f32 %v7892_v48, %v2678_v63 }
 0x2d6   : > { %v2794_v7 = vor.u32 %v2792_v54, %v2791_v50  ;;  %v3005_v55 = vsel %vm7384_vm8, %v3003_v21, %v3004_v10  ;;  %v3007_v4 = vor.u32 %v3006_v16, %v3004_v10  ;;  %v2722_v23 = vmax.f32 %v2702_v28, 0.0  ;;  %v2964_v21 = vld [vmem:[#allocation4 + $0x18] sm:$0xf] }
 0x2d7   : > { %3110 = vst [vmem:[#allocation4 + $0x8] sm:$0xf] %v3005_v55  ;;  %v2633_v2 = vpop.f32.mrf.mxu0 }
 0x2d8   : > { %v3150_v8 = vld [vmem:[#allocation4] sm:$0x1]  ;;  %v2795_v30 = vsel %vm7315_vm5, %v2787_v39, %v2794_v7  ;;  %v3008_v25 = vrot.slane %v3007_v4, 4  ;;  %v2742_v6 = vpack.c.bf16 %v2722_v23, %v2722_v23  ;;  %v2634_v42 = vadd.f32 %v2633_v2, %v2575_v57 }
 0x2d9   : > { %v3151_v51 = vsel %vm7478_vm11, 0, %v3150_v8  ;;  %2963 = vst [vmem:[#allocation4 + $0xc] sm:$0xf] %v2795_v30  ;;  %v2067_v39 = vadd.f32 %v7885_v41, %v7782_v60  ;;  %v7941_v41 = vpop.f32.mrf.mxu2 }
 0x2da   : > { %3152 = vst [vmem:[#allocation4] sm:$0x1] %v3151_v51  ;;  %v3112_v61 = vsel %vm7393_vm9, %v3008_v25, %v3111_v56  ;;  %v2797_v34 = vshrl.u32 %v2742_v6, 16  ;;  %v2800_v26 = vshll.u32 %v2742_v6, 16  ;;  %v2679_v20 = vadd.f32 %v2634_v42, %v2064_v1  ;;  %v7943_v25 = vpop.f32.mrf.mxu3  ;;  %v7947_v51 = vpop.f32.mrf.mxu1 }
 0x2db   : > { %3113 = vst [vmem:[#allocation4 + $0x14] sm:$0xf] %v3112_v61  ;;  %v2580_v42 = vadd.f32 %v7897_v3, %v7895_v19 }
 0x2dc   : > { %2762 = vst [vmem:[#allocation4 + $0x1c] sm:$0xf] %v2742_v6  ;;  %v2799_v38 = vrot.slane %v2797_v34, 7  ;;  %v3009_v5 = vrot.slane %v2797_v34, 4  ;;  %v3010_v54 = vrot.slane %v2800_v26, 5  ;;  %v2703_v63 = vadd.f32 %v7892_v48, %v2679_v20 }
 0x2de   : > { %v2802_v50 = vor.u32 %v2800_v26, %v2799_v38  ;;  %v2723_v10 = vmax.f32 %v2703_v63, 0.0  ;;  %v3011_v16 = vor.u32 %v3010_v54, %v3009_v5  ;;  %v2803_v6 = vrot.slane %v2799_v38, 4  ;;  %v3115_v5 = vld [vmem:[#allocation4 + $0x2c] sm:$0xf] }
 0x2df   : > { %v2636_v28 = vpop.f32.mrf.mxu0 }
 0x2e0   : > { %v2965_v57 = vsel %vm7292_vm2, %v2802_v50, %v2964_v21  ;;  %v2743_v17 = vpack.c.bf16 %v2723_v10, %v2723_v10  ;;  %v2637_v18 = vadd.f32 %v2636_v28, %v2578_v22  ;;  %v3012_v56 = vrot.slane %v3011_v16, 4 }
 0x2e1   : > { %2966 = vst [vmem:[#allocation4 + $0x18] sm:$0xf] %v2965_v57  ;;  %v2069_v22 = vadd.f32 %v7900_v27, %v7785_v44  ;;  %v2583_v28 = vadd.f32 %v7908_v46, %v7906_v35 }
 0x2e2   : > { %v3180_v7 = vld [vmem:[#allocation4 + $0x14] sm:$0x8]  ;;  %2763 = vst [vmem:[#allocation4 + $0x28] sm:$0xf] %v2743_v17  ;;  %v2805_v55 = vshrl.u32 %v2743_v17, 16  ;;  %v2808_v4 = vshll.u32 %v2743_v17, 16  ;;  %v2680_v23 = vadd.f32 %v2637_v18, %v2067_v39 }
 0x2e3   : > { %v3181_v1 = vsel %vm7533_vm14, 0, %v3180_v7  ;;  %v2968_v7 = vld [vmem:[#allocation4 + $0x30] sm:$0xf] }
 0x2e4   : > { %3182 = vst [vmem:[#allocation4 + $0x14] sm:$0x8] %v3181_v1  ;;  %v2807_v2 = vrot.slane %v2805_v55, 7  ;;  %v3013_v8 = vrot.slane %v2808_v4, 5  ;;  %v3015_v30 = vrot.slane %v2805_v55, 4  ;;  %v2704_v60 = vadd.f32 %v7892_v48, %v2680_v23  ;;  %v7962_v23 = vpop.f32.mrf.mxu2  ;;  %v7964_v1 = vpop.f32.mrf.mxu3 }
 0x2e6   : > { %v2810_v61 = vor.u32 %v2808_v4, %v2807_v2  ;;  %v3014_v34 = vsel %vm7384_vm8, %v3012_v56, %v3013_v8  ;;  %v3016_v26 = vor.u32 %v3015_v30, %v3013_v8  ;;  %v2724_v20 = vmax.f32 %v2704_v60, 0.0  ;;  %v7968_v30 = vpop.f32.mrf.mxu1 }
 0x2e7   : > { %3114 = vst [vmem:[#allocation4 + $0x20] sm:$0xf] %v3014_v34  ;;  %v2638_v54 = vpop.f32.mrf.mxu0  ;;  %v2072_v8 = vadd.f32 %v7910_v52, %v7790_v43 }
 0x2e8   : > { %v3153_v63 = vld [vmem:[#allocation4 + $0x18] sm:$0x1]  ;;  %v2811_v38 = vsel %vm7315_vm5, %v2803_v6, %v2810_v61  ;;  %v3017_v21 = vrot.slane %v3016_v26, 4  ;;  %v2744_v19 = vpack.c.bf16 %v2724_v20, %v2724_v20  ;;  %v2639_v3 = vadd.f32 %v2638_v54, %v2580_v42 }
 0x2e9   : > { %v3154_v50 = vsel %vm7478_vm11, 0, %v3153_v63  ;;  %2967 = vst [vmem:[#allocation4 + $0x24] sm:$0xf] %v2811_v38  ;;  %v2585_v63 = vadd.f32 %v7927_v29, %v7925_v47 }
 0x2ea   : > { %3155 = vst [vmem:[#allocation4 + $0x18] sm:$0x1] %v3154_v50  ;;  %v3116_v10 = vsel %vm7393_vm9, %v3017_v21, %v3115_v5  ;;  %v2813_v16 = vshrl.u32 %v2744_v19, 16  ;;  %v2816_v44 = vshll.u32 %v2744_v19, 16  ;;  %v2681_v27 = vadd.f32 %v2639_v3, %v2069_v22 }
 0x2eb   : > { %3117 = vst [vmem:[#allocation4 + $0x2c] sm:$0xf] %v3116_v10  ;;  %v2074_v50 = vadd.f32 %v7931_v58, %v7794_v9  ;;  %v3119_v10 = vld [vmem:[#allocation4 + $0x44] sm:$0xf] }
 0x2ec   : > { %2764 = vst [vmem:[#allocation4 + $0x34] sm:$0xf] %v2744_v19  ;;  %v2815_v39 = vrot.slane %v2813_v16, 7  ;;  %v3018_v57 = vrot.slane %v2813_v16, 4  ;;  %v3019_v17 = vrot.slane %v2816_v44, 5  ;;  %v2705_v18 = vadd.f32 %v7892_v48, %v2681_v27  ;;  %v7983_v47 = vpop.f32.mrf.mxu2  ;;  %v7985_v29 = vpop.f32.mrf.mxu3 }
 0x2ee   : > { %v2818_v55 = vor.u32 %v2816_v44, %v2815_v39  ;;  %v2725_v4 = vmax.f32 %v2705_v18, 0.0  ;;  %v3020_v56 = vor.u32 %v3019_v17, %v3018_v57  ;;  %v2819_v54 = vrot.slane %v2815_v39, 4  ;;  %v7989_v18 = vpop.f32.mrf.mxu1 }
 0x2ef   : > { %v2641_v2 = vpop.f32.mrf.mxu0 }
 0x2f0   : > { %v2969_v35 = vsel %vm7292_vm2, %v2818_v55, %v2968_v7  ;;  %v2745_v46 = vpack.c.bf16 %v2725_v4, %v2725_v4  ;;  %v2642_v60 = vadd.f32 %v2641_v2, %v2583_v28  ;;  %v3021_v20 = vrot.slane %v3020_v56, 4 }
 0x2f1   : > { %2970 = vst [vmem:[#allocation4 + $0x30] sm:$0xf] %v2969_v35  ;;  %v2588_v4 = vadd.f32 %v7943_v25, %v7941_v41 }
 0x2f2   : > { %v3183_v6 = vld [vmem:[#allocation4 + $0x2c] sm:$0x8]  ;;  %2765 = vst [vmem:[#allocation4 + $0x40] sm:$0xf] %v2745_v46  ;;  %v2821_v42 = vshrl.u32 %v2745_v46, 16  ;;  %v2824_v61 = vshll.u32 %v2745_v46, 16  ;;  %v2682_v34 = vadd.f32 %v2642_v60, %v2072_v8 }
 0x2f3   : > { %v3184_v26 = vsel %vm7533_vm14, 0, %v3183_v6  ;;  %v2972_v46 = vld [vmem:[#allocation4 + $0x48] sm:$0xf] }
 0x2f4   : > { %3185 = vst [vmem:[#allocation4 + $0x2c] sm:$0x8] %v3184_v26  ;;  %v2823_v22 = vrot.slane %v2821_v42, 7  ;;  %v3022_v43 = vrot.slane %v2824_v61, 5  ;;  %v3024_v52 = vrot.slane %v2821_v42, 4  ;;  %v2706_v5 = vadd.f32 %v7892_v48, %v2682_v34 }
 0x2f5   : > { %v2077_v34 = vadd.f32 %v7947_v51, %v7799_v31 }
 0x2f6   : > { %v2826_v38 = vor.u32 %v2824_v61, %v2823_v22  ;;  %v3023_v21 = vsel %vm7384_vm8, %v3021_v20, %v3022_v43  ;;  %v3025_v19 = vor.u32 %v3024_v52, %v3022_v43  ;;  %v2726_v3 = vmax.f32 %v2706_v5, 0.0  ;;  %v8000_v5 = vpop.f32.mrf.mxu2  ;;  %v8006_v31 = vpop.f32.mrf.mxu1 }
 0x2f7   : > { %3118 = vst [vmem:[#allocation4 + $0x38] sm:$0xf] %v3023_v21  ;;  %v2643_v16 = vpop.f32.mrf.mxu0 }
 0x2f8   : > { %v3156_v44 = vld [vmem:[#allocation4 + $0x30] sm:$0x1]  ;;  %v2827_v27 = vsel %vm7315_vm5, %v2819_v54, %v2826_v38  ;;  %v3026_v28 = vrot.slane %v3025_v19, 4  ;;  %v2746_v39 = vpack.c.bf16 %v2726_v3, %v2726_v3  ;;  %v2644_v57 = vadd.f32 %v2643_v16, %v2585_v63  ;;  %v8002_v54 = vpop.f32.mrf.mxu3 }
 0x2f9   : > { %v3157_v17 = vsel %vm7478_vm11, 0, %v3156_v44  ;;  %2971 = vst [vmem:[#allocation4 + $0x3c] sm:$0xf] %v2827_v27 }
 0x2fa   : > { %3158 = vst [vmem:[#allocation4 + $0x30] sm:$0x1] %v3157_v17  ;;  %v3120_v9 = vsel %vm7393_vm9, %v3026_v28, %v3119_v10  ;;  %v2829_v58 = vshrl.u32 %v2746_v39, 16  ;;  %v2832_v7 = vshll.u32 %v2746_v39, 16  ;;  %v2683_v55 = vadd.f32 %v2644_v57, %v2074_v50  ;;  %v3123_v57 = vld [vmem:[#allocation4 + $0x5c] sm:$0xf] }
 0x2fb   : > { %3121 = vst [vmem:[#allocation4 + $0x44] sm:$0xf] %v3120_v9  ;;  %v2590_v10 = vadd.f32 %v7964_v1, %v7962_v23 }
 0x2fc   : > { %2766 = vst [vmem:[#allocation4 + $0x4c] sm:$0xf] %v2746_v39  ;;  %v2831_v56 = vrot.slane %v2829_v58, 7  ;;  %v3027_v2 = vrot.slane %v2829_v58, 4  ;;  %v3028_v8 = vrot.slane %v2832_v7, 5  ;;  %v2707_v35 = vadd.f32 %v7892_v48, %v2683_v55 }
 0x2fd   : > { %v2079_v39 = vadd.f32 %v7968_v30, %v7803_v0 }
 0x2fe   : > { %v2834_v60 = vor.u32 %v2832_v7, %v2831_v56  ;;  %v2727_v6 = vmax.f32 %v2707_v35, 0.0  ;;  %v3029_v42 = vor.u32 %v3028_v8, %v3027_v2  ;;  %v2835_v50 = vrot.slane %v2831_v56, 4 }
 0x2ff   : > { %v2646_v61 = vpop.f32.mrf.mxu0  ;;  %v2593_v2 = vadd.f32 %v7985_v29, %v7983_v47 }
 0x300   : > { %v2973_v26 = vsel %vm7292_vm2, %v2834_v60, %v2972_v46  ;;  %v2747_v20 = vpack.c.bf16 %v2727_v6, %v2727_v6  ;;  %v2647_v22 = vadd.f32 %v2646_v61, %v2588_v4  ;;  %v3030_v38 = vrot.slane %v3029_v42, 4  ;;  %v2538_v6 = vpop.f32.mrf.mxu2  ;;  %v2597_v42 = vpop.f32.mrf.mxu3  ;;  %v2976_v61 = vld [vmem:[#allocation4 + $0x60] sm:$0xf] }
 0x301   : > { %2974 = vst [vmem:[#allocation4 + $0x48] sm:$0xf] %v2973_v26 }
 0x302   : > { %v3186_v41 = vld [vmem:[#allocation4 + $0x44] sm:$0x8]  ;;  %2767 = vst [vmem:[#allocation4 + $0x58] sm:$0xf] %v2747_v20  ;;  %v2837_v25 = vshrl.u32 %v2747_v20, 16  ;;  %v2840_v43 = vshll.u32 %v2747_v20, 16  ;;  %v2684_v52 = vadd.f32 %v2647_v22, %v2077_v34  ;;  %v2086_v34 = vpop.f32.mrf.mxu1 }
 0x303   : > { %v3187_v63 = vsel %vm7533_vm14, 0, %v3186_v41 }
 0x304   : > { %3188 = vst [vmem:[#allocation4 + $0x44] sm:$0x8] %v3187_v63  ;;  %v2839_v51 = vrot.slane %v2837_v25, 7  ;;  %v3031_v21 = vrot.slane %v2840_v43, 5  ;;  %v3033_v19 = vrot.slane %v2837_v25, 4  ;;  %v2708_v3 = vadd.f32 %v7892_v48, %v2684_v52 }
 0x305   : > { %v2082_v25 = vadd.f32 %v7989_v18, %v7806_v11 }
 0x306   : > { %v2842_v16 = vor.u32 %v2840_v43, %v2839_v51  ;;  %v3032_v44 = vsel %vm7384_vm8, %v3030_v38, %v3031_v21  ;;  %v3034_v27 = vor.u32 %v3033_v19, %v3031_v21  ;;  %v2728_v28 = vmax.f32 %v2708_v3, 0.0 }
 0x307   : > { %3122 = vst [vmem:[#allocation4 + $0x50] sm:$0xf] %v3032_v44  ;;  %v2648_v17 = vpop.f32.mrf.mxu0 }
 0x308   : > { %v3159_v9 = vld [vmem:[#allocation4 + $0x48] sm:$0x1]  ;;  %v2843_v58 = vsel %vm7315_vm5, %v2835_v50, %v2842_v16  ;;  %v3035_v7 = vrot.slane %v3034_v27, 4  ;;  %v2748_v55 = vpack.c.bf16 %v2728_v28, %v2728_v28  ;;  %v2649_v4 = vadd.f32 %v2648_v17, %v2590_v10  ;;  %v2599_v17 = vpop.f32.mrf.mxu3 }
 0x309   : > { %v3160_v23 = vsel %vm7478_vm11, 0, %v3159_v9  ;;  %2975 = vst [vmem:[#allocation4 + $0x54] sm:$0xf] %v2843_v58  ;;  %v2595_v16 = vadd.f32 %v8002_v54, %v8000_v5  ;;  %v2084_v9 = vadd.f32 %v8006_v31, %v7811_v45  ;;  %v3127_v58 = vld [vmem:[#allocation4 + $0x74] sm:$0xf] }
 0x30a   : > { %3161 = vst [vmem:[#allocation4 + $0x48] sm:$0x1] %v3160_v23  ;;  %v3124_v1 = vsel %vm7393_vm9, %v3035_v7, %v3123_v57  ;;  %v2845_v56 = vshrl.u32 %v2748_v55, 16  ;;  %v2848_v0 = vshll.u32 %v2748_v55, 16  ;;  %v2685_v30 = vadd.f32 %v2649_v4, %v2079_v39  ;;  %v2540_v57 = vpop.f32.mrf.mxu2 }
 0x30b   : > { %3125 = vst [vmem:[#allocation4 + $0x5c] sm:$0xf] %v3124_v1 }
 0x30c   : > { %2768 = vst [vmem:[#allocation4 + $0x64] sm:$0xf] %v2748_v55  ;;  %v2847_v8 = vrot.slane %v2845_v56, 7  ;;  %v3036_v35 = vrot.slane %v2845_v56, 4  ;;  %v3037_v46 = vrot.slane %v2848_v0, 5  ;;  %v2709_v60 = vadd.f32 %v7892_v48, %v2685_v30  ;;  %v2088_v55 = vpop.f32.mrf.mxu1 }
 0x30e   : > { %v2850_v26 = vor.u32 %v2848_v0, %v2847_v8  ;;  %v2729_v20 = vmax.f32 %v2709_v60, 0.0  ;;  %v3038_v22 = vor.u32 %v3037_v46, %v3036_v35  ;;  %v2851_v18 = vrot.slane %v2847_v8, 4 }
 0x30f   : > { %v2651_v41 = vpop.f32.mrf.mxu0 }
 0x310   : > { %v2977_v47 = vsel %vm7292_vm2, %v2850_v26, %v2976_v61  ;;  %v2749_v29 = vpack.c.bf16 %v2729_v20, %v2729_v20  ;;  %v2652_v43 = vadd.f32 %v2651_v41, %v2593_v2  ;;  %v3039_v19 = vrot.slane %v3038_v22, 4  ;;  %v2980_v61 = vld [vmem:[#allocation4 + $0x78] sm:$0xf] }
 0x311   : > { %2978 = vst [vmem:[#allocation4 + $0x60] sm:$0xf] %v2977_v47  ;;  %v2598_v2 = vadd.f32 %v2597_v42, %v2538_v6  ;;  %v2602_v6 = vpop.f32.mrf.mxu3 }
 0x312   : > { %v3189_v52 = vld [vmem:[#allocation4 + $0x5c] sm:$0x8]  ;;  %2769 = vst [vmem:[#allocation4 + $0x70] sm:$0xf] %v2749_v29  ;;  %v2853_v63 = vshrl.u32 %v2749_v29, 16  ;;  %v2856_v38 = vshll.u32 %v2749_v29, 16  ;;  %v2686_v51 = vadd.f32 %v2652_v43, %v2082_v25  ;;  %v2087_v25 = vadd.f32 %v2086_v34, %v7815_v40 }
 0x313   : > { %v3190_v21 = vsel %vm7533_vm14, 0, %v3189_v52  ;;  %v2543_v52 = vpop.f32.mrf.mxu2 }
 0x314   : > { %3191 = vst [vmem:[#allocation4 + $0x5c] sm:$0x8] %v3190_v21  ;;  %v2855_v3 = vrot.slane %v2853_v63, 7  ;;  %v3040_v50 = vrot.slane %v2856_v38, 5  ;;  %v3042_v10 = vrot.slane %v2853_v63, 4  ;;  %v2710_v11 = vadd.f32 %v7892_v48, %v2686_v51  ;;  %v2091_v42 = vpop.f32.mrf.mxu1 }
 0x316   : > { %v2858_v44 = vor.u32 %v2856_v38, %v2855_v3  ;;  %v3041_v27 = vsel %vm7384_vm8, %v3039_v19, %v3040_v50  ;;  %v3043_v28 = vor.u32 %v3042_v10, %v3040_v50  ;;  %v2730_v39 = vmax.f32 %v2710_v11, 0.0 }
 0x317   : > { %3126 = vst [vmem:[#allocation4 + $0x68] sm:$0xf] %v3041_v27  ;;  %v2653_v7 = vpop.f32.mrf.mxu0 }
 0x318   : > { %v3162_v4 = vld [vmem:[#allocation4 + $0x60] sm:$0x1]  ;;  %v2859_v23 = vsel %vm7315_vm5, %v2851_v18, %v2858_v44  ;;  %v3044_v5 = vrot.slane %v3043_v28, 4  ;;  %v2750_v54 = vpack.c.bf16 %v2730_v39, %v2730_v39  ;;  %v2654_v1 = vadd.f32 %v2653_v7, %v2595_v16 }
 0x319   : > { %v3163_v56 = vsel %vm7478_vm11, 0, %v3162_v4  ;;  %2979 = vst [vmem:[#allocation4 + $0x6c] sm:$0xf] %v2859_v23  ;;  %v2600_v18 = vadd.f32 %v2599_v17, %v2540_v57  ;;  %v2089_v39 = vadd.f32 %v2088_v55, %v7819_v14 }
 0x31a   : > { %3164 = vst [vmem:[#allocation4 + $0x60] sm:$0x1] %v3163_v56  ;;  %v3128_v0 = vsel %vm7393_vm9, %v3044_v5, %v3127_v58  ;;  %v2861_v45 = vshrl.u32 %v2750_v54, 16  ;;  %v2864_v31 = vshll.u32 %v2750_v54, 16  ;;  %v2687_v30 = vadd.f32 %v2654_v1, %v2084_v9  ;;  %v3131_v9 = vld [vmem:[#allocation4 + $0x8c] sm:$0xf] }
 0x31b   : > { %3129 = vst [vmem:[#allocation4 + $0x74] sm:$0xf] %v3128_v0  ;;  %v2545_v56 = vpop.f32.mrf.mxu2  ;;  %v2604_v0 = vpop.f32.mrf.mxu3 }
 0x31c   : > { %2770 = vst [vmem:[#allocation4 + $0x7c] sm:$0xf] %v2750_v54  ;;  %v2863_v8 = vrot.slane %v2861_v45, 7  ;;  %v3045_v35 = vrot.slane %v2861_v45, 4  ;;  %v3046_v46 = vrot.slane %v2864_v31, 5  ;;  %v2711_v60 = vadd.f32 %v7892_v48, %v2687_v30 }
 0x31d   : > { %v2603_v45 = vadd.f32 %v2602_v6, %v2543_v52 }
 0x31e   : > { %v2866_v26 = vor.u32 %v2864_v31, %v2863_v8  ;;  %v2731_v20 = vmax.f32 %v2711_v60, 0.0  ;;  %v3047_v22 = vor.u32 %v3046_v46, %v3045_v35  ;;  %v2867_v11 = vrot.slane %v2863_v8, 4  ;;  %v2093_v31 = vpop.f32.mrf.mxu1  ;;  %v2984_v46 = vld [vmem:[#allocation4 + $0x90] sm:$0xf] }
 0x31f   : > { %v2656_v41 = vpop.f32.mrf.mxu0 }
 0x320   : > { %v2981_v47 = vsel %vm7292_vm2, %v2866_v26, %v2980_v61  ;;  %v2751_v29 = vpack.c.bf16 %v2731_v20, %v2731_v20  ;;  %v2657_v43 = vadd.f32 %v2656_v41, %v2598_v2  ;;  %v3048_v3 = vrot.slane %v3047_v22, 4 }
 0x321   : > { %2982 = vst [vmem:[#allocation4 + $0x78] sm:$0xf] %v2981_v47  ;;  %v2092_v22 = vadd.f32 %v2091_v42, %v7837_v24 }
 0x322   : > { %v3192_v63 = vld [vmem:[#allocation4 + $0x74] sm:$0x8]  ;;  %2771 = vst [vmem:[#allocation4 + $0x88] sm:$0xf] %v2751_v29  ;;  %v2869_v38 = vshrl.u32 %v2751_v29, 16  ;;  %v2872_v51 = vshll.u32 %v2751_v29, 16  ;;  %v2688_v21 = vadd.f32 %v2657_v43, %v2087_v25 }
 0x323   : > { %v3193_v19 = vsel %vm7533_vm14, 0, %v3192_v63  ;;  %v2548_v42 = vpop.f32.mrf.mxu2 }
 0x324   : > { %3194 = vst [vmem:[#allocation4 + $0x74] sm:$0x8] %v3193_v19  ;;  %v2871_v40 = vrot.slane %v2869_v38, 7  ;;  %v3049_v34 = vrot.slane %v2872_v51, 5  ;;  %v3051_v50 = vrot.slane %v2869_v38, 4  ;;  %v2712_v10 = vadd.f32 %v7892_v48, %v2688_v21 }
 0x326   : > { %v2874_v16 = vor.u32 %v2872_v51, %v2871_v40  ;;  %v3050_v44 = vsel %vm7384_vm8, %v3048_v3, %v3049_v34  ;;  %v3052_v27 = vor.u32 %v3051_v50, %v3049_v34  ;;  %v2732_v28 = vmax.f32 %v2712_v10, 0.0  ;;  %v2607_v3 = vpop.f32.mrf.mxu3  ;;  %v2096_v50 = vpop.f32.mrf.mxu1 }
 0x327   : > { %3130 = vst [vmem:[#allocation4 + $0x80] sm:$0xf] %v3050_v44  ;;  %v2658_v58 = vpop.f32.mrf.mxu0  ;;  %v2605_v34 = vadd.f32 %v2604_v0, %v2545_v56  ;;  %v2094_v44 = vadd.f32 %v2093_v31, %v7845_v59  ;;  %v2988_v0 = vld [vmem:[#allocation4 + $0xa8] sm:$0xf] }
 0x328   : > { %v3165_v7 = vld [vmem:[#allocation4 + $0x78] sm:$0x1]  ;;  %v2875_v4 = vsel %vm7315_vm5, %v2867_v11, %v2874_v16  ;;  %v3053_v23 = vrot.slane %v3052_v27, 4  ;;  %v2752_v5 = vpack.c.bf16 %v2732_v28, %v2732_v28  ;;  %v2659_v54 = vadd.f32 %v2658_v58, %v2600_v18  ;;  %v3135_v27 = vld [vmem:[#allocation4 + $0xa4] sm:$0xf] }
 0x329   : > { %v3166_v57 = vsel %vm7478_vm11, 0, %v3165_v7  ;;  %2983 = vst [vmem:[#allocation4 + $0x84] sm:$0xf] %v2875_v4 }
 0x32a   : > { %3167 = vst [vmem:[#allocation4 + $0x78] sm:$0x1] %v3166_v57  ;;  %v3132_v17 = vsel %vm7393_vm9, %v3053_v23, %v3131_v9  ;;  %v2877_v1 = vshrl.u32 %v2752_v5, 16  ;;  %v2880_v14 = vshll.u32 %v2752_v5, 16  ;;  %v2689_v55 = vadd.f32 %v2659_v54, %v2089_v39 }
 0x32b   : > { %3133 = vst [vmem:[#allocation4 + $0x8c] sm:$0xf] %v3132_v17  ;;  %v2608_v17 = vadd.f32 %v2607_v3, %v2548_v42 }
 0x32c   : > { %2772 = vst [vmem:[#allocation4 + $0x94] sm:$0xf] %v2752_v5  ;;  %v2879_v30 = vrot.slane %v2877_v1, 7  ;;  %v3054_v2 = vrot.slane %v2877_v1, 4  ;;  %v3055_v8 = vrot.slane %v2880_v14, 5  ;;  %v2713_v35 = vadd.f32 %v7892_v48, %v2689_v55 }
 0x32e   : > { %v2882_v60 = vor.u32 %v2880_v14, %v2879_v30  ;;  %v2733_v61 = vmax.f32 %v2713_v35, 0.0  ;;  %v3056_v26 = vor.u32 %v3055_v8, %v3054_v2  ;;  %v2883_v40 = vrot.slane %v2879_v30, 4  ;;  %v2550_v30 = vpop.f32.mrf.mxu2  ;;  %v2609_v2 = vpop.f32.mrf.mxu3 }
 0x32f   : > { %v2661_v20 = vpop.f32.mrf.mxu0 }
 0x330   : > { %v2985_v41 = vsel %vm7292_vm2, %v2882_v60, %v2984_v46  ;;  %v2753_v25 = vpack.c.bf16 %v2733_v61, %v2733_v61  ;;  %v2662_v47 = vadd.f32 %v2661_v20, %v2603_v45  ;;  %v3057_v38 = vrot.slane %v3056_v26, 4  ;;  %v2098_v60 = vpop.f32.mrf.mxu1 }
 0x331   : > { %2986 = vst [vmem:[#allocation4 + $0x90] sm:$0xf] %v2985_v41  ;;  %v2097_v46 = vadd.f32 %v2096_v50, %v7852_v53  ;;  %v2099_v3 = vadd.f32 %v2098_v60, %v7859_v15 }
 0x332   : > { %v3195_v29 = vld [vmem:[#allocation4 + $0x8c] sm:$0x8]  ;;  %2773 = vst [vmem:[#allocation4 + $0xa0] sm:$0xf] %v2753_v25  ;;  %v2885_v43 = vshrl.u32 %v2753_v25, 16  ;;  %v2888_v52 = vshll.u32 %v2753_v25, 16  ;;  %v2690_v6 = vadd.f32 %v2662_v47, %v2092_v22 }
 0x333   : > { %v3196_v63 = vsel %vm7533_vm14, 0, %v3195_v29 }
 0x334   : > { %3197 = vst [vmem:[#allocation4 + $0x8c] sm:$0x8] %v3196_v63  ;;  %v2887_v51 = vrot.slane %v2885_v43, 7  ;;  %v3058_v21 = vrot.slane %v2888_v52, 5  ;;  %v3060_v19 = vrot.slane %v2885_v43, 4  ;;  %v2714_v24 = vadd.f32 %v7892_v48, %v2690_v6 }
 0x336   : > { %v2890_v10 = vor.u32 %v2888_v52, %v2887_v51  ;;  %v3059_v11 = vsel %vm7384_vm8, %v3057_v38, %v3058_v21  ;;  %v3061_v18 = vor.u32 %v3060_v19, %v3058_v21  ;;  %v2734_v16 = vmax.f32 %v2714_v24, 0.0 }
 0x337   : > { %3134 = vst [vmem:[#allocation4 + $0x98] sm:$0xf] %v3059_v11  ;;  %v2663_v28 = vpop.f32.mrf.mxu0  ;;  %v2610_v51 = vadd.f32 %v2609_v2, %v2550_v30 }
 0x338   : > { %v3168_v39 = vld [vmem:[#allocation4 + $0x90] sm:$0x1]  ;;  %v2891_v9 = vsel %vm7315_vm5, %v2883_v40, %v2890_v10  ;;  %v3062_v58 = vrot.slane %v3061_v18, 4  ;;  %v2754_v7 = vpack.c.bf16 %v2734_v16, %v2734_v16  ;;  %v2664_v4 = vadd.f32 %v2663_v28, %v2605_v34  ;;  %v3139_v40 = vld [vmem:[#allocation4 + $0xbc] sm:$0xf]  ;;  %v2553_v16 = vpop.f32.mrf.mxu2 }
 0x339   : > { %v3169_v23 = vsel %vm7478_vm11, 0, %v3168_v39  ;;  %2987 = vst [vmem:[#allocation4 + $0x9c] sm:$0xf] %v2891_v9  ;;  %v2101_v39 = vpop.f32.mrf.mxu1 }
 0x33a   : > { %3170 = vst [vmem:[#allocation4 + $0x90] sm:$0x1] %v3169_v23  ;;  %v3136_v5 = vsel %vm7393_vm9, %v3062_v58, %v3135_v27  ;;  %v2893_v54 = vshrl.u32 %v2754_v7, 16  ;;  %v2896_v59 = vshll.u32 %v2754_v7, 16  ;;  %v2691_v57 = vadd.f32 %v2664_v4, %v2094_v44  ;;  %v2612_v44 = vpop.f32.mrf.mxu3 }
 0x33b   : > { %3137 = vst [vmem:[#allocation4 + $0xa4] sm:$0xf] %v3136_v5  ;;  %v2613_v4 = vadd.f32 %v2612_v44, %v2553_v16  ;;  %v6641_v16 = vld [vmem:[%s8373_s6] ss:$0 sm:$0xff] }
 0x33c   : > { %2774 = vst [vmem:[#allocation4 + $0xac] sm:$0xf] %v2754_v7  ;;  %v2895_v1 = vrot.slane %v2893_v54, 7  ;;  %v3063_v14 = vrot.slane %v2893_v54, 4  ;;  %v3064_v55 = vrot.slane %v2896_v59, 5  ;;  %v2715_v56 = vadd.f32 %v7892_v48, %v2691_v57 }
 0x33d   : > { %v2992_v57 = vld [vmem:[#allocation4 + $0xc0] sm:$0xf] }
 0x33e   : > { %v2898_v45 = vor.u32 %v2896_v59, %v2895_v1  ;;  %v2735_v31 = vmax.f32 %v2715_v56, 0.0  ;;  %v3065_v8 = vor.u32 %v3064_v55, %v3063_v14  ;;  %v2899_v38 = vrot.slane %v2895_v1, 4 }
 0x33f   : > { %v2666_v35 = vpop.f32.mrf.mxu0  ;;  %v2102_v56 = vadd.f32 %v2101_v39, %v7868_v36 }
 0x340   : > { %v2989_v61 = vsel %vm7292_vm2, %v2898_v45, %v2988_v0  ;;  %v2755_v26 = vpack.c.bf16 %v2735_v31, %v2735_v31  ;;  %v2667_v20 = vadd.f32 %v2666_v35, %v2608_v17  ;;  %v3066_v43 = vrot.slane %v3065_v8, 4  ;;  %v2555_v35 = vpop.f32.mrf.mxu2 }
 0x341   : > { %2990 = vst [vmem:[#allocation4 + $0xa8] sm:$0xf] %v2989_v61 }
 0x342   : > { %v3198_v22 = vld [vmem:[#allocation4 + $0xa4] sm:$0x8]  ;;  %2775 = vst [vmem:[#allocation4 + $0xb8] sm:$0xf] %v2755_v26  ;;  %v2901_v41 = vshrl.u32 %v2755_v26, 16  ;;  %v2904_v25 = vshll.u32 %v2755_v26, 16  ;;  %v2692_v47 = vadd.f32 %v2667_v20, %v2097_v46  ;;  %v2614_v46 = vpop.f32.mrf.mxu3  ;;  %v2103_v20 = vpop.f32.mrf.mxu1 }
 0x343   : > { %v3199_v29 = vsel %vm7533_vm14, 0, %v3198_v22 }
 0x344   : > { %3200 = vst [vmem:[#allocation4 + $0xa4] sm:$0x8] %v3199_v29  ;;  %v2903_v52 = vrot.slane %v2901_v41, 7  ;;  %v3067_v6 = vrot.slane %v2904_v25, 5  ;;  %v3069_v53 = vrot.slane %v2901_v41, 4  ;;  %v2716_v63 = vadd.f32 %v7892_v48, %v2692_v47 }
 0x345   : > { %v2615_v29 = vadd.f32 %v2614_v46, %v2555_v35 }
 0x346   : > { %v2906_v21 = vor.u32 %v2904_v25, %v2903_v52  ;;  %v3068_v19 = vsel %vm7384_vm8, %v3066_v43, %v3067_v6  ;;  %v3070_v24 = vor.u32 %v3069_v53, %v3067_v6  ;;  %v2736_v42 = vmax.f32 %v2716_v63, 0.0 }
 0x347   : > { %3138 = vst [vmem:[#allocation4 + $0xb0] sm:$0xf] %v3068_v19  ;;  %v2668_v34 = vpop.f32.mrf.mxu0  ;;  %v2104_v63 = vadd.f32 %v2103_v20, %v7878_v12 }
 0x348   : > { %v3171_v50 = vld [vmem:[#allocation4 + $0xa8] sm:$0x1]  ;;  %v2907_v10 = vsel %vm7315_vm5, %v2899_v38, %v2906_v21  ;;  %v3071_v11 = vrot.slane %v3070_v24, 4  ;;  %v2756_v18 = vpack.c.bf16 %v2736_v42, %v2736_v42  ;;  %v2669_v27 = vadd.f32 %v2668_v34, %v2610_v51  ;;  %v3143_v38 = vld [vmem:[#allocation4 + $0xd4] sm:$0xf] }
 0x349   : > { %v3172_v28 = vsel %vm7478_vm11, 0, %v3171_v50  ;;  %2991 = vst [vmem:[#allocation4 + $0xb4] sm:$0xf] %v2907_v10 }
 0x34a   : > { %3173 = vst [vmem:[#allocation4 + $0xa8] sm:$0x1] %v3172_v28  ;;  %v3140_v15 = vsel %vm7393_vm9, %v3071_v11, %v3139_v40  ;;  %v2909_v9 = vshrl.u32 %v2756_v18, 16  ;;  %v2912_v58 = vshll.u32 %v2756_v18, 16  ;;  %v2693_v7 = vadd.f32 %v2669_v27, %v2099_v3  ;;  %v2996_v27 = vld [vmem:[#allocation4 + $0xd8] sm:$0xf] }
 0x34b   : > { %3141 = vst [vmem:[#allocation4 + $0xbc] sm:$0xf] %v3140_v15 }
 0x34c   : > { %2776 = vst [vmem:[#allocation4 + $0xc4] sm:$0xf] %v2756_v18  ;;  %v2911_v23 = vrot.slane %v2909_v9, 7  ;;  %v3072_v5 = vrot.slane %v2909_v9, 4  ;;  %v3073_v54 = vrot.slane %v2912_v58, 5  ;;  %v2717_v59 = vadd.f32 %v7892_v48, %v2693_v7 }
 0x34e   : > { %v2914_v17 = vor.u32 %v2912_v58, %v2911_v23  ;;  %v2737_v1 = vmax.f32 %v2717_v59, 0.0  ;;  %v3074_v14 = vor.u32 %v3073_v54, %v3072_v5  ;;  %v2915_v47 = vrot.slane %v2911_v23, 4 }
 0x34f   : > { %v2671_v55 = vpop.f32.mrf.mxu0 }
 0x350   : > { %v2993_v0 = vsel %vm7292_vm2, %v2914_v17, %v2992_v57  ;;  %v2757_v45 = vpack.c.bf16 %v2737_v1, %v2737_v1  ;;  %v2672_v31 = vadd.f32 %v2671_v55, %v2613_v4  ;;  %v3075_v26 = vrot.slane %v3074_v14, 4 }
 0x351   : > { %2994 = vst [vmem:[#allocation4 + $0xc0] sm:$0xf] %v2993_v0 }
 0x352   : > { %v3201_v30 = vld [vmem:[#allocation4 + $0xbc] sm:$0x8]  ;;  %2777 = vst [vmem:[#allocation4 + $0xd0] sm:$0xf] %v2757_v45  ;;  %v2917_v2 = vshrl.u32 %v2757_v45, 16  ;;  %v2920_v8 = vshll.u32 %v2757_v45, 16  ;;  %v2694_v60 = vadd.f32 %v2672_v31, %v2102_v56 }
 0x353   : > { %v3202_v61 = vsel %vm7533_vm14, 0, %v3201_v30  ;;  %v3147_v56 = vld [vmem:[#allocation4 + $0xec] sm:$0xf] }
 0x354   : > { %3203 = vst [vmem:[#allocation4 + $0xbc] sm:$0x8] %v3202_v61  ;;  %v2919_v36 = vrot.slane %v2917_v2, 7  ;;  %v3076_v22 = vrot.slane %v2920_v8, 5  ;;  %v3078_v41 = vrot.slane %v2917_v2, 4  ;;  %v2718_v25 = vadd.f32 %v7892_v48, %v2694_v60 }
 0x356   : > { %v2922_v43 = vor.u32 %v2920_v8, %v2919_v36  ;;  %v3077_v52 = vsel %vm7384_vm8, %v3075_v26, %v3076_v22  ;;  %v3079_v6 = vor.u32 %v3078_v41, %v3076_v22  ;;  %v2738_v53 = vmax.f32 %v2718_v25, 0.0 }
 0x357   : > { %3142 = vst [vmem:[#allocation4 + $0xc8] sm:$0xf] %v3077_v52  ;;  %v2673_v51 = vpop.f32.mrf.mxu0 }
 0x358   : > { %v3174_v21 = vld [vmem:[#allocation4 + $0xc0] sm:$0x1]  ;;  %v2923_v19 = vsel %vm7315_vm5, %v2915_v47, %v2922_v43  ;;  %v3080_v24 = vrot.slane %v3079_v6, 4  ;;  %v2758_v42 = vpack.c.bf16 %v2738_v53, %v2738_v53  ;;  %v2674_v48 = vadd.f32 %v2673_v51, %v2615_v29 }
 0x359   : > { %v3175_v3 = vsel %vm7478_vm11, 0, %v3174_v21  ;;  %2995 = vst [vmem:[#allocation4 + $0xcc] sm:$0xf] %v2923_v19 }
 0x35a   : > { %3176 = vst [vmem:[#allocation4 + $0xc0] sm:$0x1] %v3175_v3  ;;  %v3144_v40 = vsel %vm7393_vm9, %v3080_v24, %v3143_v38  ;;  %v2925_v34 = vshrl.u32 %v2758_v42, 16  ;;  %v2928_v12 = vshll.u32 %v2758_v42, 16  ;;  %v2695_v50 = vadd.f32 %v2674_v48, %v2104_v63 }
 0x35b   : > { %3145 = vst [vmem:[#allocation4 + $0xd4] sm:$0xf] %v3144_v40 }
 0x35c   : > { %2778 = vst [vmem:[#allocation4 + $0xdc] sm:$0xf] %v2758_v42  ;;  %v2927_v10 = vrot.slane %v2925_v34, 7  ;;  %v3081_v11 = vrot.slane %v2925_v34, 4  ;;  %v3082_v18 = vrot.slane %v2928_v12, 5  ;;  %v2719_v44 = vadd.f32 %v6641_v16, %v2695_v50 }
 0x35e   : > { %v2930_v28 = vor.u32 %v2928_v12, %v2927_v10  ;;  %v2739_v39 = vmax.f32 %v2719_v44, 0.0  ;;  %v3083_v9 = vor.u32 %v3082_v18, %v3081_v11  ;;  %v2931_v1 = vrot.slane %v2927_v10, 4 }
 0x360   : > { %v2997_v15 = vsel %vm7292_vm2, %v2930_v28, %v2996_v27  ;;  %v2759_v58 = vpack.c.bf16 %v2739_v39, %v2739_v39  ;;  %v3084_v54 = vrot.slane %v3083_v9, 4 }
 0x361   : > { %2998 = vst [vmem:[#allocation4 + $0xd8] sm:$0xf] %v2997_v15 }
 0x362   : > { %v3204_v7 = vld [vmem:[#allocation4 + $0xd4] sm:$0x8]  ;;  %2779 = vst [vmem:[#allocation4 + $0xe8] sm:$0xf] %v2759_v58  ;;  %v2933_v4 = vshrl.u32 %v2759_v58, 16  ;;  %v2936_v23 = vshll.u32 %v2759_v58, 16 }
 0x363   : > { %v3205_v5 = vsel %vm7533_vm14, 0, %v3204_v7 }
 0x364   : > { %3206 = vst [vmem:[#allocation4 + $0xd4] sm:$0x8] %v3205_v5  ;;  %v2935_v59 = vrot.slane %v2933_v4, 7  ;;  %v3085_v57 = vrot.slane %v2936_v23, 5  ;;  %v3087_v17 = vrot.slane %v2933_v4, 4 }
 0x366   : > { %v2938_v14 = vor.u32 %v2936_v23, %v2935_v59  ;;  %v3086_v37 = vsel %vm7384_vm8, %v3084_v54, %v3085_v57  ;;  %v3088_v55 = vor.u32 %v3087_v17, %v3085_v57 }
 0x367   : > { %3146 = vst [vmem:[#allocation4 + $0xe0] sm:$0xf] %v3086_v37 }
 0x368   : > { %v3177_v0 = vld [vmem:[#allocation4 + $0xd8] sm:$0x1]  ;;  %v2939_v45 = vsel %vm7315_vm5, %v2931_v1, %v2938_v14  ;;  %v3089_v31 = vrot.slane %v3088_v55, 4 }
 0x369   : > { %v3178_v30 = vsel %vm7478_vm11, 0, %v3177_v0  ;;  %2999 = vst [vmem:[#allocation4 + $0xe4] sm:$0xf] %v2939_v45 }
 0x36a   : > { %3179 = vst [vmem:[#allocation4 + $0xd8] sm:$0x1] %v3178_v30  ;;  %v3148_v2 = vsel %vm7393_vm9, %v3089_v31, %v3147_v56 }
 0x36b   : > { %3149 = vst [vmem:[#allocation4 + $0xec] sm:$0xf] %v3148_v2 }
 0x370   : > { %3212 = sbr.rel (%p4957_p12) target bundleno = 890 (0x37a), region = 88 }
 0x372   : > { %v3207_v8 = vld [vmem:[#allocation4 + $0xec] sm:$0x8] }
 0x373   : > { %v3208_v13 = vsel %vm7533_vm14, 0, %v3207_v8 }
 0x374   : > { %3209 = vst [vmem:[#allocation4 + $0xec] sm:$0x8] %v3208_v13 }
 0x375   : > { %v6909_v33 = vmov 0  }
 0x376   : > { %3213 = vst [vmem:[#allocation4] sm:$0xff] %v6909_v33 }
 0x377   : > { %3214 = vst [vmem:[#allocation4 + $0x8] sm:$0xf] %v6909_v33 }
 0x378   : > { %3215 = vst [vmem:[#allocation4 + $0xc] sm:$0xff] %v6909_v33 }
 0x379   : > { %3216 = vst [vmem:[#allocation4 + $0x14] sm:$0xf] %v6909_v33 }
 0x37a PF: > { %3219 = sbr.rel (%p4958_p13) target bundleno = 900 (0x384), region = 92 }
 0x37f   : > { %v6910_v32 = vmov 0  }
 0x380   : > { %3221 = vst [vmem:[#allocation4 + $0xd8] sm:$0xff] %v6910_v32 }
 0x381   : > { %3222 = vst [vmem:[#allocation4 + $0xe0] sm:$0xf] %v6910_v32 }
 0x382   : > { %3223 = vst [vmem:[#allocation4 + $0xe4] sm:$0xff] %v6910_v32 }
 0x383   : > { %3224 = vst [vmem:[#allocation4 + $0xec] sm:$0xf] %v6910_v32 }
 0x384 PF: > { %v6438_v49 = vld [vmem:[#allocation11 + $0xf8] sm:$0xff]  ;;  %v6437_v46 = vld [vmem:[#allocation11 + $0xf0] sm:$0xff]  ;;  %v6436_v26 = vld [vmem:[#allocation11 + $0xe8] sm:$0xff]  ;;  %s8374_s12 = sld [smem:[#allocation32_spill]]  ;;  %s6190_s9 = sshll.u32 %s7099_s11, 3 }
 0x385   : > { %v6446_v62 = vld [vmem:[#allocation11 + $0x138] sm:$0xff]  ;;  %3659 = vmatpush.bf16.msra.mxu1 %v6438_v49  ;;  %v6445_v60 = vld [vmem:[#allocation11 + $0x130] sm:$0xff]  ;;  %v6444_v20 = vld [vmem:[#allocation11 + $0x128] sm:$0xff]  ;;  %s8375_s19 = sld [smem:[#allocation33_spill]]  ;;  %s4793_s13 = sshll.u32 %s7125_s25, 4  ;;  %s4794_s13 = int_to_ptr.vmem [resolvable:$true] %s4793_s13 }
 0x386   : > { %v6454_v35 = vld [vmem:[#allocation11 + $0x178] sm:$0xff]  ;;  %3708 = vmatpush.bf16.msra.mxu2 %v6446_v62  ;;  %v6453_v61 = vld [vmem:[#allocation11 + $0x170] sm:$0xff]  ;;  %v6452_v36 = vld [vmem:[#allocation11 + $0x168] sm:$0xff]  ;;  %s4779_s20 = scalar_lea.sflag [#allocation8], %s7077_s2 }
 0x387   : > { %3757 = vmatpush.bf16.msrb.mxu3 %v6454_v35  ;;  %v6435_v22 = vld [vmem:[#allocation11 + $0xe0] sm:$0xff]  ;;  %v6434_v47 = vld [vmem:[#allocation11 + $0xd8] sm:$0xff]  ;;  %v6433_v52 = vld [vmem:[#allocation11 + $0xd0] sm:$0xff] }
 0x388   : > { %v6443_v41 = vld [vmem:[#allocation11 + $0x120] sm:$0xff]  ;;  %v6442_v29 = vld [vmem:[#allocation11 + $0x118] sm:$0xff]  ;;  %v6441_v6 = vld [vmem:[#allocation11 + $0x110] sm:$0xff] }
 0x389   : > { %3660 = vmatpush.bf16.msra.mxu1 %v6437_v46  ;;  %v6451_v25 = vld [vmem:[#allocation11 + $0x160] sm:$0xff]  ;;  %v6450_v43 = vld [vmem:[#allocation11 + $0x158] sm:$0xff]  ;;  %v6449_v53 = vld [vmem:[#allocation11 + $0x150] sm:$0xff] }
 0x38a   : > { %3709 = vmatpush.bf16.msra.mxu2 %v6445_v60  ;;  %v6432_v63 = vld [vmem:[#allocation11 + $0xc8] sm:$0xff]  ;;  %v6431_v21 = vld [vmem:[#allocation11 + $0xc0] sm:$0xff]  ;;  %v6408_v48 = vld [vmem:[#allocation4 + $0x20] sm:$0xf0] }
 0x38b   : > { %3758 = vmatpush.bf16.msrb.mxu3 %v6453_v61  ;;  %v6440_v38 = vld [vmem:[#allocation11 + $0x108] sm:$0xff]  ;;  %v6439_v19 = vld [vmem:[#allocation11 + $0x100] sm:$0xff]  ;;  %v5615_v40 = vld [vmem:[#allocation4 + $0x24] sm:$0xf0]  ;;  %s4792_s30 = scalar_lea.hbm %s8375_s19, %s6190_s9  ;;  %s6809_s3 = scalar_lea.hbm %s8375_s19, 512 }
 0x38c   : > { %v6448_v51 = vld [vmem:[#allocation11 + $0x148] sm:$0xff]  ;;  %v6447_v24 = vld [vmem:[#allocation11 + $0x140] sm:$0xff]  ;;  %v6398_v34 = vld [vmem:[#allocation11 + $0x78] sm:$0xff]  ;;  %s4795_s11 = sshll.u32 %s4792_s30, 4  ;;  %s4796_s11 = int_to_ptr.hbm [resolvable:$true] %s4795_s11 }
 0x38d   : > { %3661 = vmatpush.bf16.msra.mxu1 %v6436_v26  ;;  %v5613_v42 = vld [vmem:[#allocation4 + $0x18] sm:$0xf]  ;;  %v6407_v3 = vld [vmem:[#allocation4 + $0x1c] sm:$0xf]  ;;  %v5621_v12 = vld [vmem:[#allocation4 + $0x20] sm:$0xf] }
 0x38e   : > { %3710 = vmatpush.bf16.msra.mxu2 %v6444_v20  ;;  %v6409_v50 = vld [vmem:[#allocation4 + $0x28] sm:$0xf0]  ;;  %v5614_v11 = vor.u32 %v6408_v48, %v5613_v42  ;;  %v5618_v18 = vor.u32 %v6407_v3, %v5615_v40  ;;  %v6397_v44 = vld [vmem:[#allocation11 + $0x70] sm:$0xff]  ;;  %v6396_v28 = vld [vmem:[#allocation11 + $0x68] sm:$0xff]  ;;  %s6803_s4 = sshra.s32 %s4796_s11, 4  ;;  %s6804_s4 = int_to_ptr.hbm [resolvable:$true] %s6803_s4 }
 0x38f   : > { %3759 = vmatpush.bf16.msrb.mxu3 %v6452_v36  ;;  %v6390_v10 = vld [vmem:[#allocation11 + $0x38] sm:$0xff]  ;;  %v5622_v16 = vor.u32 %v6409_v50, %v5621_v12  ;;  %v6389_v27 = vld [vmem:[#allocation11 + $0x30] sm:$0xff]  ;;  %v6388_v39 = vld [vmem:[#allocation11 + $0x28] sm:$0xff]  ;;  %s6805_s18 = scalar_lea.hbm %s6804_s4, 128  ;;  %p6810_p7 = scmp.lt.s32.totalorder %s6804_s4, %s8375_s19 }
 0x390   : > { %v5625_v15 = vld [vmem:[#allocation4 + $0x30] sm:$0xf]  ;;  %v6411_v9 = vld [vmem:[#allocation4 + $0x38] sm:$0xf0]  ;;  %v6410_v58 = vld [vmem:[#allocation4 + $0x34] sm:$0xf]  ;;  %p6806_p8 = scmp.ne.s32.totalorder %s6804_s4, %s6805_s18  ;;  %p6811_p9 = scmp.lt.s32.totalorder %s6809_s3, %s6805_s18 }
 0x391   : > { %3662 = vmatpush.bf16.msra.mxu1 %v6435_v22  ;;  %v5627_v7 = vld [vmem:[#allocation4 + $0x3c] sm:$0xf0]  ;;  %v5633_v4 = vld [vmem:[#allocation4 + $0x38] sm:$0xf]  ;;  %v6412_v23 = vld [vmem:[#allocation4 + $0x40] sm:$0xf0]  ;;  %v5626_v5 = vor.u32 %v6411_v9, %v5625_v15 }
 0x392   : > { %3711 = vmatpush.bf16.msra.mxu2 %v6443_v41  ;;  %v5630_v54 = vor.u32 %v6410_v58, %v5627_v7  ;;  %v5634_v59 = vor.u32 %v6412_v23, %v5633_v4  ;;  %v6395_v57 = vld [vmem:[#allocation11 + $0x60] sm:$0xff]  ;;  %v5637_v1 = vld [vmem:[#allocation4 + $0x48] sm:$0xf]  ;;  %v6413_v37 = vld [vmem:[#allocation4 + $0x4c] sm:$0xf]  ;;  %p6807_p0 = pnand %p6806_p8, %p7049_p5  ;;  %p6812_p2 = por %p6811_p9, %p6810_p7 }
 0x393   : > { %3760 = vmatpush.bf16.msrb.mxu3 %v6451_v25  ;;  %v6387_v17 = vld [vmem:[#allocation11 + $0x20] sm:$0xff]  ;;  %v5639_v55 = vld [vmem:[#allocation4 + $0x54] sm:$0xf0]  ;;  %v6415_v0 = vld [vmem:[#allocation4 + $0x58] sm:$0xf0] }
 0x394   : > { %v6414_v14 = vld [vmem:[#allocation4 + $0x50] sm:$0xf0]  ;;  %v5645_v56 = vld [vmem:[#allocation4 + $0x50] sm:$0xf]  ;;  %v5642_v31 = vor.u32 %v6413_v37, %v5639_v55  ;;  %v6394_v2 = vld [vmem:[#allocation11 + $0x58] sm:$0xff]  ;;  %p6808_p3 = pneg %p6807_p0 }
 0x395   : > { %3663 = vmatpush.bf16.msra.mxu1 %v6434_v47  ;;  %v5638_v45 = vor.u32 %v6414_v14, %v5637_v1  ;;  %v5646_v30 = vor.u32 %v6415_v0, %v5645_v56  ;;  %v6386_v8 = vld [vmem:[#allocation11 + $0x18] sm:$0xff]  ;;  %v5649_v13 = vld [vmem:[#allocation4 + $0x60] sm:$0xf]  ;;  %v6416_v32 = vld [vmem:[#allocation4 + $0x64] sm:$0xf] }
 0x396   : > { %3712 = vmatpush.bf16.msra.mxu2 %v6442_v29  ;;  %v6417_v33 = vld [vmem:[#allocation4 + $0x68] sm:$0xf0]  ;;  %v5651_v49 = vld [vmem:[#allocation4 + $0x6c] sm:$0xf0]  ;;  %v5657_v62 = vld [vmem:[#allocation4 + $0x68] sm:$0xf]  ;;  %p6813_p1 = pnand %p6812_p2, %p6808_p3 }
 0x397   : > { %3761 = vmatpush.bf16.msrb.mxu3 %v6450_v43  ;;  %v6418_v35 = vld [vmem:[#allocation4 + $0x70] sm:$0xf0]  ;;  %v5650_v46 = vor.u32 %v6417_v33, %v5649_v13  ;;  %v5654_v60 = vor.u32 %v6416_v32, %v5651_v49  ;;  %v6393_v26 = vld [vmem:[#allocation11 + $0x50] sm:$0xff]  ;;  %v5661_v36 = vld [vmem:[#allocation4 + $0x78] sm:$0xf] }
 0x398   : > { %v5658_v61 = vor.u32 %v6418_v35, %v5657_v62  ;;  %v6385_v20 = vld [vmem:[#allocation11 + $0x10] sm:$0xff]  ;;  %v6419_v41 = vld [vmem:[#allocation4 + $0x7c] sm:$0xf]  ;;  %v5663_v25 = vld [vmem:[#allocation4 + $0x84] sm:$0xf0] }
 0x399   : > { %3664 = vmatpush.bf16.msra.mxu1 %v6433_v52  ;;  %v6420_v22 = vld [vmem:[#allocation4 + $0x80] sm:$0xf0]  ;;  %v5669_v47 = vld [vmem:[#allocation4 + $0x80] sm:$0xf]  ;;  %v6421_v29 = vld [vmem:[#allocation4 + $0x88] sm:$0xf0]  ;;  %v5666_v52 = vor.u32 %v6419_v41, %v5663_v25 }
 0x39a   : > { %3713 = vmatpush.bf16.msra.mxu2 %v6441_v6  ;;  %v5662_v43 = vor.u32 %v6420_v22, %v5661_v36  ;;  %v5670_v6 = vor.u32 %v6421_v29, %v5669_v47  ;;  %v6422_v42 = vld [vmem:[#allocation4 + $0x94] sm:$0xf]  ;;  %v5675_v48 = vld [vmem:[#allocation4 + $0x9c] sm:$0xf0]  ;;  %v5681_v3 = vld [vmem:[#allocation4 + $0x98] sm:$0xf] }
 0x39b   : > { %3762 = vmatpush.bf16.msrb.mxu3 %v6449_v53  ;;  %v6392_v53 = vld [vmem:[#allocation11 + $0x48] sm:$0xff]  ;;  %v6424_v40 = vld [vmem:[#allocation4 + $0xa0] sm:$0xf0]  ;;  %v5678_v50 = vor.u32 %v6422_v42, %v5675_v48  ;;  %v6425_v15 = vld [vmem:[#allocation4 + $0xac] sm:$0xf] }
 0x39c   : > { %v5687_v9 = vld [vmem:[#allocation4 + $0xb4] sm:$0xf0]  ;;  %v5693_v58 = vld [vmem:[#allocation4 + $0xb0] sm:$0xf]  ;;  %v6427_v7 = vld [vmem:[#allocation4 + $0xb8] sm:$0xf0] }
 0x39d   : > { %3665 = vmatpush.bf16.msra.mxu1 %v6432_v63  ;;  %v6406_v63 = vld [vmem:[#allocation11 + $0xb8] sm:$0xff]  ;;  %v5690_v23 = vor.u32 %v6425_v15, %v5687_v9  ;;  %v6428_v14 = vld [vmem:[#allocation4 + $0xc4] sm:$0xf]  ;;  %v5699_v37 = vld [vmem:[#allocation4 + $0xcc] sm:$0xf0] }
 0x39e   : > { %3714 = vmatpush.bf16.msra.mxu2 %v6440_v38  ;;  %v6384_v38 = vld [vmem:[#allocation11 + $0x8] sm:$0xff]  ;;  %v6429_v1 = vld [vmem:[#allocation4 + $0xc8] sm:$0xf0]  ;;  %v5705_v55 = vld [vmem:[#allocation4 + $0xc8] sm:$0xf] }
 0x39f   : > { %3763 = vmatpush.bf16.msrb.mxu3 %v6448_v51  ;;  %v6405_v51 = vld [vmem:[#allocation11 + $0xb0] sm:$0xff]  ;;  %v6430_v56 = vld [vmem:[#allocation4 + $0xd0] sm:$0xf0]  ;;  %v6360_v13 = vld [vmem:[#allocation4 + $0x8] sm:$0xf0] }
 0x3a0   : > { %v6359_v33 = vld [vmem:[#allocation4 + $0x4] sm:$0xf]  ;;  %v5807_v32 = vld [vmem:[#allocation4 + $0xc] sm:$0xf0]  ;;  %v5813_v49 = vld [vmem:[#allocation4 + $0x8] sm:$0xf] }
 0x3a1   : > { %3666 = vmatpush.bf16.msra.mxu1 %v6431_v21  ;;  %v6404_v21 = vld [vmem:[#allocation11 + $0xa8] sm:$0xff]  ;;  %v6361_v62 = vld [vmem:[#allocation4 + $0x10] sm:$0xf0]  ;;  %v6367_v15 = vld [vmem:[#allocation4 + $0x40] sm:$0xf0] }
 0x3a2   : > { %3715 = vmatpush.bf16.msra.mxu2 %v6439_v19  ;;  %v5673_v19 = vld [vmem:[#allocation4 + $0x90] sm:$0xf]  ;;  %v6492_v41 = vld [vmem:[#allocation11 + $0x1e8] sm:$0xff] }
 0x3a3   : > { %3764 = vmatpush.bf16.msrb.mxu3 %v6447_v24  ;;  %v6423_v24 = vld [vmem:[#allocation4 + $0x98] sm:$0xf0]  ;;  %v5817_v29 = vld [vmem:[#allocation4 + $0x18] sm:$0xf] }
 0x3a4   : > { %3667 = vmatmul.bf16.vlgmr.msra.gmra.mxu1 %v5614_v11  ;;  %v5674_v12 = vor.u32 %v6423_v24, %v5673_v19  ;;  %v6391_v11 = vld [vmem:[#allocation11 + $0x40] sm:$0xff] }
 0x3a5   : > { %4078 = vmatpush.bf16.msrb.mxu1 %v6390_v10  ;;  %3716 = vmatmul.bf16.vlgmr.msra.gmra.mxu2 %v5618_v18  ;;  %v5682_v10 = vor.u32 %v6424_v40, %v5681_v3  ;;  %v6402_v18 = vld [vmem:[#allocation11 + $0x98] sm:$0xff]  ;;  %v6499_v40 = vld [vmem:[#allocation11 + $0x220] sm:$0xff] }
 0x3a6   : > { %4127 = vmatpush.bf16.msrb.mxu2 %v6398_v34  ;;  %3765 = vmatmul.bf16.vlgmr.msrb.gmra.mxu3 %v5622_v16  ;;  %v6403_v34 = vld [vmem:[#allocation11 + $0xa0] sm:$0xff] }
 0x3a7   : > { %4176 = vmatpush.bf16.msra.mxu3 %v6406_v63  ;;  %v6383_v16 = vld [vmem:[#allocation11] sm:$0xff]  ;;  %v6364_v63 = vld [vmem:[#allocation4 + $0x28] sm:$0xf0] }
 0x3a9   : > { %4079 = vmatpush.bf16.msrb.mxu1 %v6389_v27  ;;  %v6400_v27 = vld [vmem:[#allocation11 + $0x88] sm:$0xff] }
 0x3aa   : > { %4128 = vmatpush.bf16.msrb.mxu2 %v6397_v44  ;;  %v6401_v44 = vld [vmem:[#allocation11 + $0x90] sm:$0xff] }
 0x3ab   : > { %4177 = vmatpush.bf16.msra.mxu3 %v6405_v51 }
 0x3ad   : > { %4080 = vmatpush.bf16.msrb.mxu1 %v6388_v39  ;;  %v6426_v39 = vld [vmem:[#allocation4 + $0xb0] sm:$0xf0] }
 0x3ae   : > { %4129 = vmatpush.bf16.msrb.mxu2 %v6396_v28  ;;  %v5685_v28 = vld [vmem:[#allocation4 + $0xa8] sm:$0xf] }
 0x3af   : > { %4178 = vmatpush.bf16.msra.mxu3 %v6404_v21  ;;  %v5686_v4 = vor.u32 %v6426_v39, %v5685_v28  ;;  %v5831_v28 = vld [vmem:[#allocation4 + $0x3c] sm:$0xf0]  ;;  %v5837_v39 = vld [vmem:[#allocation4 + $0x38] sm:$0xf] }
 0x3b1   : > { %4081 = vmatpush.bf16.msrb.mxu1 %v6387_v17  ;;  %v5697_v17 = vld [vmem:[#allocation4 + $0xc0] sm:$0xf] }
 0x3b2   : > { %4130 = vmatpush.bf16.msrb.mxu2 %v6395_v57  ;;  %v6494_v57 = vld [vmem:[#allocation11 + $0x1f8] sm:$0xff]  ;;  %v5698_v0 = vor.u32 %v6429_v1, %v5697_v17 }
 0x3b3   : > { %4179 = vmatpush.bf16.msra.mxu3 %v6403_v34 }
 0x3b4   : > { %3672 = vmatmul.bf16.gmra.mxu1 %v5626_v5  ;;  %v5694_v5 = vor.u32 %v6427_v7, %v5693_v58 }
 0x3b5   : > { %3721 = vmatmul.bf16.gmra.mxu2 %v5630_v54  ;;  %4082 = vmatpush.bf16.msrb.mxu1 %v6386_v8  ;;  %v6399_v54 = vld [vmem:[#allocation11 + $0x80] sm:$0xff]  ;;  %v5805_v8 = vld [vmem:[#allocation4] sm:$0xf] }
 0x3b6   : > { %3770 = vmatmul.bf16.gmra.mxu3 %v5634_v59  ;;  %4131 = vmatpush.bf16.msrb.mxu2 %v6394_v2  ;;  %v6502_v59 = vld [vmem:[#allocation11 + $0x238] sm:$0xff]  ;;  %v6493_v2 = vld [vmem:[#allocation11 + $0x1f0] sm:$0xff]  ;;  %v5806_v35 = vor.u32 %v6360_v13, %v5805_v8  ;;  %v6370_v8 = vld [vmem:[#allocation4 + $0x58] sm:$0xf0] }
 0x3b7   : > { %4180 = vmatpush.bf16.msra.mxu3 %v6402_v18 }
 0x3b9   : > { %4083 = vmatpush.bf16.msrb.mxu1 %v6385_v20 }
 0x3ba   : > { %4132 = vmatpush.bf16.msrb.mxu2 %v6393_v26  ;;  %v6500_v26 = vld [vmem:[#allocation11 + $0x228] sm:$0xff] }
 0x3bb   : > { %4181 = vmatpush.bf16.msra.mxu3 %v6401_v44  ;;  %v6366_v44 = vld [vmem:[#allocation4 + $0x38] sm:$0xf0] }
 0x3bd   : > { %4084 = vmatpush.bf16.msrb.mxu1 %v6384_v38 }
 0x3be   : > { %4133 = vmatpush.bf16.msrb.mxu2 %v6392_v53  ;;  %v5825_v53 = vld [vmem:[#allocation4 + $0x20] sm:$0xf] }
 0x3bf   : > { %4182 = vmatpush.bf16.msra.mxu3 %v6400_v27  ;;  %v5826_v48 = vor.u32 %v6364_v63, %v5825_v53  ;;  %v6365_v27 = vld [vmem:[#allocation4 + $0x34] sm:$0xf]  ;;  %v5861_v53 = vld [vmem:[#allocation4 + $0x68] sm:$0xf] }
 0x3c0   : > { %v6373_v63 = vld [vmem:[#allocation4 + $0x70] sm:$0xf0] }
 0x3c1   : > { %4085 = vmatpush.bf16.msrb.mxu1 %v6383_v16  ;;  %v5829_v16 = vld [vmem:[#allocation4 + $0x30] sm:$0xf] }
 0x3c2   : > { %4134 = vmatpush.bf16.msrb.mxu2 %v6391_v11 }
 0x3c3   : > { %4183 = vmatpush.bf16.msra.mxu3 %v6399_v54  ;;  %v5838_v54 = vor.u32 %v6367_v15, %v5837_v39  ;;  %v6483_v15 = vld [vmem:[#allocation11 + $0x1a0] sm:$0xff] }
 0x3c4   : > { %3677 = vmatmul.bf16.gmra.mxu1 %v5638_v45  ;;  %v5702_v45 = vor.u32 %v6428_v14, %v5699_v37  ;;  %v6490_v37 = vld [vmem:[#allocation11 + $0x1d8] sm:$0xff] }
 0x3c5   : > { %3726 = vmatmul.bf16.gmra.mxu2 %v5642_v31  ;;  %4628 = vmatpush.bf16.msra.mxu1 %v6494_v57  ;;  %v5706_v31 = vor.u32 %v6430_v56, %v5705_v55  ;;  %v6498_v57 = vld [vmem:[#allocation11 + $0x218] sm:$0xff] }
 0x3c6   : > { %3775 = vmatmul.bf16.gmra.mxu3 %v5646_v30  ;;  %4677 = vmatpush.bf16.msra.mxu2 %v6502_v59  ;;  %v6501_v30 = vld [vmem:[#allocation11 + $0x230] sm:$0xff] }
 0x3c9   : > { %4629 = vmatpush.bf16.msra.mxu1 %v6493_v2  ;;  %v5849_v2 = vld [vmem:[#allocation4 + $0x50] sm:$0xf] }
 0x3ca   : > { %4678 = vmatpush.bf16.msra.mxu2 %v6501_v30  ;;  %v5843_v30 = vld [vmem:[#allocation4 + $0x54] sm:$0xf0] }
 0x3cd   : > { %4630 = vmatpush.bf16.msra.mxu1 %v6492_v41 }
 0x3ce   : > { %4679 = vmatpush.bf16.msra.mxu2 %v6500_v26 }
 0x3d2   : > { %4680 = vmatpush.bf16.msra.mxu2 %v6499_v40  ;;  %v5862_v40 = vor.u32 %v6373_v63, %v5861_v53 }
 0x3d4   : > { %3682 = vmatmul.bf16.gmra.mxu1 %v5650_v46  ;;  %v5810_v46 = vor.u32 %v6359_v33, %v5807_v32 }
 0x3d5   : > { %3731 = vmatmul.bf16.gmra.mxu2 %v5654_v60 }
 0x3d6   : > { %3780 = vmatmul.bf16.gmra.mxu3 %v5658_v61  ;;  %v5814_v61 = vor.u32 %v6361_v62, %v5813_v49  ;;  %4681 = vmatpush.bf16.msra.mxu2 %v6498_v57  ;;  %v6482_v57 = vld [vmem:[#allocation11 + $0x198] sm:$0xff] }
 0x3e4   : > { %3687 = vmatmul.bf16.gmra.mxu1 %v5662_v43  ;;  %v6363_v43 = vld [vmem:[#allocation4 + $0x20] sm:$0xf0] }
 0x3e5   : > { %3736 = vmatmul.bf16.gmra.mxu2 %v5666_v52  ;;  %v6362_v52 = vld [vmem:[#allocation4 + $0x1c] sm:$0xf]  ;;  %v5818_v19 = vor.u32 %v6363_v43, %v5817_v29  ;;  %v5853_v29 = vld [vmem:[#allocation4 + $0x60] sm:$0xf]  ;;  %v6372_v43 = vld [vmem:[#allocation4 + $0x68] sm:$0xf0] }
 0x3e6   : > { %3785 = vmatmul.bf16.gmra.mxu3 %v5670_v6  ;;  %v5819_v6 = vld [vmem:[#allocation4 + $0x24] sm:$0xf0] }
 0x3e7   : > { %v5822_v24 = vor.u32 %v6362_v52, %v5819_v6  ;;  %v6371_v52 = vld [vmem:[#allocation4 + $0x64] sm:$0xf]  ;;  %v5855_v6 = vld [vmem:[#allocation4 + $0x6c] sm:$0xf0] }
 0x3f4   : > { %3692 = vmatmul.bf16.gmra.mxu1 %v5674_v12 }
 0x3f5   : > { %3741 = vmatmul.bf16.gmra.mxu2 %v5678_v50 }
 0x3f6   : > { %3790 = vmatmul.bf16.gmra.mxu3 %v5682_v10  ;;  %v6491_v10 = vld [vmem:[#allocation11 + $0x1e0] sm:$0xff] }
 0x3f7   : > { %4631 = vmatpush.bf16.msra.mxu1 %v6491_v10 }
 0x3fb   : > { %4632 = vmatpush.bf16.msra.mxu1 %v6490_v37 }
 0x404   : > { %3697 = vmatmul.bf16.gmra.mxu1 %v5686_v4  ;;  %v5830_v4 = vor.u32 %v6366_v44, %v5829_v16 }
 0x405   : > { %3746 = vmatmul.bf16.gmra.mxu2 %v5690_v23  ;;  %v5834_v23 = vor.u32 %v6365_v27, %v5831_v28  ;;  %v6488_v27 = vld [vmem:[#allocation11 + $0x1c8] sm:$0xff] }
 0x406   : > { %3795 = vmatmul.bf16.gmra.mxu3 %v5694_v5 }
 0x414   : > { %3702 = vmatmul.bf16.gmra.mxu1 %v5698_v0  ;;  %v5841_v0 = vld [vmem:[#allocation4 + $0x48] sm:$0xf] }
 0x415   : > { %3751 = vmatmul.bf16.gmra.mxu2 %v5702_v45  ;;  %v6369_v45 = vld [vmem:[#allocation4 + $0x50] sm:$0xf0] }
 0x416   : > { %3800 = vmatmul.bf16.gmra.mxu3 %v5706_v31  ;;  %v6368_v31 = vld [vmem:[#allocation4 + $0x4c] sm:$0xf]  ;;  %v5842_v49 = vor.u32 %v6369_v45, %v5841_v0 }
 0x417   : > { %v5846_v62 = vor.u32 %v6368_v31, %v5843_v30  ;;  %v6481_v31 = vld [vmem:[#allocation11 + $0x190] sm:$0xff]  ;;  %v6495_v30 = vld [vmem:[#allocation11 + $0x200] sm:$0xff] }
 0x421   : > { %v3668_v60 = vpop.f32.mrf.mxu1 }
 0x424   : > { %4086 = vmatmul.bf16.vlgmr.msrb.gmra.mxu1 %v5806_v35 }
 0x425   : > { %4135 = vmatmul.bf16.vlgmr.msrb.gmra.mxu2 %v5810_v46  ;;  %v5850_v46 = vor.u32 %v6370_v8, %v5849_v2  ;;  %v6480_v8 = vld [vmem:[#allocation11 + $0x188] sm:$0xff] }
 0x426   : > { %4184 = vmatmul.bf16.vlgmr.msra.gmra.mxu3 %v5814_v61  ;;  %v6497_v61 = vld [vmem:[#allocation11 + $0x210] sm:$0xff] }
 0x427   : > { %4682 = vmatpush.bf16.msra.mxu2 %v6497_v61  ;;  %v6378_v61 = vld [vmem:[#allocation4 + $0x98] sm:$0xf0] }
 0x428   : > { %v3717_v20 = vpop.f32.mrf.mxu2 }
 0x429   : > { %v3718_v36 = vadd.f32 %v3717_v20, %v3668_v60  ;;  %v3766_v22 = vpop.f32.mrf.mxu3  ;;  %v3670_v25 = vpop.f32.mrf.mxu1 }
 0x42b   : > { %v8128_v47 = vadd.f32 %v3766_v22, %v3718_v36  ;;  %v6489_v22 = vld [vmem:[#allocation11 + $0x1d0] sm:$0xff] }
 0x42c   : > { %4633 = vmatpush.bf16.msra.mxu1 %v6489_v22  ;;  %v6456_v22 = vld [vmem:[#allocation4 + $0x38] sm:$0xf0] }
 0x430   : > { %v3719_v38 = vpop.f32.mrf.mxu2  ;;  %4634 = vmatpush.bf16.msra.mxu1 %v6488_v27  ;;  %v6459_v27 = vld [vmem:[#allocation4 + $0x50] sm:$0xf0] }
 0x431   : > { %v3720_v51 = vadd.f32 %v3719_v38, %v3670_v25  ;;  %v3768_v21 = vpop.f32.mrf.mxu3  ;;  %v3673_v42 = vpop.f32.mrf.mxu1 }
 0x433   : > { %v8130_v3 = vadd.f32 %v3768_v21, %v3720_v51  ;;  %v6486_v51 = vld [vmem:[#allocation11 + $0x1b8] sm:$0xff] }
 0x434   : > { %4091 = vmatmul.bf16.gmra.mxu1 %v5818_v19  ;;  %4579 = vmatpush.bf16.msra.mxu0 %v6486_v51 }
 0x435   : > { %4140 = vmatmul.bf16.gmra.mxu2 %v5822_v24  ;;  %v5854_v24 = vor.u32 %v6372_v43, %v5853_v29  ;;  %v6379_v29 = vld [vmem:[#allocation4 + $0xa0] sm:$0xf0] }
 0x436   : > { %4189 = vmatmul.bf16.gmra.mxu3 %v5826_v48 }
 0x438   : > { %v3722_v34 = vpop.f32.mrf.mxu2 }
 0x439   : > { %v3723_v12 = vadd.f32 %v3722_v34, %v3673_v42  ;;  %v3771_v50 = vpop.f32.mrf.mxu3  ;;  %v3675_v11 = vpop.f32.mrf.mxu1  ;;  %v5858_v42 = vor.u32 %v6371_v52, %v5855_v6 }
 0x43b   : > { %v8132_v18 = vadd.f32 %v3771_v50, %v3723_v12  ;;  %v6485_v12 = vld [vmem:[#allocation11 + $0x1b0] sm:$0xff]  ;;  %v6496_v50 = vld [vmem:[#allocation11 + $0x208] sm:$0xff] }
 0x43c   : > { %4580 = vmatpush.bf16.msra.mxu0 %v6485_v12  ;;  %4683 = vmatpush.bf16.msra.mxu2 %v6496_v50  ;;  %v5889_v50 = vld [vmem:[#allocation4 + $0xa8] sm:$0xf] }
 0x440   : > { %v3724_v9 = vpop.f32.mrf.mxu2  ;;  %4684 = vmatpush.bf16.msra.mxu2 %v6495_v30  ;;  %v5999_v30 = vld [vmem:[#allocation4 + $0x3c] sm:$0xf0] }
 0x441   : > { %v3725_v58 = vadd.f32 %v3724_v9, %v3675_v11  ;;  %v3773_v7 = vpop.f32.mrf.mxu3  ;;  %v3678_v5 = vpop.f32.mrf.mxu1  ;;  %v6484_v11 = vld [vmem:[#allocation11 + $0x1a8] sm:$0xff] }
 0x442   : > { %4581 = vmatpush.bf16.msra.mxu0 %v6484_v11  ;;  %v5865_v9 = vld [vmem:[#allocation4 + $0x78] sm:$0xf]  ;;  %v6380_v11 = vld [vmem:[#allocation4 + $0xac] sm:$0xf] }
 0x443   : > { %v8134_v59 = vadd.f32 %v3773_v7, %v3725_v58  ;;  %v6375_v58 = vld [vmem:[#allocation4 + $0x80] sm:$0xf0]  ;;  %v6374_v7 = vld [vmem:[#allocation4 + $0x7c] sm:$0xf] }
 0x444   : > { %4096 = vmatmul.bf16.gmra.mxu1 %v5830_v4  ;;  %v5867_v4 = vld [vmem:[#allocation4 + $0x84] sm:$0xf0] }
 0x445   : > { %4145 = vmatmul.bf16.gmra.mxu2 %v5834_v23  ;;  %v5873_v23 = vld [vmem:[#allocation4 + $0x80] sm:$0xf]  ;;  %v5870_v37 = vor.u32 %v6374_v7, %v5867_v4 }
 0x446   : > { %4194 = vmatmul.bf16.gmra.mxu3 %v5838_v54  ;;  %4582 = vmatpush.bf16.msra.mxu0 %v6483_v15  ;;  %v6382_v15 = vld [vmem:[#allocation4 + $0xb8] sm:$0xf0] }
 0x448   : > { %v3727_v17 = vpop.f32.mrf.mxu2 }
 0x449   : > { %v3728_v1 = vadd.f32 %v3727_v17, %v3678_v5  ;;  %v3776_v14 = vpop.f32.mrf.mxu3  ;;  %v3680_v55 = vpop.f32.mrf.mxu1  ;;  %v6376_v5 = vld [vmem:[#allocation4 + $0x88] sm:$0xf0] }
 0x44a   : > { %v5874_v0 = vor.u32 %v6376_v5, %v5873_v23  ;;  %4583 = vmatpush.bf16.msra.mxu0 %v6482_v57 }
 0x44b   : > { %v8136_v56 = vadd.f32 %v3776_v14, %v3728_v1  ;;  %v5866_v14 = vor.u32 %v6375_v58, %v5865_v9 }
 0x44e   : > { %4584 = vmatpush.bf16.msra.mxu0 %v6481_v31  ;;  %v6455_v31 = vld [vmem:[#allocation4 + $0x34] sm:$0xf] }
 0x450   : > { %v3729_v13 = vpop.f32.mrf.mxu2 }
 0x451   : > { %v3730_v33 = vadd.f32 %v3729_v13, %v3680_v55  ;;  %v3778_v32 = vpop.f32.mrf.mxu3  ;;  %v3683_v35 = vpop.f32.mrf.mxu1 }
 0x452   : > { %4585 = vmatpush.bf16.msra.mxu0 %v6480_v8  ;;  %v6457_v8 = vld [vmem:[#allocation4 + $0x40] sm:$0xf0] }
 0x453   : > { %v8138_v60 = vadd.f32 %v3778_v32, %v3730_v33  ;;  %v6487_v32 = vld [vmem:[#allocation11 + $0x1c0] sm:$0xff] }
 0x454   : > { %4101 = vmatmul.bf16.gmra.mxu1 %v5842_v49 }
 0x455   : > { %4150 = vmatmul.bf16.gmra.mxu2 %v5846_v62  ;;  %4635 = vmatpush.bf16.msra.mxu1 %v6487_v32 }
 0x456   : > { %4199 = vmatmul.bf16.gmra.mxu3 %v5850_v46  ;;  %v5877_v46 = vld [vmem:[#allocation4 + $0x90] sm:$0xf] }
 0x457   : > { %v5878_v63 = vor.u32 %v6378_v61, %v5877_v46  ;;  %v6002_v61 = vor.u32 %v6455_v31, %v5999_v30  ;;  %v6464_v31 = vld [vmem:[#allocation4 + $0x7c] sm:$0xf]  ;;  %v6035_v30 = vld [vmem:[#allocation4 + $0x84] sm:$0xf0] }
 0x458   : > { %v3732_v26 = vpop.f32.mrf.mxu2 }
 0x459   : > { %v3733_v20 = vadd.f32 %v3732_v26, %v3683_v35  ;;  %v3781_v36 = vpop.f32.mrf.mxu3  ;;  %v3685_v41 = vpop.f32.mrf.mxu1  ;;  %v6479_v35 = vld [vmem:[#allocation11 + $0x180] sm:$0xff] }
 0x45a   : > { %v6377_v26 = vld [vmem:[#allocation4 + $0x94] sm:$0xf]  ;;  %4586 = vmatpush.bf16.msra.mxu0 %v6479_v35 }
 0x45b   : > { %v8140_v25 = vadd.f32 %v3781_v36, %v3733_v20  ;;  %v5879_v20 = vld [vmem:[#allocation4 + $0x9c] sm:$0xf0]  ;;  %v5997_v36 = vld [vmem:[#allocation4 + $0x30] sm:$0xf] }
 0x45c   : > { %v5998_v43 = vor.u32 %v6456_v22, %v5997_v36 }
 0x45e   : > { %4587 = vmatmul.bf16.vlgmr.msra.gmra.mxu0 %v5998_v43 }
 0x460   : > { %v3734_v38 = vpop.f32.mrf.mxu2 }
 0x461   : > { %v3735_v21 = vadd.f32 %v3734_v38, %v3685_v41  ;;  %v3783_v19 = vpop.f32.mrf.mxu3  ;;  %v3688_v48 = vpop.f32.mrf.mxu1  ;;  %v5885_v41 = vld [vmem:[#allocation4 + $0x98] sm:$0xf]  ;;  %v5882_v38 = vor.u32 %v6377_v26, %v5879_v20 }
 0x463   : > { %v8142_v34 = vadd.f32 %v3783_v19, %v3735_v21  ;;  %v5886_v21 = vor.u32 %v6379_v29, %v5885_v41 }
 0x464   : > { %4106 = vmatmul.bf16.gmra.mxu1 %v5854_v24 }
 0x465   : > { %4155 = vmatmul.bf16.gmra.mxu2 %v5858_v42 }
 0x466   : > { %4204 = vmatmul.bf16.gmra.mxu3 %v5862_v40 }
 0x468   : > { %v3737_v10 = vpop.f32.mrf.mxu2 }
 0x469   : > { %v3738_v16 = vadd.f32 %v3737_v10, %v3688_v48  ;;  %v3786_v44 = vpop.f32.mrf.mxu3  ;;  %v3690_v28 = vpop.f32.mrf.mxu1  ;;  %v6381_v10 = vld [vmem:[#allocation4 + $0xb0] sm:$0xf0] }
 0x46a   : > { %v5890_v23 = vor.u32 %v6381_v10, %v5889_v50 }
 0x46b   : > { %v8144_v39 = vadd.f32 %v3786_v44, %v3738_v16  ;;  %v5891_v16 = vld [vmem:[#allocation4 + $0xb4] sm:$0xf0]  ;;  %v6009_v44 = vld [vmem:[#allocation4 + $0x48] sm:$0xf] }
 0x46c   : > { %v6010_v9 = vor.u32 %v6459_v27, %v6009_v44  ;;  %v5894_v5 = vor.u32 %v6380_v11, %v5891_v16  ;;  %v6461_v27 = vld [vmem:[#allocation4 + $0x64] sm:$0xf] }
 0x46e   : > { %4592 = vmatmul.bf16.gmra.mxu0 %v6010_v9  ;;  %v6463_v9 = vld [vmem:[#allocation4 + $0x70] sm:$0xf0] }
 0x470   : > { %v3739_v54 = vpop.f32.mrf.mxu2 }
 0x471   : > { %v3740_v17 = vadd.f32 %v3739_v54, %v3690_v28  ;;  %v3788_v1 = vpop.f32.mrf.mxu3  ;;  %v3693_v55 = vpop.f32.mrf.mxu1  ;;  %v5897_v28 = vld [vmem:[#allocation4 + $0xb0] sm:$0xf] }
 0x472   : > { %v5898_v57 = vor.u32 %v6382_v15, %v5897_v28  ;;  %v6023_v28 = vld [vmem:[#allocation4 + $0x6c] sm:$0xf0]  ;;  %v6029_v15 = vld [vmem:[#allocation4 + $0x68] sm:$0xf] }
 0x473   : > { %v8146_v45 = vadd.f32 %v3788_v1, %v3740_v17 }
 0x474   : > { %4111 = vmatmul.bf16.gmra.mxu1 %v5866_v14 }
 0x475   : > { %4160 = vmatmul.bf16.gmra.mxu2 %v5870_v37 }
 0x476   : > { %4209 = vmatmul.bf16.gmra.mxu3 %v5874_v0 }
 0x478   : > { %v3742_v2 = vpop.f32.mrf.mxu2 }
 0x479   : > { %v3743_v13 = vadd.f32 %v3742_v2, %v3693_v55  ;;  %v3791_v33 = vpop.f32.mrf.mxu3  ;;  %v3695_v49 = vpop.f32.mrf.mxu1  ;;  %v6005_v2 = vld [vmem:[#allocation4 + $0x38] sm:$0xf] }
 0x47a   : > { %v6006_v26 = vor.u32 %v6457_v8, %v6005_v2  ;;  %v6041_v2 = vld [vmem:[#allocation4 + $0x80] sm:$0xf]  ;;  %v6466_v8 = vld [vmem:[#allocation4 + $0x88] sm:$0xf0] }
 0x47b   : > { %v8148_v62 = vadd.f32 %v3791_v33, %v3743_v13  ;;  %v6021_v13 = vld [vmem:[#allocation4 + $0x60] sm:$0xf]  ;;  %v6462_v33 = vld [vmem:[#allocation4 + $0x68] sm:$0xf0] }
 0x47c   : > { %v6022_v32 = vor.u32 %v6462_v33, %v6021_v13  ;;  %v6057_v13 = vld [vmem:[#allocation4 + $0xa8] sm:$0xf]  ;;  %v6471_v33 = vld [vmem:[#allocation4 + $0xb0] sm:$0xf0] }
 0x47e   : > { %4597 = vmatmul.bf16.gmra.mxu0 %v6022_v32  ;;  %v6058_v32 = vor.u32 %v6471_v33, %v6057_v13 }
 0x480   : > { %v3744_v52 = vpop.f32.mrf.mxu2 }
 0x481   : > { %v3745_v6 = vadd.f32 %v3744_v52, %v3695_v49  ;;  %v3793_v53 = vpop.f32.mrf.mxu3  ;;  %v3698_v51 = vpop.f32.mrf.mxu1 }
 0x483   : > { %v8150_v19 = vadd.f32 %v3793_v53, %v3745_v6  ;;  %v6458_v6 = vld [vmem:[#allocation4 + $0x4c] sm:$0xf]  ;;  %v6011_v53 = vld [vmem:[#allocation4 + $0x54] sm:$0xf0] }
 0x484   : > { %4116 = vmatmul.bf16.gmra.mxu1 %v5878_v63  ;;  %v6017_v63 = vld [vmem:[#allocation4 + $0x50] sm:$0xf] }
 0x485   : > { %4165 = vmatmul.bf16.gmra.mxu2 %v5882_v38  ;;  %v6460_v38 = vld [vmem:[#allocation4 + $0x58] sm:$0xf0] }
 0x486   : > { %4214 = vmatmul.bf16.gmra.mxu3 %v5886_v21  ;;  %v6465_v21 = vld [vmem:[#allocation4 + $0x80] sm:$0xf0] }
 0x488   : > { %v3747_v24 = vpop.f32.mrf.mxu2 }
 0x489   : > { %v3748_v42 = vadd.f32 %v3747_v24, %v3698_v51  ;;  %v3796_v48 = vpop.f32.mrf.mxu3  ;;  %v3700_v40 = vpop.f32.mrf.mxu1  ;;  %v6033_v51 = vld [vmem:[#allocation4 + $0x78] sm:$0xf] }
 0x48a   : > { %v6034_v24 = vor.u32 %v6465_v21, %v6033_v51 }
 0x48b   : > { %v8152_v12 = vadd.f32 %v3796_v48, %v3748_v42 }
 0x48e   : > { %4602 = vmatmul.bf16.gmra.mxu0 %v6034_v24 }
 0x490   : > { %v3749_v58 = vpop.f32.mrf.mxu2 }
 0x491   : > { %v3750_v7 = vadd.f32 %v3749_v58, %v3700_v40  ;;  %v3798_v4 = vpop.f32.mrf.mxu3  ;;  %v3703_v54 = vpop.f32.mrf.mxu1  ;;  %v6014_v40 = vor.u32 %v6458_v6, %v6011_v53  ;;  %v6045_v58 = vld [vmem:[#allocation4 + $0x90] sm:$0xf]  ;;  %v6053_v6 = vld [vmem:[#allocation4 + $0x98] sm:$0xf]  ;;  %v6469_v53 = vld [vmem:[#allocation4 + $0xa0] sm:$0xf0] }
 0x493   : > { %v8154_v17 = vadd.f32 %v3798_v4, %v3750_v7  ;;  %v6468_v7 = vld [vmem:[#allocation4 + $0x98] sm:$0xf0] }
 0x494   : > { %4121 = vmatmul.bf16.gmra.mxu1 %v5890_v23  ;;  %v6046_v4 = vor.u32 %v6468_v7, %v6045_v58 }
 0x495   : > { %4170 = vmatmul.bf16.gmra.mxu2 %v5894_v5 }
 0x496   : > { %4219 = vmatmul.bf16.gmra.mxu3 %v5898_v57 }
 0x498   : > { %v3752_v1 = vpop.f32.mrf.mxu2 }
 0x499   : > { %v3753_v14 = vadd.f32 %v3752_v1, %v3703_v54  ;;  %v3801_v37 = vpop.f32.mrf.mxu3  ;;  %v3705_v55 = vpop.f32.mrf.mxu1  ;;  %v6026_v54 = vor.u32 %v6461_v27, %v6023_v28  ;;  %v6065_v27 = vld [vmem:[#allocation4 + $0xb0] sm:$0xf]  ;;  %v6472_v28 = vld [vmem:[#allocation4 + $0xb8] sm:$0xf0] }
 0x49b   : > { %v8156_v0 = vadd.f32 %v3801_v37, %v3753_v14 }
 0x49e   : > { %4607 = vmatmul.bf16.gmra.mxu0 %v6046_v4 }
 0x4a0   : > { %v3754_v49 = vpop.f32.mrf.mxu2 }
 0x4a1   : > { %v3755_v35 = vadd.f32 %v3754_v49, %v3705_v55  ;;  %v3803_v46 = vpop.f32.mrf.mxu3  ;;  %v4087_v20 = vpop.f32.mrf.mxu1 }
 0x4a2   : > { %v4088_v22 = vadd.f32 %v4087_v20, %v8128_v47  ;;  %v6018_v47 = vor.u32 %v6460_v38, %v6017_v63  ;;  %v6069_v63 = vld [vmem:[#allocation4 + $0xc0] sm:$0xf]  ;;  %v6474_v38 = vld [vmem:[#allocation4 + $0xc8] sm:$0xf0] }
 0x4a3   : > { %v8158_v36 = vadd.f32 %v3803_v46, %v3755_v35  ;;  %v6038_v46 = vor.u32 %v6464_v31, %v6035_v30  ;;  %v6070_v51 = vor.u32 %v6474_v38, %v6069_v63  ;;  %v6077_v31 = vld [vmem:[#allocation4 + $0xc8] sm:$0xf]  ;;  %v6475_v30 = vld [vmem:[#allocation4 + $0xd0] sm:$0xf0] }
 0x4a4   : > { %4636 = vmatmul.bf16.vlgmr.msra.gmra.mxu1 %v6002_v61  ;;  %v6078_v33 = vor.u32 %v6475_v30, %v6077_v31 }
 0x4a5   : > { %4685 = vmatmul.bf16.vlgmr.msra.gmra.mxu2 %v6006_v26 }
 0x4a8   : > { %v4136_v41 = vpop.f32.mrf.mxu2 }
 0x4a9   : > { %v8161_v29 = vadd.f32 %v4136_v41, %v4088_v22  ;;  %v4089_v43 = vpop.f32.mrf.mxu1 }
 0x4aa   : > { %v4090_v52 = vadd.f32 %v4089_v43, %v8130_v3  ;;  %v6467_v43 = vld [vmem:[#allocation4 + $0x94] sm:$0xf] }
 0x4ae   : > { %4612 = vmatmul.bf16.gmra.mxu0 %v6058_v32 }
 0x4b0   : > { %v4138_v42 = vpop.f32.mrf.mxu2 }
 0x4b1   : > { %v8164_v48 = vadd.f32 %v4138_v42, %v4090_v52  ;;  %v4092_v50 = vpop.f32.mrf.mxu1  ;;  %v6047_v52 = vld [vmem:[#allocation4 + $0x9c] sm:$0xf0] }
 0x4b2   : > { %v4093_v10 = vadd.f32 %v4092_v50, %v8132_v18  ;;  %v6030_v18 = vor.u32 %v6463_v9, %v6029_v15  ;;  %v6050_v42 = vor.u32 %v6467_v43, %v6047_v52  ;;  %v6081_v15 = vld [vmem:[#allocation4 + $0xd8] sm:$0xf]  ;;  %v6477_v9 = vld [vmem:[#allocation4 + $0xe0] sm:$0xf0]  ;;  %v6478_v43 = vld [vmem:[#allocation4 + $0xe8] sm:$0xf0] }
 0x4b3   : > { %v6082_v58 = vor.u32 %v6477_v9, %v6081_v15 }
 0x4b4   : > { %4641 = vmatmul.bf16.gmra.mxu1 %v6014_v40 }
 0x4b5   : > { %4690 = vmatmul.bf16.gmra.mxu2 %v6018_v47 }
 0x4b8   : > { %v4141_v11 = vpop.f32.mrf.mxu2 }
 0x4b9   : > { %v8167_v3 = vadd.f32 %v4141_v11, %v4093_v10  ;;  %v4094_v16 = vpop.f32.mrf.mxu1 }
 0x4ba   : > { %v4095_v44 = vadd.f32 %v4094_v16, %v8134_v59  ;;  %v6470_v16 = vld [vmem:[#allocation4 + $0xac] sm:$0xf] }
 0x4be   : > { %4617 = vmatmul.bf16.gmra.mxu0 %v6070_v51 }
 0x4c0   : > { %v4143_v23 = vpop.f32.mrf.mxu2 }
 0x4c1   : > { %v8170_v5 = vadd.f32 %v4143_v23, %v4095_v44  ;;  %v4097_v57 = vpop.f32.mrf.mxu1  ;;  %v6059_v44 = vld [vmem:[#allocation4 + $0xb4] sm:$0xf0] }
 0x4c2   : > { %v4098_v1 = vadd.f32 %v4097_v57, %v8136_v56  ;;  %v6042_v56 = vor.u32 %v6466_v8, %v6041_v2  ;;  %v6062_v23 = vor.u32 %v6470_v16, %v6059_v44 }
 0x4c4   : > { %4646 = vmatmul.bf16.gmra.mxu1 %v6026_v54 }
 0x4c5   : > { %4695 = vmatmul.bf16.gmra.mxu2 %v6030_v18 }
 0x4c8   : > { %v4146_v14 = vpop.f32.mrf.mxu2 }
 0x4c9   : > { %v8173_v59 = vadd.f32 %v4146_v14, %v4098_v1  ;;  %v4099_v37 = vpop.f32.mrf.mxu1 }
 0x4ca   : > { %v4100_v55 = vadd.f32 %v4099_v37, %v8138_v60  ;;  %v6473_v37 = vld [vmem:[#allocation4 + $0xc4] sm:$0xf] }
 0x4ce   : > { %4622 = vmatmul.bf16.gmra.mxu0 %v6082_v58  ;;  %v8212_v58 = vld [vmem:[%s8374_s12] ss:$0 sm:$0xff] }
 0x4d0   : > { %v4148_v49 = vpop.f32.mrf.mxu2 }
 0x4d1   : > { %v8176_v35 = vadd.f32 %v4148_v49, %v4100_v55  ;;  %v4102_v61 = vpop.f32.mrf.mxu1  ;;  %v6071_v55 = vld [vmem:[#allocation4 + $0xcc] sm:$0xf0]  ;;  %v4185_v49 = vpop.f32.mrf.mxu3 }
 0x4d2   : > { %v4103_v26 = vadd.f32 %v4102_v61, %v8140_v25  ;;  %v6054_v25 = vor.u32 %v6469_v53, %v6053_v6  ;;  %v6074_v13 = vor.u32 %v6473_v37, %v6071_v55 }
 0x4d4   : > { %4651 = vmatmul.bf16.gmra.mxu1 %v6038_v46 }
 0x4d5   : > { %4700 = vmatmul.bf16.gmra.mxu2 %v6042_v56 }
 0x4d8   : > { %v4151_v20 = vpop.f32.mrf.mxu2 }
 0x4d9   : > { %v8179_v60 = vadd.f32 %v4151_v20, %v4103_v26  ;;  %v4104_v22 = vpop.f32.mrf.mxu1  ;;  %v6476_v20 = vld [vmem:[#allocation4 + $0xdc] sm:$0xf]  ;;  %v4187_v6 = vpop.f32.mrf.mxu3 }
 0x4da   : > { %v4105_v41 = vadd.f32 %v4104_v22, %v8142_v34  ;;  %v6083_v22 = vld [vmem:[#allocation4 + $0xe4] sm:$0xf0] }
 0x4db   : > { %v4588_v56 = vpop.f32.mrf.mxu0  ;;  %v6086_v63 = vor.u32 %v6476_v20, %v6083_v22 }
 0x4e0   : > { %v4153_v21 = vpop.f32.mrf.mxu2 }
 0x4e1   : > { %v8182_v24 = vadd.f32 %v4153_v21, %v4105_v41  ;;  %v4107_v40 = vpop.f32.mrf.mxu1  ;;  %v6089_v41 = vld [vmem:[#allocation4 + $0xe0] sm:$0xf] }
 0x4e2   : > { %v4108_v47 = vadd.f32 %v4107_v40, %v8144_v39  ;;  %v6066_v39 = vor.u32 %v6472_v28, %v6065_v27  ;;  %v4190_v40 = vpop.f32.mrf.mxu3 }
 0x4e3   : > { %v4590_v51 = vpop.f32.mrf.mxu0 }
 0x4e4   : > { %4656 = vmatmul.bf16.gmra.mxu1 %v6050_v42 }
 0x4e5   : > { %4705 = vmatmul.bf16.gmra.mxu2 %v6054_v25 }
 0x4e8   : > { %v4156_v50 = vpop.f32.mrf.mxu2 }
 0x4e9   : > { %v8185_v34 = vadd.f32 %v4156_v50, %v4108_v47  ;;  %v4109_v10 = vpop.f32.mrf.mxu1 }
 0x4ea   : > { %v4110_v11 = vadd.f32 %v4109_v10, %v8146_v45  ;;  %v4192_v44 = vpop.f32.mrf.mxu3 }
 0x4eb   : > { %v4593_v50 = vpop.f32.mrf.mxu0 }
 0x4f0   : > { %v4158_v7 = vpop.f32.mrf.mxu2 }
 0x4f1   : > { %v8188_v4 = vadd.f32 %v4158_v7, %v4110_v11  ;;  %v4112_v54 = vpop.f32.mrf.mxu1 }
 0x4f2   : > { %v4113_v18 = vadd.f32 %v4112_v54, %v8148_v62 }
 0x4f3   : > { %v4595_v28 = vpop.f32.mrf.mxu0 }
 0x4f4   : > { %4661 = vmatmul.bf16.gmra.mxu1 %v6062_v23 }
 0x4f5   : > { %4710 = vmatmul.bf16.gmra.mxu2 %v6066_v39  ;;  %v4195_v39 = vpop.f32.mrf.mxu3 }
 0x4f8   : > { %v4161_v57 = vpop.f32.mrf.mxu2 }
 0x4f9   : > { %v8191_v45 = vadd.f32 %v4161_v57, %v4113_v18  ;;  %v4114_v1 = vpop.f32.mrf.mxu1 }
 0x4fa   : > { %v4115_v14 = vadd.f32 %v4114_v1, %v8150_v19  ;;  %v4188_v1 = vadd.f32 %v4187_v6, %v8164_v48 }
 0x4fb   : > { %v4598_v57 = vpop.f32.mrf.mxu0 }
 0x500   : > { %v4163_v2 = vpop.f32.mrf.mxu2 }
 0x501   : > { %v8194_v8 = vadd.f32 %v4163_v2, %v4115_v14  ;;  %v4117_v32 = vpop.f32.mrf.mxu1  ;;  %v4191_v2 = vadd.f32 %v4190_v40, %v8167_v3 }
 0x502   : > { %v4118_v62 = vadd.f32 %v4117_v32, %v8152_v12  ;;  %v6090_v12 = vor.u32 %v6478_v43, %v6089_v41 }
 0x504   : > { %4666 = vmatmul.bf16.gmra.mxu1 %v6074_v13  ;;  %v4197_v13 = vpop.f32.mrf.mxu3 }
 0x505   : > { %4715 = vmatmul.bf16.gmra.mxu2 %v6078_v33 }
 0x508   : > { %v4166_v46 = vpop.f32.mrf.mxu2 }
 0x509   : > { %v8197_v61 = vadd.f32 %v4166_v46, %v4118_v62  ;;  %v4119_v19 = vpop.f32.mrf.mxu1  ;;  %v4600_v62 = vpop.f32.mrf.mxu0 }
 0x50a   : > { %v4120_v26 = vadd.f32 %v4119_v19, %v8154_v17  ;;  %v4193_v19 = vadd.f32 %v4192_v44, %v8170_v5 }
 0x50c   : > { %v4200_v22 = vpop.f32.mrf.mxu3 }
 0x510   : > { %v4168_v52 = vpop.f32.mrf.mxu2 }
 0x511   : > { %v8200_v53 = vadd.f32 %v4168_v52, %v4120_v26  ;;  %v4122_v38 = vpop.f32.mrf.mxu1  ;;  %v4603_v43 = vpop.f32.mrf.mxu0 }
 0x512   : > { %v4123_v21 = vadd.f32 %v4122_v38, %v8156_v0  ;;  %v4186_v0 = vadd.f32 %v4185_v49, %v8161_v29 }
 0x514   : > { %4671 = vmatmul.bf16.gmra.mxu1 %v6086_v63  ;;  %v4196_v63 = vadd.f32 %v4195_v39, %v8173_v59 }
 0x515   : > { %4720 = vmatmul.bf16.gmra.mxu2 %v6090_v12 }
 0x518   : > { %v4171_v42 = vpop.f32.mrf.mxu2 }
 0x519   : > { %v8203_v25 = vadd.f32 %v4171_v42, %v4123_v21  ;;  %v4124_v17 = vpop.f32.mrf.mxu1  ;;  %v4202_v21 = vpop.f32.mrf.mxu3 }
 0x51a   : > { %v4125_v47 = vadd.f32 %v4124_v17, %v8158_v36  ;;  %v4605_v42 = vpop.f32.mrf.mxu0 }
 0x520   : > { %v4173_v10 = vpop.f32.mrf.mxu2 }
 0x521   : > { %v8206_v11 = vadd.f32 %v4173_v10, %v4125_v47  ;;  %v4637_v16 = vpop.f32.mrf.mxu1  ;;  %v4198_v47 = vadd.f32 %v4197_v13, %v8176_v35 }
 0x522   : > { %v4638_v27 = vadd.f32 %v4637_v16, %v4588_v56 }
 0x528   : > { %v4686_v15 = vpop.f32.mrf.mxu2 }
 0x529   : > { %v4687_v9 = vadd.f32 %v4686_v15, %v4638_v27  ;;  %v4639_v36 = vpop.f32.mrf.mxu1  ;;  %v4205_v27 = vpop.f32.mrf.mxu3 }
 0x52a   : > { %v4640_v54 = vadd.f32 %v4639_v36, %v4590_v51  ;;  %v4608_v15 = vpop.f32.mrf.mxu0 }
 0x52b   : > { %v4726_v7 = vadd.f32 %v4687_v9, %v4186_v0  ;;  %v4201_v0 = vadd.f32 %v4200_v22, %v8179_v60 }
 0x52d   : > { %v4746_v23 = vadd.f32 %v8212_v58, %v4726_v7 }
 0x52f   : > { %4762 = vst [vmem:[%s7125_s25] sm:$0xff] %v4746_v23 }
 0x530   : > { %v4688_v18 = vpop.f32.mrf.mxu2 }
 0x531   : > { %v4689_v29 = vadd.f32 %v4688_v18, %v4640_v54  ;;  %v4642_v14 = vpop.f32.mrf.mxu1  ;;  %v4203_v54 = vadd.f32 %v4202_v21, %v8182_v24  ;;  %v4207_v18 = vpop.f32.mrf.mxu3 }
 0x532   : > { %v4643_v31 = vadd.f32 %v4642_v14, %v4593_v50 }
 0x533   : > { %v4727_v37 = vadd.f32 %v4689_v29, %v4188_v1  ;;  %v4610_v29 = vpop.f32.mrf.mxu0 }
 0x535   : > { %v4747_v55 = vadd.f32 %v8212_v58, %v4727_v37 }
 0x537   : > { %4763 = vst [vmem:[%s7125_s25 + $0x8] sm:$0xff] %v4747_v55 }
 0x538   : > { %v4691_v30 = vpop.f32.mrf.mxu2 }
 0x539   : > { %v4692_v33 = vadd.f32 %v4691_v30, %v4643_v31  ;;  %v4644_v32 = vpop.f32.mrf.mxu1  ;;  %v4206_v31 = vadd.f32 %v4205_v27, %v8185_v34  ;;  %v4210_v13 = vpop.f32.mrf.mxu3 }
 0x53a   : > { %v4645_v48 = vadd.f32 %v4644_v32, %v4595_v28 }
 0x53b   : > { %v4728_v49 = vadd.f32 %v4692_v33, %v4191_v2  ;;  %v4613_v32 = vpop.f32.mrf.mxu0 }
 0x53d   : > { %v4748_v46 = vadd.f32 %v8212_v58, %v4728_v49 }
 0x53f   : > { %4764 = vst [vmem:[%s7125_s25 + $0x10] sm:$0xff] %v4748_v46  ;;  %v4208_v46 = vadd.f32 %v4207_v18, %v8188_v4 }
 0x540   : > { %v4693_v56 = vpop.f32.mrf.mxu2 }
 0x541   : > { %v4694_v26 = vadd.f32 %v4693_v56, %v4645_v48  ;;  %v4647_v20 = vpop.f32.mrf.mxu1 }
 0x542   : > { %v4648_v52 = vadd.f32 %v4647_v20, %v4598_v57 }
 0x543   : > { %v4729_v41 = vadd.f32 %v4694_v26, %v4193_v19  ;;  %v4212_v26 = vpop.f32.mrf.mxu3  ;;  %v4615_v22 = vpop.f32.mrf.mxu0 }
 0x544   : > { %v4213_v21 = vadd.f32 %v4212_v26, %v8194_v8 }
 0x545   : > { %v4749_v3 = vadd.f32 %v8212_v58, %v4729_v41 }
 0x547   : > { %4765 = vst [vmem:[%s7125_s25 + $0x18] sm:$0xff] %v4749_v3 }
 0x548   : > { %v4696_v6 = vpop.f32.mrf.mxu2 }
 0x549   : > { %v4697_v12 = vadd.f32 %v4696_v6, %v4648_v52  ;;  %v4649_v38 = vpop.f32.mrf.mxu1 }
 0x54a   : > { %v4650_v17 = vadd.f32 %v4649_v38, %v4600_v62 }
 0x54b   : > { %v4730_v51 = vadd.f32 %v4697_v12, %v4196_v63  ;;  %v4215_v4 = vpop.f32.mrf.mxu3  ;;  %v4618_v38 = vpop.f32.mrf.mxu0 }
 0x54d   : > { %v4750_v5 = vadd.f32 %v8212_v58, %v4730_v51 }
 0x54f   : > { %4766 = vst [vmem:[%s7125_s25 + $0x20] sm:$0xff] %v4750_v5 }
 0x550   : > { %v4698_v40 = vpop.f32.mrf.mxu2 }
 0x551   : > { %v4699_v50 = vadd.f32 %v4698_v40, %v4650_v17  ;;  %v4652_v10 = vpop.f32.mrf.mxu1 }
 0x552   : > { %v4653_v59 = vadd.f32 %v4652_v10, %v4603_v43  ;;  %v4211_v43 = vadd.f32 %v4210_v13, %v8191_v45 }
 0x553   : > { %v4731_v16 = vadd.f32 %v4699_v50, %v4198_v47  ;;  %v4216_v50 = vadd.f32 %v4215_v4, %v8197_v61  ;;  %v4217_v10 = vpop.f32.mrf.mxu3 }
 0x555   : > { %v4751_v44 = vadd.f32 %v8212_v58, %v4731_v16 }
 0x557   : > { %4767 = vst [vmem:[%s7125_s25 + $0x28] sm:$0xff] %v4751_v44  ;;  %v4620_v44 = vpop.f32.mrf.mxu0 }
 0x558   : > { %v4701_v28 = vpop.f32.mrf.mxu2 }
 0x559   : > { %v4702_v9 = vadd.f32 %v4701_v28, %v4653_v59  ;;  %v4654_v36 = vpop.f32.mrf.mxu1 }
 0x55a   : > { %v4655_v35 = vadd.f32 %v4654_v36, %v4605_v42 }
 0x55b   : > { %v4732_v7 = vadd.f32 %v4702_v9, %v4201_v0  ;;  %v4218_v0 = vadd.f32 %v4217_v10, %v8200_v53 }
 0x55d   : > { %v4752_v23 = vadd.f32 %v8212_v58, %v4732_v7 }
 0x55f   : > { %4768 = vst [vmem:[%s7125_s25 + $0x30] sm:$0xff] %v4752_v23  ;;  %v4220_v23 = vpop.f32.mrf.mxu3  ;;  %v4623_v61 = vpop.f32.mrf.mxu0 }
 0x560   : > { %v4703_v39 = vpop.f32.mrf.mxu2  ;;  %v4221_v18 = vadd.f32 %v4220_v23, %v8203_v25 }
 0x561   : > { %v4704_v57 = vadd.f32 %v4703_v39, %v4655_v35  ;;  %v4657_v1 = vpop.f32.mrf.mxu1 }
 0x562   : > { %v4658_v60 = vadd.f32 %v4657_v1, %v4608_v15 }
 0x563   : > { %v4733_v14 = vadd.f32 %v4704_v57, %v4203_v54 }
 0x565   : > { %v4753_v37 = vadd.f32 %v8212_v58, %v4733_v14 }
 0x567   : > { %4769 = vst [vmem:[%s7125_s25 + $0x38] sm:$0xff] %v4753_v37  ;;  %v4222_v14 = vpop.f32.mrf.mxu3  ;;  %v4625_v37 = vpop.f32.mrf.mxu0 }
 0x568   : > { %v4706_v55 = vpop.f32.mrf.mxu2  ;;  %v4223_v25 = vadd.f32 %v4222_v14, %v8206_v11 }
 0x569   : > { %v4707_v30 = vadd.f32 %v4706_v55, %v4658_v60  ;;  %v4659_v2 = vpop.f32.mrf.mxu1 }
 0x56a   : > { %v4660_v62 = vadd.f32 %v4659_v2, %v4610_v29 }
 0x56b   : > { %v4734_v33 = vadd.f32 %v4707_v30, %v4206_v31 }
 0x56d   : > { %v4754_v24 = vadd.f32 %v8212_v58, %v4734_v33 }
 0x56f   : > { %4770 = vst [vmem:[%s7125_s25 + $0x40] sm:$0xff] %v4754_v24 }
 0x570   : > { %v4708_v49 = vpop.f32.mrf.mxu2 }
 0x571   : > { %v4709_v48 = vadd.f32 %v4708_v49, %v4660_v62  ;;  %v4662_v56 = vpop.f32.mrf.mxu1 }
 0x572   : > { %v4663_v20 = vadd.f32 %v4662_v56, %v4613_v32 }
 0x573   : > { %v4735_v19 = vadd.f32 %v4709_v48, %v4208_v46 }
 0x575   : > { %v4755_v34 = vadd.f32 %v8212_v58, %v4735_v19 }
 0x577   : > { %4771 = vst [vmem:[%s7125_s25 + $0x48] sm:$0xff] %v4755_v34 }
 0x578   : > { %v4711_v41 = vpop.f32.mrf.mxu2 }
 0x579   : > { %v4712_v3 = vadd.f32 %v4711_v41, %v4663_v20  ;;  %v4664_v52 = vpop.f32.mrf.mxu1 }
 0x57a   : > { %v4665_v12 = vadd.f32 %v4664_v52, %v4615_v22 }
 0x57b   : > { %v4736_v6 = vadd.f32 %v4712_v3, %v4211_v43 }
 0x57d   : > { %v4756_v63 = vadd.f32 %v8212_v58, %v4736_v6 }
 0x57f   : > { %4772 = vst [vmem:[%s7125_s25 + $0x50] sm:$0xff] %v4756_v63 }
 0x580   : > { %v4713_v51 = vpop.f32.mrf.mxu2 }
 0x581   : > { %v4714_v5 = vadd.f32 %v4713_v51, %v4665_v12  ;;  %v4667_v42 = vpop.f32.mrf.mxu1 }
 0x582   : > { %v4668_v45 = vadd.f32 %v4667_v42, %v4618_v38 }
 0x583   : > { %v4737_v17 = vadd.f32 %v4714_v5, %v4213_v21 }
 0x585   : > { %v4757_v40 = vadd.f32 %v8212_v58, %v4737_v17 }
 0x587   : > { %4773 = vst [vmem:[%s7125_s25 + $0x58] sm:$0xff] %v4757_v40 }
 0x588   : > { %v4716_v47 = vpop.f32.mrf.mxu2 }
 0x589   : > { %v4717_v16 = vadd.f32 %v4716_v47, %v4668_v45  ;;  %v4669_v59 = vpop.f32.mrf.mxu1 }
 0x58a   : > { %v4670_v8 = vadd.f32 %v4669_v59, %v4620_v44 }
 0x58b   : > { %v4738_v27 = vadd.f32 %v4717_v16, %v4216_v50 }
 0x58d   : > { %v4758_v28 = vadd.f32 %v8212_v58, %v4738_v27 }
 0x58f   : > { %4774 = vst [vmem:[%s7125_s25 + $0x60] sm:$0xff] %v4758_v28 }
 0x590   : > { %v4718_v15 = vpop.f32.mrf.mxu2 }
 0x591   : > { %v4719_v9 = vadd.f32 %v4718_v15, %v4670_v8  ;;  %v4672_v36 = vpop.f32.mrf.mxu1 }
 0x592   : > { %v4673_v39 = vadd.f32 %v4672_v36, %v4623_v61 }
 0x593   : > { %v4739_v7 = vadd.f32 %v4719_v9, %v4218_v0 }
 0x595   : > { %v4759_v35 = vadd.f32 %v8212_v58, %v4739_v7 }
 0x597   : > { %4775 = vst [vmem:[%s7125_s25 + $0x68] sm:$0xff] %v4759_v35 }
 0x598   : > { %v4721_v54 = vpop.f32.mrf.mxu2 }
 0x599   : > { %v4722_v57 = vadd.f32 %v4721_v54, %v4673_v39  ;;  %v4674_v29 = vpop.f32.mrf.mxu1 }
 0x59a   : > { %v4675_v60 = vadd.f32 %v4674_v29, %v4625_v37 }
 0x59b   : > { %v4740_v1 = vadd.f32 %v4722_v57, %v4221_v18 }
 0x59d   : > { %v4760_v53 = vadd.f32 %v8212_v58, %v4740_v1 }
 0x59f   : > { %4776 = vst [vmem:[%s7125_s25 + $0x70] sm:$0xff] %v4760_v53 }
 0x5a0   : > { %v4723_v55 = vpop.f32.mrf.mxu2 }
 0x5a1   : > { %v4724_v31 = vadd.f32 %v4723_v55, %v4675_v60 }
 0x5a3   : > { %v4741_v30 = vadd.f32 %v4724_v31, %v4223_v25 }
 0x5a5   : > { %v4761_v2 = vadd.f32 %v8212_v58, %v4741_v30 }
 0x5a7   : > { %4777 = vst [vmem:[%s7125_s25 + $0x78] sm:$0xff] %v4761_v2 }
 0x5a8   : > { %6816 = shalt.err (!%p6813_p1)
}
 0x5a9   : > { %s6911_s2 = smov 128   ;;  %s6912_s25 = smov 8  }
 0x5aa   : > { %6537 = dma.vmem_to_hbm [thread:$0]  (%p7049_p5), %s4794_s13, 2048, %s4796_s11, %s4779_s20, %s6911_s2, %s6911_s2, %s6912_s25  }
 0x5ab PF: > { %s8377_s24 = sld [smem:[#allocation24_spill]]  ;;  %p6563_p4 = scmp.ge.s32.totalorder %s6899_s28, 2 }
 0x5ad   : > { %p6551_p10 = pnand %p6563_p4, %p7007_p6 }
 0x5af   : > { %p6552_p11 = pneg %p6551_p10 }
 0x5b1   : > { %s4810_s12 = sand.u32 1, %s8377_s24  }
 0x5b2   : > { %s4811_s9 = scalar_lea.sflag [#allocation8], %s4810_s12 }
 0x5b3   : > { %6866 = dma.done.wait (%p6552_p11), %s4811_s9, 2048  }
 0x5b4   : > { %6868 = vsyncadd (%p6552_p11), %s4811_s9, 4294965248  ;;  %s23_s28 = sadd.s32 1, %s6899_s28   ;;  %s8379_s17 = sld [smem:[#allocation26_spill]] }
 0x5b5   : > { %p20_p12 = scmp.ge.s32.totalorder %s23_s28, 6   ;;  %s8380_s21 = smov %s6875_s22 }
 0x5b6   : > { %s8381_s22 = smov %s6879_s23  ;;  %s8382_s23 = smov %s7062_s10 }
 0x5b7   : > { %s8383_s24 = smov %s6891_s26  ;;  %s8384_s25 = smov %s6895_s27 }
 0x5b8   : > { %s8386_s27 = smov %s8392_s15  ;;  %22 = sbr.rel (!%p20_p12) target bundleno = 14 (0xe), region = 151 }
 0x5ba   : > { %s8385_s26 = smov %s8379_s17 }
 0x5bd   :  { %4817 = vsyncpa [#allocation7], 1 }
 0x5be   :  { %4819 = vsyncpa [#allocation7 + $0x1], 1 }
 0x5bf   :  { %4820 = vsyncpa [#allocation10], 1 }
 0x5c0   :  { %4821 = vsyncpa [#allocation8], 1 }
 0x5c1   :  { %4823 = vsyncpa [#allocation8 + $0x1], 1 }
 0x5c2   :  { %4824 = vsyncmov [#allocation5] }
 0x5c5   :  { %s4825_s16 = vpop.sfrf %4824 }
 0x5c6   :  { %p6193_p6 = scmp.ne.s32.totalorder %s4825_s16, 0 }
 0x5c8   :  { %4829 = shalt.err (%p6193_p6)  }
 0x5c9   :  { %4831 = vsyncmov [#allocation5 + $0x1] }
 0x5cc   :  { %s4832_s10 = vpop.sfrf %4831 }
 0x5cd   :  { %p6194_p5 = scmp.ne.s32.totalorder %s4832_s10, 0 }
 0x5cf   :  { %4836 = shalt.err (%p6194_p5)  }

</bundles_post_ra>
